<compile_context>
chip_gen: v5e
topology: v5e:2x2
jax: 0.10.0
libtpu: 0.0.40
codegen_flags: <defaults>
</compile_context>

<pallas_src>
import functools

import jax
import jax.numpy as jnp
from jax.experimental import pallas as pl
from jax.experimental.pallas import tpu as pltpu

LATENT_DIM = 40
LATENT_PAD = 64           # latent zero-padded to 64 -> fused head is 128 lanes wide
IN_DIM = 28 * 28          # 784
H1 = 512
H2 = 256


def _round_up(n, m):
    return (n + m - 1) // m * m


def _vae_kernel(x_ref, eps_ref,
                w1_ref, b1_ref, w2_ref, b2_ref,
                wh_ref, bh_ref,
                wd1_ref, bd1_ref, wd2_ref, bd2_ref,
                wout_ref, bout_ref,
                recon_ref, heads_ref):
    # ---- encoder: Linear(784,512)+ReLU, Linear(512,256)+ReLU (bf16 in, f32 acc) ----
    x = x_ref[...]                                                    # (TB, 784) bf16
    h1 = jnp.dot(x, w1_ref[...], preferred_element_type=jnp.float32) + b1_ref[...]
    h1 = jnp.maximum(h1, 0.0).astype(jnp.bfloat16)
    h2 = jnp.dot(h1, w2_ref[...], preferred_element_type=jnp.float32) + b2_ref[...]
    h2 = jnp.maximum(h2, 0.0).astype(jnp.bfloat16)

    # ---- fused mu|logvar heads: one (256, 2*LATENT_PAD=128) matmul ----
    heads = jnp.dot(h2, wh_ref[...], preferred_element_type=jnp.float32) + bh_ref[...]
    mu = heads[:, :LATENT_PAD]
    logvar = heads[:, LATENT_PAD:]

    # ---- reparameterize in f32: z = mu + eps * exp(0.5*logvar) ----
    # Padded latent columns have mu=0, logvar=0, eps=0  ->  z=0, and the padded
    # rows of wd1 are zero, so the decoder result is unchanged.
    z = (mu + eps_ref[...] * jnp.exp(0.5 * logvar)).astype(jnp.bfloat16)

    # ---- decoder: Linear(64->256)+ReLU, Linear(256,512)+ReLU, Linear(512,784) ----
    d1 = jnp.dot(z, wd1_ref[...], preferred_element_type=jnp.float32) + bd1_ref[...]
    d1 = jnp.maximum(d1, 0.0).astype(jnp.bfloat16)
    d2 = jnp.dot(d1, wd2_ref[...], preferred_element_type=jnp.float32) + bd2_ref[...]
    d2 = jnp.maximum(d2, 0.0).astype(jnp.bfloat16)
    logits = jnp.dot(d2, wout_ref[...], preferred_element_type=jnp.float32) + bout_ref[...]

    # f32 sigmoid (safe on v5e's f32-only EUP), bf16 store (halves HBM writeback).
    recon_ref[...] = jax.nn.sigmoid(logits).astype(jnp.bfloat16)      # (TB, 784) bf16
    heads_ref[...] = heads                                            # (TB, 128) f32


def prepare_params(params):
    """One-time host-side prep: fuse mu/logvar heads, pad latent to 64, cast to bf16."""
    (w1, b1, w2, b2, wmu, bmu, wlv, blv, wd1, bd1, wd2, bd2, wout, bout) = params

    wh = jnp.zeros((H2, 2 * LATENT_PAD), jnp.float32)
    wh = wh.at[:, :LATENT_DIM].set(wmu).at[:, LATENT_PAD:LATENT_PAD + LATENT_DIM].set(wlv)
    bh = jnp.zeros((1, 2 * LATENT_PAD), jnp.float32)
    bh = bh.at[:, :LATENT_DIM].set(bmu).at[:, LATENT_PAD:LATENT_PAD + LATENT_DIM].set(blv)
    wd1p = jnp.zeros((LATENT_PAD, H2), jnp.float32).at[:LATENT_DIM, :].set(wd1)

    bf = lambda a: a.astype(jnp.bfloat16)
    # weights in bf16 (halves HBM traffic / VMEM residency), biases stay f32.
    return (bf(w1), b1, bf(w2), b2, bf(wh), bh, bf(wd1p), bd1,
            bf(wd2), bd2, bf(wout), bout)


def _default_block_b(B):
    """Batch-tile heuristic: >=2 grid steps when B >= 256 (keeps both v7x TCs
    busy via the 'parallel' batch axis), tiles up to 512 rows, and small
    batches rounded to a multiple of 16 for dense bf16 sublane packing."""
    if B < 256:
        return _round_up(max(B, 1), 16)
    return min(512, _round_up(pl.cdiv(B, 2), 128))


@functools.partial(jax.jit, static_argnames=("block_b",))
def bernoulli_vae_forward(x_nchw, eps, prep_params, block_b=None):
    """x_nchw: (B, 1, 28, 28) f32.  eps: (B, LATENT_DIM) f32 ~ N(0,1).

    prep_params: output of prepare_params(params).
    Returns (recon[bf16], mu[f32], logvar[f32]).
    """
    B = x_nchw.shape[0]
    if block_b is None:
        block_b = _default_block_b(B)
    B_pad = _round_up(B, block_b)

    x = x_nchw.reshape(B, -1).astype(jnp.bfloat16)            # nn.Flatten + bf16 cast
    if B_pad != B:
        x = jnp.pad(x, ((0, B_pad - B), (0, 0)))
    # eps padded only to LATENT_PAD=64 (f32): half the bytes of the old 128-wide pad.
    eps_p = jnp.zeros((B_pad, LATENT_PAD), jnp.float32).at[:B, :LATENT_DIM].set(eps)

    grid = (B_pad // block_b,)

    in_specs = [
        pl.BlockSpec((block_b, IN_DIM), lambda i: (i, 0)),        # x tile (bf16)
        pl.BlockSpec((block_b, LATENT_PAD), lambda i: (i, 0)),    # eps tile (f32)
    ] + [
        # weights/biases: constant block index -> VMEM-resident across the grid
        pl.BlockSpec(p.shape, lambda i: (0, 0)) for p in prep_params
    ]
    out_specs = (
        pl.BlockSpec((block_b, IN_DIM), lambda i: (i, 0)),         # recon tile (bf16)
        pl.BlockSpec((block_b, 2 * LATENT_PAD), lambda i: (i, 0)), # fused mu|logvar (f32)
    )
    out_shapes = (
        jax.ShapeDtypeStruct((B_pad, IN_DIM), jnp.bfloat16),
        jax.ShapeDtypeStruct((B_pad, 2 * LATENT_PAD), jnp.float32),
    )

    weight_elems = (IN_DIM * H1 + H1 * H2 + H2 * 2 * LATENT_PAD
                    + LATENT_PAD * H2 + H2 * H1 + H1 * IN_DIM)
    bias_elems = H1 + H2 + 2 * LATENT_PAD + H2 + H1 + IN_DIM
    cost = pl.CostEstimate(
        flops=2 * B_pad * weight_elems,
        transcendentals=B_pad * (LATENT_PAD + IN_DIM),              # exp + sigmoid
        bytes_accessed=(weight_elems * 2 + bias_elems * 4           # resident, once
                        + B_pad * (IN_DIM * 2 + LATENT_PAD * 4)     # x bf16 + eps f32
                        + B_pad * (IN_DIM * 2 + 2 * LATENT_PAD * 4)),  # recon bf16 + heads f32
    )

    recon_p, heads_p = pl.pallas_call(
        _vae_kernel,
        out_shape=out_shapes,
        grid=grid,
        in_specs=in_specs,
        out_specs=out_specs,
        compiler_params=pltpu.CompilerParams(
            dimension_semantics=("parallel",),      # megacore sharding on v7x
            vmem_limit_bytes=32 << 20,              # safe on v7x's 64 MiB VMEM
        ),
        cost_estimate=cost,
    )(x, eps_p, *prep_params)

    recon = recon_p[:B]
    mu = heads_p[:B, :LATENT_DIM]
    logvar = heads_p[:B, LATENT_PAD:LATENT_PAD + LATENT_DIM]
    return recon, mu, logvar


def init_params(key):
    """Deterministic synthetic parameter init (shapes from BernoulliVAE.__init__)."""
    dims = [
        (IN_DIM, H1),        # encoder Linear(784, 512)
        (H1, H2),            # encoder Linear(512, 256)
        (H2, LATENT_DIM),    # fc_mu
        (H2, LATENT_DIM),    # fc_logvar
        (LATENT_DIM, H2),    # decoder Linear(40, 256)
        (H2, H1),            # decoder Linear(256, 512)
        (H1, IN_DIM),        # fc_out
    ]
    params = []
    keys = jax.random.split(key, len(dims))
    for k, (din, dout) in zip(keys, dims):
        kw, kb = jax.random.split(k)
        scale = 1.0 / jnp.sqrt(jnp.float32(din))
        w = jax.random.uniform(kw, (din, dout), jnp.float32, -scale, scale)
        b = jax.random.uniform(kb, (1, dout), jnp.float32, -scale, scale)
        params += [w, b]
    return tuple(params)


def _reference_forward(x_nchw, eps, params):
    """Pure-JAX f32 reference of the module forward (correctness check)."""
    (w1, b1, w2, b2, wmu, bmu, wlv, blv, wd1, bd1, wd2, bd2, wout, bout) = params
    x = x_nchw.reshape(x_nchw.shape[0], -1)
    h = jnp.maximum(x @ w1 + b1, 0.0)
    h = jnp.maximum(h @ w2 + b2, 0.0)
    mu = h @ wmu + bmu
    logvar = h @ wlv + blv
    z = mu + eps * jnp.exp(0.5 * logvar)
    d = jnp.maximum(z @ wd1 + bd1, 0.0)
    d = jnp.maximum(d @ wd2 + bd2, 0.0)
    recon = jax.nn.sigmoid(d @ wout + bout)
    return recon, mu, logvar


if __name__ == "__main__":
    key = jax.random.PRNGKey(0)
    kx, keps, kp = jax.random.split(key, 3)

    B = 32
    x = jax.random.uniform(kx, (B, 1, 28, 28), jnp.float32)        # NCHW, MNIST-like
    eps = jax.random.normal(keps, (B, LATENT_DIM), jnp.float32)    # reparam noise
    params = init_params(kp)
    prep = prepare_params(params)                                  # bf16 cast once

    # block_b=16 so the grid has 2 steps at this small test batch.
    recon, mu, logvar = bernoulli_vae_forward(x, eps, prep, block_b=16)
    jax.block_until_ready((recon, mu, logvar))

    # sanity check against pure-JAX f32 reference (bf16 matmuls/recon -> loose tol)
    r_ref, mu_ref, lv_ref = _reference_forward(x, eps, params)
    assert recon.shape == (B, IN_DIM) and recon.dtype == jnp.bfloat16
    assert mu.shape == (B, LATENT_DIM) and logvar.shape == (B, LATENT_DIM)
    assert jnp.allclose(recon.astype(jnp.float32), r_ref, atol=3e-2, rtol=3e-2)
    assert jnp.allclose(mu, mu_ref, atol=3e-2, rtol=3e-2)
    assert jnp.allclose(logvar, lv_ref, atol=3e-2, rtol=3e-2)

    print("KERNEL_OK")
</pallas_src>

<mosaic_0001>
module attributes {stable_mosaic.version = 11 : i64} {
  func.func @_vae_kernel(%arg0: i32, %arg1: memref<16x784xbf16, #tpu.memory_space<vmem>>, %arg2: memref<16x64xf32, #tpu.memory_space<vmem>>, %arg3: memref<784x512xbf16, #tpu.memory_space<vmem>>, %arg4: memref<1x512xf32, #tpu.memory_space<vmem>>, %arg5: memref<512x256xbf16, #tpu.memory_space<vmem>>, %arg6: memref<1x256xf32, #tpu.memory_space<vmem>>, %arg7: memref<256x128xbf16, #tpu.memory_space<vmem>>, %arg8: memref<1x128xf32, #tpu.memory_space<vmem>>, %arg9: memref<64x256xbf16, #tpu.memory_space<vmem>>, %arg10: memref<1x256xf32, #tpu.memory_space<vmem>>, %arg11: memref<256x512xbf16, #tpu.memory_space<vmem>>, %arg12: memref<1x512xf32, #tpu.memory_space<vmem>>, %arg13: memref<512x784xbf16, #tpu.memory_space<vmem>>, %arg14: memref<1x784xf32, #tpu.memory_space<vmem>>, %arg15: memref<16x784xbf16, #tpu.memory_space<vmem>>, %arg16: memref<16x128xf32, #tpu.memory_space<vmem>>) attributes {dimension_semantics = [#tpu.dimension_semantics<parallel>], iteration_bounds = array<i64: 2>, scalar_prefetch = 0 : i64, scratch_operands = 0 : i64, tpu.core_type = #tpu.core_type<tc>, window_params = [{transform_indices = @transform_0, window_bounds = array<i64: 16, 784>}, {transform_indices = @transform_1, window_bounds = array<i64: 16, 64>}, {pipeline_mode = #tpu.pipeline_mode<synchronous>, transform_indices = @transform_2, window_bounds = array<i64: 784, 512>}, {pipeline_mode = #tpu.pipeline_mode<synchronous>, transform_indices = @transform_3, window_bounds = array<i64: 1, 512>}, {pipeline_mode = #tpu.pipeline_mode<synchronous>, transform_indices = @transform_4, window_bounds = array<i64: 512, 256>}, {pipeline_mode = #tpu.pipeline_mode<synchronous>, transform_indices = @transform_5, window_bounds = array<i64: 1, 256>}, {pipeline_mode = #tpu.pipeline_mode<synchronous>, transform_indices = @transform_6, window_bounds = array<i64: 256, 128>}, {pipeline_mode = #tpu.pipeline_mode<synchronous>, transform_indices = @transform_7, window_bounds = array<i64: 1, 128>}, {pipeline_mode = #tpu.pipeline_mode<synchronous>, transform_indices = @transform_8, window_bounds = array<i64: 64, 256>}, {pipeline_mode = #tpu.pipeline_mode<synchronous>, transform_indices = @transform_9, window_bounds = array<i64: 1, 256>}, {pipeline_mode = #tpu.pipeline_mode<synchronous>, transform_indices = @transform_10, window_bounds = array<i64: 256, 512>}, {pipeline_mode = #tpu.pipeline_mode<synchronous>, transform_indices = @transform_11, window_bounds = array<i64: 1, 512>}, {pipeline_mode = #tpu.pipeline_mode<synchronous>, transform_indices = @transform_12, window_bounds = array<i64: 512, 784>}, {pipeline_mode = #tpu.pipeline_mode<synchronous>, transform_indices = @transform_13, window_bounds = array<i64: 1, 784>}, {transform_indices = @transform_14, window_bounds = array<i64: 16, 784>}, {transform_indices = @transform_15, window_bounds = array<i64: 16, 128>}]} {
    %c0 = arith.constant 0 : index
    %c0_0 = arith.constant 0 : index
    %0 = vector.load %arg1[%c0, %c0_0] : memref<16x784xbf16, #tpu.memory_space<vmem>>, vector<16x784xbf16>
    %c0_1 = arith.constant 0 : index
    %c0_2 = arith.constant 0 : index
    %1 = vector.load %arg3[%c0_1, %c0_2] : memref<784x512xbf16, #tpu.memory_space<vmem>>, vector<784x512xbf16>
    %cst = arith.constant dense<0.000000e+00> : vector<16x512xf32>
    %2 = tpu.matmul %0, %1, %cst {dimension_numbers = #tpu.dot_dimension_numbers<[1], [0], [0], [1], [0, 0, 1, 1], [], []>} : vector<16x784xbf16>, vector<784x512xbf16>, vector<16x512xf32> -> vector<16x512xf32>
    %c0_3 = arith.constant 0 : index
    %c0_4 = arith.constant 0 : index
    %3 = vector.load %arg4[%c0_3, %c0_4] : memref<1x512xf32, #tpu.memory_space<vmem>>, vector<1x512xf32>
    %4 = vector.broadcast %3 : vector<1x512xf32> to vector<16x512xf32>
    %5 = arith.addf %2, %4 : vector<16x512xf32>
    %cst_5 = arith.constant 0.000000e+00 : f32
    %6 = vector.broadcast %cst_5 : f32 to vector<16x512xf32>
    %7 = arith.maximumf %5, %6 : vector<16x512xf32>
    %8 = arith.truncf %7 : vector<16x512xf32> to vector<16x512xbf16>
    %c0_6 = arith.constant 0 : index
    %c0_7 = arith.constant 0 : index
    %9 = vector.load %arg5[%c0_6, %c0_7] : memref<512x256xbf16, #tpu.memory_space<vmem>>, vector<512x256xbf16>
    %cst_8 = arith.constant dense<0.000000e+00> : vector<16x256xf32>
    %10 = tpu.matmul %8, %9, %cst_8 {dimension_numbers = #tpu.dot_dimension_numbers<[1], [0], [0], [1], [0, 0, 1, 1], [], []>} : vector<16x512xbf16>, vector<512x256xbf16>, vector<16x256xf32> -> vector<16x256xf32>
    %c0_9 = arith.constant 0 : index
    %c0_10 = arith.constant 0 : index
    %11 = vector.load %arg6[%c0_9, %c0_10] : memref<1x256xf32, #tpu.memory_space<vmem>>, vector<1x256xf32>
    %12 = vector.broadcast %11 : vector<1x256xf32> to vector<16x256xf32>
    %13 = arith.addf %10, %12 : vector<16x256xf32>
    %cst_11 = arith.constant 0.000000e+00 : f32
    %14 = vector.broadcast %cst_11 : f32 to vector<16x256xf32>
    %15 = arith.maximumf %13, %14 : vector<16x256xf32>
    %16 = arith.truncf %15 : vector<16x256xf32> to vector<16x256xbf16>
    %c0_12 = arith.constant 0 : index
    %c0_13 = arith.constant 0 : index
    %17 = vector.load %arg7[%c0_12, %c0_13] : memref<256x128xbf16, #tpu.memory_space<vmem>>, vector<256x128xbf16>
    %cst_14 = arith.constant dense<0.000000e+00> : vector<16x128xf32>
    %18 = tpu.matmul %16, %17, %cst_14 {dimension_numbers = #tpu.dot_dimension_numbers<[1], [0], [0], [1], [0, 0, 1, 1], [], []>} : vector<16x256xbf16>, vector<256x128xbf16>, vector<16x128xf32> -> vector<16x128xf32>
    %c0_15 = arith.constant 0 : index
    %c0_16 = arith.constant 0 : index
    %19 = vector.load %arg8[%c0_15, %c0_16] : memref<1x128xf32, #tpu.memory_space<vmem>>, vector<1x128xf32>
    %20 = vector.broadcast %19 : vector<1x128xf32> to vector<16x128xf32>
    %21 = arith.addf %18, %20 : vector<16x128xf32>
    %22 = vector.extract_strided_slice %21 {offsets = [0, 0], sizes = [16, 64], strides = [1, 1]} : vector<16x128xf32> to vector<16x64xf32>
    %23 = vector.extract_strided_slice %21 {offsets = [0, 64], sizes = [16, 64], strides = [1, 1]} : vector<16x128xf32> to vector<16x64xf32>
    %c0_17 = arith.constant 0 : index
    %c0_18 = arith.constant 0 : index
    %24 = vector.load %arg2[%c0_17, %c0_18] : memref<16x64xf32, #tpu.memory_space<vmem>>, vector<16x64xf32>
    %cst_19 = arith.constant 5.000000e-01 : f32
    %25 = vector.broadcast %cst_19 : f32 to vector<16x64xf32>
    %26 = arith.mulf %25, %23 : vector<16x64xf32>
    %27 = math.exp %26 : vector<16x64xf32>
    %28 = arith.mulf %24, %27 : vector<16x64xf32>
    %29 = arith.addf %22, %28 : vector<16x64xf32>
    %30 = arith.truncf %29 : vector<16x64xf32> to vector<16x64xbf16>
    %c0_20 = arith.constant 0 : index
    %c0_21 = arith.constant 0 : index
    %31 = vector.load %arg9[%c0_20, %c0_21] : memref<64x256xbf16, #tpu.memory_space<vmem>>, vector<64x256xbf16>
    %cst_22 = arith.constant dense<0.000000e+00> : vector<16x256xf32>
    %32 = tpu.matmul %30, %31, %cst_22 {dimension_numbers = #tpu.dot_dimension_numbers<[1], [0], [0], [1], [0, 0, 1, 1], [], []>} : vector<16x64xbf16>, vector<64x256xbf16>, vector<16x256xf32> -> vector<16x256xf32>
    %c0_23 = arith.constant 0 : index
    %c0_24 = arith.constant 0 : index
    %33 = vector.load %arg10[%c0_23, %c0_24] : memref<1x256xf32, #tpu.memory_space<vmem>>, vector<1x256xf32>
    %34 = vector.broadcast %33 : vector<1x256xf32> to vector<16x256xf32>
    %35 = arith.addf %32, %34 : vector<16x256xf32>
    %cst_25 = arith.constant 0.000000e+00 : f32
    %36 = vector.broadcast %cst_25 : f32 to vector<16x256xf32>
    %37 = arith.maximumf %35, %36 : vector<16x256xf32>
    %38 = arith.truncf %37 : vector<16x256xf32> to vector<16x256xbf16>
    %c0_26 = arith.constant 0 : index
    %c0_27 = arith.constant 0 : index
    %39 = vector.load %arg11[%c0_26, %c0_27] : memref<256x512xbf16, #tpu.memory_space<vmem>>, vector<256x512xbf16>
    %cst_28 = arith.constant dense<0.000000e+00> : vector<16x512xf32>
    %40 = tpu.matmul %38, %39, %cst_28 {dimension_numbers = #tpu.dot_dimension_numbers<[1], [0], [0], [1], [0, 0, 1, 1], [], []>} : vector<16x256xbf16>, vector<256x512xbf16>, vector<16x512xf32> -> vector<16x512xf32>
    %c0_29 = arith.constant 0 : index
    %c0_30 = arith.constant 0 : index
    %41 = vector.load %arg12[%c0_29, %c0_30] : memref<1x512xf32, #tpu.memory_space<vmem>>, vector<1x512xf32>
    %42 = vector.broadcast %41 : vector<1x512xf32> to vector<16x512xf32>
    %43 = arith.addf %40, %42 : vector<16x512xf32>
    %cst_31 = arith.constant 0.000000e+00 : f32
    %44 = vector.broadcast %cst_31 : f32 to vector<16x512xf32>
    %45 = arith.maximumf %43, %44 : vector<16x512xf32>
    %46 = arith.truncf %45 : vector<16x512xf32> to vector<16x512xbf16>
    %c0_32 = arith.constant 0 : index
    %c0_33 = arith.constant 0 : index
    %47 = vector.load %arg13[%c0_32, %c0_33] : memref<512x784xbf16, #tpu.memory_space<vmem>>, vector<512x784xbf16>
    %cst_34 = arith.constant dense<0.000000e+00> : vector<16x784xf32>
    %48 = tpu.matmul %46, %47, %cst_34 {dimension_numbers = #tpu.dot_dimension_numbers<[1], [0], [0], [1], [0, 0, 1, 1], [], []>} : vector<16x512xbf16>, vector<512x784xbf16>, vector<16x784xf32> -> vector<16x784xf32>
    %c0_35 = arith.constant 0 : index
    %c0_36 = arith.constant 0 : index
    %49 = vector.load %arg14[%c0_35, %c0_36] : memref<1x784xf32, #tpu.memory_space<vmem>>, vector<1x784xf32>
    %50 = vector.broadcast %49 : vector<1x784xf32> to vector<16x784xf32>
    %51 = arith.addf %48, %50 : vector<16x784xf32>
    %52 = arith.negf %51 : vector<16x784xf32>
    %53 = math.exp %52 : vector<16x784xf32>
    %cst_37 = arith.constant 1.000000e+00 : f32
    %54 = vector.broadcast %cst_37 : f32 to vector<16x784xf32>
    %55 = arith.addf %54, %53 : vector<16x784xf32>
    %56 = arith.divf %54, %55 : vector<16x784xf32>
    %57 = arith.truncf %56 : vector<16x784xf32> to vector<16x784xbf16>
    %c0_38 = arith.constant 0 : index
    %c0_39 = arith.constant 0 : index
    %58 = vector.load %arg15[%c0_38, %c0_39] : memref<16x784xbf16, #tpu.memory_space<vmem>>, vector<16x784xbf16>
    tpu.vector_store %arg15[%c0_38, %c0_39], %57 {strides = array<i32>} : memref<16x784xbf16, #tpu.memory_space<vmem>>, vector<16x784xbf16>,
    %c0_40 = arith.constant 0 : index
    %c0_41 = arith.constant 0 : index
    %59 = vector.load %arg16[%c0_40, %c0_41] : memref<16x128xf32, #tpu.memory_space<vmem>>, vector<16x128xf32>
    tpu.vector_store %arg16[%c0_40, %c0_41], %21 {strides = array<i32>} : memref<16x128xf32, #tpu.memory_space<vmem>>, vector<16x128xf32>,
    return
  }
  func.func @transform_0(%arg0: i32) -> (i32, i32) {
    %c0_i32 = arith.constant 0 : i32
    %c0_i32_0 = arith.constant 0 : i32
    return %arg0, %c0_i32 : i32, i32
  }
  func.func @transform_1(%arg0: i32) -> (i32, i32) {
    %c0_i32 = arith.constant 0 : i32
    %c0_i32_0 = arith.constant 0 : i32
    return %arg0, %c0_i32 : i32, i32
  }
  func.func @transform_2(%arg0: i32) -> (i32, i32) {
    %c0_i32 = arith.constant 0 : i32
    %c0_i32_0 = arith.constant 0 : i32
    %c0_i32_1 = arith.constant 0 : i32
    return %c0_i32, %c0_i32_0 : i32, i32
  }
  func.func @transform_3(%arg0: i32) -> (i32, i32) {
    %c0_i32 = arith.constant 0 : i32
    %c0_i32_0 = arith.constant 0 : i32
    %c0_i32_1 = arith.constant 0 : i32
    return %c0_i32, %c0_i32_0 : i32, i32
  }
  func.func @transform_4(%arg0: i32) -> (i32, i32) {
    %c0_i32 = arith.constant 0 : i32
    %c0_i32_0 = arith.constant 0 : i32
    %c0_i32_1 = arith.constant 0 : i32
    return %c0_i32, %c0_i32_0 : i32, i32
  }
  func.func @transform_5(%arg0: i32) -> (i32, i32) {
    %c0_i32 = arith.constant 0 : i32
    %c0_i32_0 = arith.constant 0 : i32
    %c0_i32_1 = arith.constant 0 : i32
    return %c0_i32, %c0_i32_0 : i32, i32
  }
  func.func @transform_6(%arg0: i32) -> (i32, i32) {
    %c0_i32 = arith.constant 0 : i32
    %c0_i32_0 = arith.constant 0 : i32
    %c0_i32_1 = arith.constant 0 : i32
    return %c0_i32, %c0_i32_0 : i32, i32
  }
  func.func @transform_7(%arg0: i32) -> (i32, i32) {
    %c0_i32 = arith.constant 0 : i32
    %c0_i32_0 = arith.constant 0 : i32
    %c0_i32_1 = arith.constant 0 : i32
    return %c0_i32, %c0_i32_0 : i32, i32
  }
  func.func @transform_8(%arg0: i32) -> (i32, i32) {
    %c0_i32 = arith.constant 0 : i32
    %c0_i32_0 = arith.constant 0 : i32
    %c0_i32_1 = arith.constant 0 : i32
    return %c0_i32, %c0_i32_0 : i32, i32
  }
  func.func @transform_9(%arg0: i32) -> (i32, i32) {
    %c0_i32 = arith.constant 0 : i32
    %c0_i32_0 = arith.constant 0 : i32
    %c0_i32_1 = arith.constant 0 : i32
    return %c0_i32, %c0_i32_0 : i32, i32
  }
  func.func @transform_10(%arg0: i32) -> (i32, i32) {
    %c0_i32 = arith.constant 0 : i32
    %c0_i32_0 = arith.constant 0 : i32
    %c0_i32_1 = arith.constant 0 : i32
    return %c0_i32, %c0_i32_0 : i32, i32
  }
  func.func @transform_11(%arg0: i32) -> (i32, i32) {
    %c0_i32 = arith.constant 0 : i32
    %c0_i32_0 = arith.constant 0 : i32
    %c0_i32_1 = arith.constant 0 : i32
    return %c0_i32, %c0_i32_0 : i32, i32
  }
  func.func @transform_12(%arg0: i32) -> (i32, i32) {
    %c0_i32 = arith.constant 0 : i32
    %c0_i32_0 = arith.constant 0 : i32
    %c0_i32_1 = arith.constant 0 : i32
    return %c0_i32, %c0_i32_0 : i32, i32
  }
  func.func @transform_13(%arg0: i32) -> (i32, i32) {
    %c0_i32 = arith.constant 0 : i32
    %c0_i32_0 = arith.constant 0 : i32
    %c0_i32_1 = arith.constant 0 : i32
    return %c0_i32, %c0_i32_0 : i32, i32
  }
  func.func @transform_14(%arg0: i32) -> (i32, i32) {
    %c0_i32 = arith.constant 0 : i32
    %c0_i32_0 = arith.constant 0 : i32
    return %arg0, %c0_i32 : i32, i32
  }
  func.func @transform_15(%arg0: i32) -> (i32, i32) {
    %c0_i32 = arith.constant 0 : i32
    %c0_i32_0 = arith.constant 0 : i32
    return %arg0, %c0_i32 : i32, i32
  }
}

</mosaic_0001>

<bundles_post_ra>
// kernel: bernoulli_vae_forward.1
= control target key start
LH: loop header
LB: loop body
LE: loop exit
PB: predicated region body
PF: predicated region fallthrough
CT: control target
= control target key end

     0   :  { %s12639_s0 = inlined_call_operand.vmem [shape: bf16[32,784], index: 0, kind: input, shape index: {}]   ;;  %s12640_s1 = inlined_call_operand.vmem [shape: f32[32,64], index: 1, kind: input, shape index: {}]   ;;  %s12641_s2 = inlined_call_operand.vmem [shape: bf16[784,512], index: 2, kind: input, shape index: {}]   ;;  %s12642_s3 = inlined_call_operand.vmem [shape: f32[1,512], index: 3, kind: input, shape index: {}]   ;;  %s12643_s4 = inlined_call_operand.vmem [shape: bf16[512,256], index: 4, kind: input, shape index: {}]   ;;  %s12644_s5 = inlined_call_operand.vmem [shape: f32[1,256], index: 5, kind: input, shape index: {}]   ;;  %s12645_s6 = inlined_call_operand.vmem [shape: bf16[256,128], index: 6, kind: input, shape index: {}]   ;;  %s12646_s7 = inlined_call_operand.vmem [shape: f32[1,128], index: 7, kind: input, shape index: {}]   ;;  %s12647_s8 = inlined_call_operand.vmem [shape: bf16[64,256], index: 8, kind: input, shape index: {}]   ;;  %s12648_s9 = inlined_call_operand.vmem [shape: f32[1,256], index: 9, kind: input, shape index: {}]   ;;  %s12649_s10 = inlined_call_operand.vmem [shape: bf16[256,512], index: 10, kind: input, shape index: {}]   ;;  %s12650_s11 = inlined_call_operand.vmem [shape: f32[1,512], index: 11, kind: input, shape index: {}]   ;;  %s12651_s12 = inlined_call_operand.vmem [shape: bf16[512,784], index: 12, kind: input, shape index: {}]   ;;  %s12652_s13 = inlined_call_operand.vmem [shape: f32[1,784], index: 13, kind: input, shape index: {}]   ;;  %s12653_s14 = inlined_call_operand.hbm [shape: bf16[32,784], index: 14, kind: output, shape index: {0}]   ;;  %s12654_s15 = inlined_call_operand.vmem [shape: f32[32,128], index: 15, kind: output, shape index: {1}]  }
   0x1   :  { %12663 = sst [smem:[#allocation12_spill]] %s12639_s0 }
   0x2   :  { %12664 = sst [smem:[#allocation13_spill]] %s12640_s1 }
   0x3   :  { %21 = vsyncpa [#allocation3], 0 }
   0x4   :  { %23 = vsyncpa [#allocation3 + $0x1], 0  ;;  %s8881_s18 = smov 0   ;;  %s8883_s19 = smov 0  }
   0x5   :  { %s8885_s20 = smov 0   ;;  %s8887_s21 = smov 0  }
   0x6 LB: > { %12665 = sst [smem:[#allocation5_spill]] %s8784_s18  ;;  %s8902_s22 = sadd.s32 4294967295, %s8796_s21   ;;  %s8796_s21 = sphi %s8887_s21, %s12688_s21   ;;  %s8792_s20 = sphi %s8885_s20, %s12690_s20   ;;  %s8788_s19 = sphi %s8883_s19, %s12692_s19   ;;  %s8784_s18 = sphi %s8881_s18, %s12691_s18  }
   0x7   : > { %12666 = sst [smem:[#allocation6_spill]] %s8792_s20  ;;  %s5698_s23 = sadd.s32 4294967294, %s8796_s21  }
   0x8   : > { %12667 = sst [smem:[#allocation7_spill]] %s8796_s21  ;;  %s8906_s24 = sadd.s32 1, %s8796_s21  }
   0x9   : > { %12668 = sst [smem:[#allocation8_spill]] %s8906_s24  ;;  %s340_s25 = sadd.s32 1, %s8792_s20 }
   0xa   : > { %s337_s26 = ssub.s32 %s8796_s21, %s8906_s24  ;;  %p350_p0 = scmp.ne.s32.totalorder %s8792_s20, %s8788_s19 }
   0xb   : > { %p338_p1 = scmp.eq.s32.totalorder %s337_s26, 0  ;;  %p351_p2 = scmp.eq.s32.totalorder %s8902_s22, 1 }
   0xc   : > { %p356_p3 = scmp.ne.s32.totalorder %s8788_s19, %s8784_s18  ;;  %p357_p4 = scmp.eq.s32.totalorder %s5698_s23, 1 }
   0xd   : > { %s8917_s27 = scalar_select %p338_p1, %s8792_s20, %s340_s25  }
   0xe   : > { %p8919_p5 = por %p351_p2, %p350_p0  ;;  %p8923_p6 = por %p357_p4, %p356_p3 }
   0xf   : > { %12669 = sst [smem:[#allocation9_spill]] %s8917_s27  ;;  %p5701_p7 = scmp.ge.s32.totalorder %s8796_s21, 1 }
  0x10   : > { %s12670_s28 = scalar_select %p8919_p5, 1, 0 }
  0x11   : > { %s12672_s29 = scalar_select %p8923_p6, 1, 0 }
  0x12   : > { %12671 = sst [smem:[#allocation10_spill]] %s12670_s28  ;;  %p456_p8 = scmp.lt.s32.totalorder %s8796_s21, 3 }
  0x13   : > { %12673 = sst [smem:[#allocation11_spill]] %s12672_s29 }
  0x14   : > { %p457_p9 = pnand %p5701_p7, %p456_p8 }
  0x15   : > { %s5702_s21 = sshll.u32 (!%p457_p9), %s8902_s22, 1  ;;  %s12674_s0 = sld [smem:[#allocation12_spill]] (!%p457_p9) }
  0x16   : > { %460 = sbr.rel (%p457_p9) target bundleno = 1444 (0x5a4), region = 76  ;;  %p516_p10 = scmp.lt.s32.totalorder (!%p457_p9), %s5702_s21, 3 }
  0x17   : > { %s8798_s25 = smov (!%p457_p9), 64   ;;  %s12675_s1 = sld [smem:[#allocation13_spill]] (!%p457_p9) }
  0x18   : > { %s8630_s27 = smul.u32 (!%p457_p9), 56, %s8902_s22 }
  0x1a   : > { %s5591_s28 = scalar_lea.hbm (!%p457_p9), %s12653_s14, %s8630_s27 }
  0x1b   : > { %v5850_v0 = vld [vmem:[%s12641_s2 + $0xe0] sm:$0xf]  ;;  %v8086_v1 = vld [vmem:[%s12641_s2 + $0xec] sm:$0xf0]  ;;  %s12694_s21 = smov (!%p516_p10, %s5702_s21), 3  ;;  %vm1765_vm0 = vcmask 130048  }
  0x1c   : > { %v5978_v2 = vld [vmem:[%s12641_s2 + $0x1e0] sm:$0xf]  ;;  %v5851_v3 = vor.u32 %v8086_v1, %v5850_v0  ;;  %v8118_v4 = vld [vmem:[%s12641_s2 + $0x1ec] sm:$0xf0]  ;;  %s8629_s30 = smul.u32 28, %s12694_s21  ;;  %vm2916_vm1 = vcmask 523264  }
  0x1d   : > { %v6106_v5 = vld [vmem:[%s12641_s2 + $0x2e0] sm:$0xf]  ;;  %v8150_v6 = vld [vmem:[%s12641_s2 + $0x2ec] sm:$0xf0]  ;;  %v5979_v7 = vor.u32 %v8118_v4, %v5978_v2  ;;  %s5594_s26 = sshll.u32 %s5591_s28, 4  ;;  %s5595_s26 = int_to_ptr.hbm [resolvable:$true] %s5594_s26 }
  0x1e   : > { %v6107_v8 = vor.u32 %v8150_v6, %v6106_v5  ;;  %v6234_v9 = vld [vmem:[%s12641_s2 + $0x3e0] sm:$0xf]  ;;  %v8182_v10 = vld [vmem:[%s12641_s2 + $0x3ec] sm:$0xf0]  ;;  %1769 = vmatpush.bf16.msra.mxu0 %v5851_v3  ;;  %s9167_s23 = scalar_lea.vmem %s12674_s0, %s8629_s30 }
  0x1f   : > { %v5834_v11 = vld [vmem:[%s12641_s2 + $0xc0] sm:$0xf]  ;;  %v6235_v12 = vor.u32 %v8182_v10, %v6234_v9  ;;  %v8082_v13 = vld [vmem:[%s12641_s2 + $0xcc] sm:$0xf0]  ;;  %1783 = vmatpush.bf16.msra.mxu1 %v5979_v7 }
  0x20   : > { %v5962_v14 = vld [vmem:[%s12641_s2 + $0x1c0] sm:$0xf]  ;;  %v8114_v15 = vld [vmem:[%s12641_s2 + $0x1cc] sm:$0xf0]  ;;  %1797 = vmatpush.bf16.msra.mxu2 %v6107_v8  ;;  %v5835_v16 = vor.u32 %v8082_v13, %v5834_v11 }
  0x21   : > { %v5963_v17 = vor.u32 %v8114_v15, %v5962_v14  ;;  %v6090_v18 = vld [vmem:[%s12641_s2 + $0x2c0] sm:$0xf]  ;;  %v8146_v19 = vld [vmem:[%s12641_s2 + $0x2cc] sm:$0xf0]  ;;  %1811 = vmatpush.bf16.msra.mxu3 %v6235_v12 }
  0x22   : > { %v6218_v20 = vld [vmem:[%s12641_s2 + $0x3c0] sm:$0xf]  ;;  %v6091_v21 = vor.u32 %v8146_v19, %v6090_v18  ;;  %v8178_v22 = vld [vmem:[%s12641_s2 + $0x3cc] sm:$0xf0]  ;;  %1770 = vmatpush.bf16.msra.mxu0 %v5835_v16 }
  0x23   : > { %v5818_v23 = vld [vmem:[%s12641_s2 + $0xa0] sm:$0xf]  ;;  %v8078_v24 = vld [vmem:[%s12641_s2 + $0xac] sm:$0xf0]  ;;  %v6219_v25 = vor.u32 %v8178_v22, %v6218_v20  ;;  %1784 = vmatpush.bf16.msra.mxu1 %v5963_v17 }
  0x24   : > { %v5946_v26 = vld [vmem:[%s12641_s2 + $0x1a0] sm:$0xf]  ;;  %v8110_v27 = vld [vmem:[%s12641_s2 + $0x1ac] sm:$0xf0]  ;;  %v5819_v29 = vor.u32 %v8078_v24, %v5818_v23  ;;  %1798 = vmatpush.bf16.msra.mxu2 %v6091_v21 }
  0x25   : > { %v6074_v28 = vld [vmem:[%s12641_s2 + $0x2a0] sm:$0xf]  ;;  %v8142_v30 = vld [vmem:[%s12641_s2 + $0x2ac] sm:$0xf0]  ;;  %v5947_v33 = vor.u32 %v8110_v27, %v5946_v26  ;;  %1812 = vmatpush.bf16.msra.mxu3 %v6219_v25 }
  0x26   : > { %v6202_v31 = vld [vmem:[%s12641_s2 + $0x3a0] sm:$0xf]  ;;  %v8174_v32 = vld [vmem:[%s12641_s2 + $0x3ac] sm:$0xf0]  ;;  %v6075_v34 = vor.u32 %v8142_v30, %v6074_v28  ;;  %1771 = vmatpush.bf16.msra.mxu0 %v5819_v29 }
  0x27   : > { %v5802_v35 = vld [vmem:[%s12641_s2 + $0x80] sm:$0xf]  ;;  %v8074_v36 = vld [vmem:[%s12641_s2 + $0x8c] sm:$0xf0]  ;;  %v6203_v38 = vor.u32 %v8174_v32, %v6202_v31  ;;  %1785 = vmatpush.bf16.msra.mxu1 %v5947_v33  ;;  %v8084_v32 = vld [vmem:[%s12641_s2 + $0xe4] sm:$0xf] }
  0x28   : > { %v5930_v37 = vld [vmem:[%s12641_s2 + $0x180] sm:$0xf]  ;;  %v8106_v39 = vld [vmem:[%s12641_s2 + $0x18c] sm:$0xf0]  ;;  %v5803_v44 = vor.u32 %v8074_v36, %v5802_v35  ;;  %1799 = vmatpush.bf16.msra.mxu2 %v6075_v34  ;;  %v5852_v34 = vld [vmem:[%s12641_s2 + $0xf0] sm:$0xf0] }
  0x29   : > { %v6058_v40 = vld [vmem:[%s12641_s2 + $0x280] sm:$0xf]  ;;  %v8138_v41 = vld [vmem:[%s12641_s2 + $0x28c] sm:$0xf0]  ;;  %v5931_v45 = vor.u32 %v8106_v39, %v5930_v37  ;;  %1813 = vmatpush.bf16.msra.mxu3 %v6203_v38  ;;  %v8116_v39 = vld [vmem:[%s12641_s2 + $0x1e4] sm:$0xf] }
  0x2a   : > { %v6186_v42 = vld [vmem:[%s12641_s2 + $0x380] sm:$0xf]  ;;  %v8170_v43 = vld [vmem:[%s12641_s2 + $0x38c] sm:$0xf0]  ;;  %v6059_v46 = vor.u32 %v8138_v41, %v6058_v40  ;;  %1772 = vmatpush.bf16.msra.mxu0 %v5803_v44  ;;  %v5980_v40 = vld [vmem:[%s12641_s2 + $0x1f0] sm:$0xf0] }
  0x2b   : > { %v5786_v47 = vld [vmem:[%s12641_s2 + $0x60] sm:$0xf]  ;;  %v8070_v48 = vld [vmem:[%s12641_s2 + $0x6c] sm:$0xf0]  ;;  %v6187_v50 = vor.u32 %v8170_v43, %v6186_v42  ;;  %1786 = vmatpush.bf16.msra.mxu1 %v5931_v45 }
  0x2c   : > { %v5914_v49 = vld [vmem:[%s12641_s2 + $0x160] sm:$0xf]  ;;  %v8102_v51 = vld [vmem:[%s12641_s2 + $0x16c] sm:$0xf0]  ;;  %v5787_v56 = vor.u32 %v8070_v48, %v5786_v47  ;;  %1800 = vmatpush.bf16.msra.mxu2 %v6059_v46  ;;  %v5855_v47 = vor.u32 %v8084_v32, %v5852_v34  ;;  %v8068_v34 = vld [vmem:[%s12641_s2 + $0x64] sm:$0xf] }
  0x2d   : > { %v6042_v52 = vld [vmem:[%s12641_s2 + $0x260] sm:$0xf]  ;;  %v8134_v53 = vld [vmem:[%s12641_s2 + $0x26c] sm:$0xf0]  ;;  %v5915_v57 = vor.u32 %v8102_v51, %v5914_v49  ;;  %1814 = vmatpush.bf16.msra.mxu3 %v6187_v50  ;;  %v8080_v49 = vld [vmem:[%s12641_s2 + $0xc4] sm:$0xf] }
  0x2e   : > { %v6170_v54 = vld [vmem:[%s12641_s2 + $0x360] sm:$0xf]  ;;  %v8166_v55 = vld [vmem:[%s12641_s2 + $0x36c] sm:$0xf0]  ;;  %v6043_v58 = vor.u32 %v8134_v53, %v6042_v52  ;;  %1773 = vmatpush.bf16.msra.mxu0 %v5787_v56  ;;  %v5836_v50 = vld [vmem:[%s12641_s2 + $0xd0] sm:$0xf0]  ;;  %v5983_v56 = vor.u32 %v8116_v39, %v5980_v40 }
  0x2f   : > { %v5770_v59 = vld [vmem:[%s12641_s2 + $0x40] sm:$0xf]  ;;  %v8066_v60 = vld [vmem:[%s12641_s2 + $0x4c] sm:$0xf0]  ;;  %v6171_v62 = vor.u32 %v8166_v55, %v6170_v54  ;;  %1787 = vmatpush.bf16.msra.mxu1 %v5915_v57  ;;  %v5718_v51 = vld [vmem:[%s9167_s23 + $0x8] sm:$0xf] }
  0x30   : > { %v5898_v61 = vld [vmem:[%s12641_s2 + $0x140] sm:$0xf]  ;;  %v8098_v63 = vld [vmem:[%s12641_s2 + $0x14c] sm:$0xf0]  ;;  %v5771_v4 = vor.u32 %v8066_v60, %v5770_v59  ;;  %1801 = vmatpush.bf16.msra.mxu2 %v6043_v58  ;;  %v8053_v52 = vld [vmem:[%s9167_s23 + $0x20] sm:$0xf0] }
  0x31   : > { %v6026_v0 = vld [vmem:[%s12641_s2 + $0x240] sm:$0xf]  ;;  %v8130_v1 = vld [vmem:[%s12641_s2 + $0x24c] sm:$0xf0]  ;;  %v5899_v6 = vor.u32 %v8098_v63, %v5898_v61  ;;  %1815 = vmatpush.bf16.msra.mxu3 %v6171_v62  ;;  %v9181_v54 = vor.u32 %v8053_v52, %v5718_v51  ;;  %v8052_v57 = vld [vmem:[%s9167_s23 + $0x18] sm:$0xf0] }
  0x32   : > { %v6154_v2 = vld [vmem:[%s12641_s2 + $0x340] sm:$0xf]  ;;  %v8162_v3 = vld [vmem:[%s12641_s2 + $0x34c] sm:$0xf0]  ;;  %v6027_v7 = vor.u32 %v8130_v1, %v6026_v0  ;;  %1774 = vmatpush.bf16.msra.mxu0 %v5771_v4  ;;  %v8050_v58 = vld [vmem:[%s9167_s23 + $0xc] sm:$0xf]  ;;  %v5839_v4 = vor.u32 %v8080_v49, %v5836_v50 }
  0x33   : > { %v5754_v5 = vld [vmem:[%s12641_s2 + $0x20] sm:$0xf]  ;;  %v8062_v8 = vld [vmem:[%s12641_s2 + $0x2c] sm:$0xf0]  ;;  %v6155_v11 = vor.u32 %v8162_v3, %v6154_v2  ;;  %1788 = vmatpush.bf16.msra.mxu1 %v5899_v6  ;;  %v5720_v59 = vld [vmem:[%s9167_s23 + $0x24] sm:$0xf0] }
  0x34   : > { %v5882_v9 = vld [vmem:[%s12641_s2 + $0x120] sm:$0xf]  ;;  %v8094_v10 = vld [vmem:[%s12641_s2 + $0x12c] sm:$0xf0]  ;;  %v5755_v18 = vor.u32 %v8062_v8, %v5754_v5  ;;  %1802 = vmatpush.bf16.msra.mxu2 %v6027_v7  ;;  %v8112_v60 = vld [vmem:[%s12641_s2 + $0x1c4] sm:$0xf]  ;;  %v9191_v62 = vor.u32 %v8050_v58, %v5720_v59 }
  0x35   : > { %v6010_v12 = vld [vmem:[%s12641_s2 + $0x220] sm:$0xf]  ;;  %v8126_v13 = vld [vmem:[%s12641_s2 + $0x22c] sm:$0xf0]  ;;  %v5883_v23 = vor.u32 %v8094_v10, %v5882_v9  ;;  %1816 = vmatpush.bf16.msra.mxu3 %v6155_v11  ;;  %v8049_v0 = vld [vmem:[%s9167_s23 + $0x4] sm:$0xf] }
  0x36   : > { %v6138_v14 = vld [vmem:[%s12641_s2 + $0x320] sm:$0xf]  ;;  %v8158_v15 = vld [vmem:[%s12641_s2 + $0x32c] sm:$0xf0]  ;;  %v6011_v24 = vor.u32 %v8126_v13, %v6010_v12  ;;  %1775 = vmatpush.bf16.msra.mxu0 %v5755_v18  ;;  %v5964_v2 = vld [vmem:[%s12641_s2 + $0x1d0] sm:$0xf0] }
  0x37   : > { %v5738_v16 = vld [vmem:[%s12641_s2] sm:$0xf]  ;;  %v8058_v17 = vld [vmem:[%s12641_s2 + $0xc] sm:$0xf0]  ;;  %v6139_v27 = vor.u32 %v8158_v15, %v6138_v14  ;;  %1789 = vmatpush.bf16.msra.mxu1 %v5883_v23  ;;  %v8076_v10 = vld [vmem:[%s12641_s2 + $0xa4] sm:$0xf]  ;;  %v5967_v12 = vor.u32 %v8112_v60, %v5964_v2 }
  0x38   : > { %v5866_v19 = vld [vmem:[%s12641_s2 + $0x100] sm:$0xf]  ;;  %v8090_v20 = vld [vmem:[%s12641_s2 + $0x10c] sm:$0xf0]  ;;  %v5739_v33 = vor.u32 %v8058_v17, %v5738_v16  ;;  %1803 = vmatpush.bf16.msra.mxu2 %v6011_v24  ;;  %v5820_v11 = vld [vmem:[%s12641_s2 + $0xb0] sm:$0xf0] }
  0x39   : > { %v5994_v21 = vld [vmem:[%s12641_s2 + $0x200] sm:$0xf]  ;;  %v8122_v22 = vld [vmem:[%s12641_s2 + $0x20c] sm:$0xf0]  ;;  %v5867_v37 = vor.u32 %v8090_v20, %v5866_v19  ;;  %1817 = vmatpush.bf16.msra.mxu3 %v6139_v27  ;;  %v8108_v14 = vld [vmem:[%s12641_s2 + $0x1a4] sm:$0xf]  ;;  %v5823_v17 = vor.u32 %v8076_v10, %v5820_v11 }
  0x3a   : > { %v6122_v25 = vld [vmem:[%s12641_s2 + $0x300] sm:$0xf]  ;;  %v8154_v26 = vld [vmem:[%s12641_s2 + $0x30c] sm:$0xf0]  ;;  %v5995_v38 = vor.u32 %v8122_v22, %v5994_v21  ;;  %1776 = vmatpush.bf16.msra.mxu0 %v5739_v33  ;;  %v5948_v15 = vld [vmem:[%s12641_s2 + $0x1b0] sm:$0xf0] }
  0x3b   : > { %v6362_v28 = vld [vmem:[%s12641_s2 + $0x4e0] sm:$0xf]  ;;  %v8214_v29 = vld [vmem:[%s12641_s2 + $0x4ec] sm:$0xf0]  ;;  %v6123_v41 = vor.u32 %v8154_v26, %v6122_v25  ;;  %1790 = vmatpush.bf16.msra.mxu1 %v5867_v37  ;;  %v8072_v22 = vld [vmem:[%s12641_s2 + $0x84] sm:$0xf]  ;;  %v5951_v24 = vor.u32 %v8108_v14, %v5948_v15 }
  0x3c   : > { %v6490_v30 = vld [vmem:[%s12641_s2 + $0x5e0] sm:$0xf]  ;;  %v8246_v31 = vld [vmem:[%s12641_s2 + $0x5ec] sm:$0xf0]  ;;  %v6363_v42 = vor.u32 %v8214_v29, %v6362_v28  ;;  %1804 = vmatpush.bf16.msra.mxu2 %v5995_v38  ;;  %v5804_v23 = vld [vmem:[%s12641_s2 + $0x90] sm:$0xf0] }
  0x3d   : > { %v6506_v35 = vld [vmem:[%s12641_s2 + $0x600] sm:$0xf]  ;;  %v8250_v36 = vld [vmem:[%s12641_s2 + $0x60c] sm:$0xf0]  ;;  %v6491_v46 = vor.u32 %v8246_v31, %v6490_v30  ;;  %1818 = vmatpush.bf16.msra.mxu3 %v6123_v41  ;;  %v8104_v26 = vld [vmem:[%s12641_s2 + $0x184] sm:$0xf]  ;;  %v5807_v29 = vor.u32 %v8072_v22, %v5804_v23 }
  0x3e   : > { %v6346_v43 = vld [vmem:[%s12641_s2 + $0x4c0] sm:$0xf]  ;;  %v8210_v44 = vld [vmem:[%s12641_s2 + $0x4cc] sm:$0xf0]  ;;  %v6507_v55 = vor.u32 %v8250_v36, %v6506_v35  ;;  %1825 = vmatpush.bf16.msrb.mxu0 %v6363_v42  ;;  %v5932_v27 = vld [vmem:[%s12641_s2 + $0x190] sm:$0xf0] }
  0x3f   : > { %v6474_v45 = vld [vmem:[%s12641_s2 + $0x5c0] sm:$0xf]  ;;  %v8242_v48 = vld [vmem:[%s12641_s2 + $0x5cc] sm:$0xf0]  ;;  %v6347_v63 = vor.u32 %v8210_v44, %v6346_v43  ;;  %1839 = vmatpush.bf16.msrb.mxu1 %v6491_v46  ;;  %1805 = vmatmul.bf16.vlgmr.msra.gmra.mxu2 %v9181_v54  ;;  %v5788_v35 = vld [vmem:[%s12641_s2 + $0x70] sm:$0xf0]  ;;  %v5935_v38 = vor.u32 %v8104_v26, %v5932_v27 }
  0x40   : > { %v5710_v53 = vld [vmem:[%s9167_s23] sm:$0xf]  ;;  %v6475_v3 = vor.u32 %v8242_v48, %v6474_v45  ;;  %v8206_v6 = vld [vmem:[%s12641_s2 + $0x4ac] sm:$0xf0]  ;;  %1860 = vmatpush.bf16.msrb.mxu2 %v6507_v55  ;;  %1819 = vmatmul.bf16.vlgmr.msra.gmra.mxu3 %v9191_v62  ;;  %v5734_v36 = vld [vmem:[%s9167_s23 + $0x18] sm:$0xf]  ;;  %v5791_v43 = vor.u32 %v8068_v34, %v5788_v35 }
  0x41   : > { %v9189_v61 = vor.u32 %v8052_v57, %v5710_v53  ;;  %v5712_v1 = vld [vmem:[%s9167_s23 + $0x1c] sm:$0xf0]  ;;  %1867 = vmatpush.bf16.msrb.mxu3 %v5855_v47  ;;  %v8238_v9 = vld [vmem:[%s12641_s2 + $0x5ac] sm:$0xf0]  ;;  %v8055_v37 = vld [vmem:[%s9167_s23 + $0x30] sm:$0xf0] }
  0x42   : > { %v6330_v5 = vld [vmem:[%s12641_s2 + $0x4a0] sm:$0xf]  ;;  %v9209_v8 = vor.u32 %v8049_v0, %v5712_v1  ;;  %1826 = vmatpush.bf16.msrb.mxu0 %v6347_v63  ;;  %v8202_v19 = vld [vmem:[%s12641_s2 + $0x48c] sm:$0xf0]  ;;  %v8100_v40 = vld [vmem:[%s12641_s2 + $0x164] sm:$0xf]  ;;  %v9296_v50 = vor.u32 %v8055_v37, %v5734_v36 }
  0x43   : > { %v6458_v7 = vld [vmem:[%s12641_s2 + $0x5a0] sm:$0xf]  ;;  %1777 = vmatmul.bf16.vlgmr.msra.gmra.mxu0 %v9189_v61  ;;  %v6331_v13 = vor.u32 %v8206_v6, %v6330_v5  ;;  %1840 = vmatpush.bf16.msrb.mxu1 %v6475_v3  ;;  %v8234_v21 = vld [vmem:[%s12641_s2 + $0x58c] sm:$0xf0]  ;;  %v5916_v41 = vld [vmem:[%s12641_s2 + $0x170] sm:$0xf0] }
  0x44   : > { %1881 = vmatpush.bf16.msra.mxu2 %v5983_v56  ;;  %v6459_v16 = vor.u32 %v8238_v9, %v6458_v7  ;;  %v6314_v18 = vld [vmem:[%s12641_s2 + $0x480] sm:$0xf]  ;;  %1791 = vmatmul.bf16.vlgmr.msra.gmra.mxu1 %v9209_v8  ;;  %v8198_v31 = vld [vmem:[%s12641_s2 + $0x46c] sm:$0xf0]  ;;  %v8064_v48 = vld [vmem:[%s12641_s2 + $0x44] sm:$0xf]  ;;  %v5919_v51 = vor.u32 %v8100_v40, %v5916_v41 }
  0x45   : > { %1868 = vmatpush.bf16.msrb.mxu3 %v5839_v4  ;;  %v6442_v20 = vld [vmem:[%s12641_s2 + $0x580] sm:$0xf]  ;;  %v6315_v25 = vor.u32 %v8202_v19, %v6314_v18  ;;  %v8230_v33 = vld [vmem:[%s12641_s2 + $0x56c] sm:$0xf0]  ;;  %v5772_v49 = vld [vmem:[%s12641_s2 + $0x50] sm:$0xf0] }
  0x46   : > { %1827 = vmatpush.bf16.msrb.mxu0 %v6331_v13  ;;  %v6443_v28 = vor.u32 %v8234_v21, %v6442_v20  ;;  %v6298_v30 = vld [vmem:[%s12641_s2 + $0x460] sm:$0xf]  ;;  %v8194_v45 = vld [vmem:[%s12641_s2 + $0x44c] sm:$0xf0]  ;;  %v8096_v53 = vld [vmem:[%s12641_s2 + $0x144] sm:$0xf]  ;;  %v5775_v57 = vor.u32 %v8064_v48, %v5772_v49 }
  0x47   : > { %1841 = vmatpush.bf16.msrb.mxu1 %v6459_v16  ;;  %v6426_v32 = vld [vmem:[%s12641_s2 + $0x560] sm:$0xf]  ;;  %v6299_v39 = vor.u32 %v8198_v31, %v6298_v30  ;;  %v8226_v47 = vld [vmem:[%s12641_s2 + $0x54c] sm:$0xf0]  ;;  %v5900_v55 = vld [vmem:[%s12641_s2 + $0x150] sm:$0xf0] }
  0x48   : > { %1882 = vmatpush.bf16.msra.mxu2 %v5967_v12  ;;  %v6427_v42 = vor.u32 %v8230_v33, %v6426_v32  ;;  %v6282_v44 = vld [vmem:[%s12641_s2 + $0x440] sm:$0xf]  ;;  %v8190_v59 = vld [vmem:[%s12641_s2 + $0x42c] sm:$0xf0]  ;;  %v8060_v0 = vld [vmem:[%s12641_s2 + $0x24] sm:$0xf]  ;;  %v5903_v4 = vor.u32 %v8096_v53, %v5900_v55 }
  0x49   : > { %1869 = vmatpush.bf16.msrb.mxu3 %v5823_v17  ;;  %v6410_v46 = vld [vmem:[%s12641_s2 + $0x540] sm:$0xf]  ;;  %v6283_v52 = vor.u32 %v8194_v45, %v6282_v44  ;;  %v8222_v63 = vld [vmem:[%s12641_s2 + $0x52c] sm:$0xf0]  ;;  %v5756_v1 = vld [vmem:[%s12641_s2 + $0x30] sm:$0xf0] }
  0x4a   : > { %1828 = vmatpush.bf16.msrb.mxu0 %v6315_v25  ;;  %v6411_v56 = vor.u32 %v8226_v47, %v6410_v46  ;;  %v6266_v58 = vld [vmem:[%s12641_s2 + $0x420] sm:$0xf]  ;;  %v8092_v2 = vld [vmem:[%s12641_s2 + $0x124] sm:$0xf]  ;;  %v5884_v3 = vld [vmem:[%s12641_s2 + $0x130] sm:$0xf0]  ;;  %v5759_v11 = vor.u32 %v8060_v0, %v5756_v1 }
  0x4b   : > { %1842 = vmatpush.bf16.msrb.mxu1 %v6443_v28  ;;  %v6394_v60 = vld [vmem:[%s12641_s2 + $0x520] sm:$0xf]  ;;  %v6267_v5 = vor.u32 %v8190_v59, %v6266_v58  ;;  %v8186_v7 = vld [vmem:[%s12641_s2 + $0x40c] sm:$0xf0]  ;;  %v8056_v13 = vld [vmem:[%s12641_s2 + $0x4] sm:$0xf]  ;;  %v5887_v21 = vor.u32 %v8092_v2, %v5884_v3 }
  0x4c   : > { %1883 = vmatpush.bf16.msra.mxu2 %v5951_v24  ;;  %v6250_v6 = vld [vmem:[%s12641_s2 + $0x400] sm:$0xf]  ;;  %v6395_v10 = vor.u32 %v8222_v63, %v6394_v60  ;;  %v8218_v12 = vld [vmem:[%s12641_s2 + $0x50c] sm:$0xf0]  ;;  %v5740_v14 = vld [vmem:[%s12641_s2 + $0x10] sm:$0xf0] }
  0x4d   : > { %1870 = vmatpush.bf16.msrb.mxu3 %v5807_v29  ;;  %v6378_v9 = vld [vmem:[%s12641_s2 + $0x500] sm:$0xf]  ;;  %v8148_v15 = vld [vmem:[%s12641_s2 + $0x2e4] sm:$0xf]  ;;  %v6108_v16 = vld [vmem:[%s12641_s2 + $0x2f0] sm:$0xf0]  ;;  %v6251_v22 = vor.u32 %v8186_v7, %v6250_v6  ;;  %v5743_v27 = vor.u32 %v8056_v13, %v5740_v14 }
  0x4e   : > { %1829 = vmatpush.bf16.msrb.mxu0 %v6299_v39  ;;  %v8180_v17 = vld [vmem:[%s12641_s2 + $0x3e4] sm:$0xf]  ;;  %v6236_v18 = vld [vmem:[%s12641_s2 + $0x3f0] sm:$0xf0]  ;;  %v5726_v23 = vld [vmem:[%s9167_s23 + $0x10] sm:$0xf]  ;;  %v6379_v26 = vor.u32 %v8218_v12, %v6378_v9  ;;  %v6111_v31 = vor.u32 %v8148_v15, %v6108_v16 }
  0x4f   : > { %1843 = vmatpush.bf16.msrb.mxu1 %v6427_v42  ;;  %6520 = vmatmul.msk.bf16.vlgmr.msrb.gmra.mxu2 %vm1765_vm0, %v9296_v50  ;;  %v8212_v19 = vld [vmem:[%s12641_s2 + $0x4e4] sm:$0xf]  ;;  %v6364_v20 = vld [vmem:[%s12641_s2 + $0x4f0] sm:$0xf0]  ;;  %v8054_v24 = vld [vmem:[%s9167_s23 + $0x28] sm:$0xf0]  ;;  %v6239_v32 = vor.u32 %v8180_v17, %v6236_v18 }
  0x50   : > { %1884 = vmatpush.bf16.msra.mxu2 %v5935_v38  ;;  %v8088_v25 = vld [vmem:[%s12641_s2 + $0x104] sm:$0xf]  ;;  %v5868_v28 = vld [vmem:[%s12641_s2 + $0x110] sm:$0xf0]  ;;  %v5728_v30 = vld [vmem:[%s9167_s23 + $0x2c] sm:$0xf0]  ;;  %v6367_v36 = vor.u32 %v8212_v19, %v6364_v20  ;;  %v9385_v37 = vor.u32 %v8054_v24, %v5726_v23 }
  0x51   : > { %1871 = vmatpush.bf16.msrb.mxu3 %v5791_v43  ;;  %v8051_v29 = vld [vmem:[%s9167_s23 + $0x14] sm:$0xf]  ;;  %v8244_v33 = vld [vmem:[%s12641_s2 + $0x5e4] sm:$0xf]  ;;  %v5871_v41 = vor.u32 %v8088_v25, %v5868_v28  ;;  %s5705_s23 = sshll.u32 %s12694_s21, 3 }
  0x52   : > { %1830 = vmatpush.bf16.msrb.mxu0 %v6283_v52  ;;  %v6492_v34 = vld [vmem:[%s12641_s2 + $0x5f0] sm:$0xf0]  ;;  %v8144_v35 = vld [vmem:[%s12641_s2 + $0x2c4] sm:$0xf]  ;;  %v9396_v42 = vor.u32 %v8051_v29, %v5728_v30  ;;  %s533_s17 = scalar_lea.vmem %s12654_s15, %s5705_s23  ;;  %s526_s30 = scalar_lea.vmem %s12675_s1, %s5705_s23 }
  0x53   : > { %1844 = vmatpush.bf16.msrb.mxu1 %v6411_v56  ;;  %v6092_v38 = vld [vmem:[%s12641_s2 + $0x2d0] sm:$0xf0]  ;;  %v8176_v39 = vld [vmem:[%s12641_s2 + $0x3c4] sm:$0xf]  ;;  %v6495_v45 = vor.u32 %v8244_v33, %v6492_v34  ;;  %s505_s23 = sand.u32 1, %s8788_s19  }
  0x54   : > { %1885 = vmatpush.bf16.msra.mxu2 %v5919_v51  ;;  %v6220_v40 = vld [vmem:[%s12641_s2 + $0x3d0] sm:$0xf0]  ;;  %v8208_v43 = vld [vmem:[%s12641_s2 + $0x4c4] sm:$0xf]  ;;  %v6095_v46 = vor.u32 %v8144_v35, %v6092_v38  ;;  %s8628_s20 = smul.u32 56, %s505_s23  ;;  %s5574_s16 = scalar_lea.sflag [#allocation3], %s505_s23 }
  0x55   : > { %1872 = vmatpush.bf16.msrb.mxu3 %v5775_v57  ;;  %v6348_v44 = vld [vmem:[%s12641_s2 + $0x4d0] sm:$0xf0]  ;;  %v6223_v47 = vor.u32 %v8176_v39, %v6220_v40  ;;  %v8240_v48 = vld [vmem:[%s12641_s2 + $0x5c4] sm:$0xf] }
  0x56   : > { %1831 = vmatpush.bf16.msrb.mxu0 %v6267_v5  ;;  %v6476_v49 = vld [vmem:[%s12641_s2 + $0x5d0] sm:$0xf0]  ;;  %v8140_v51 = vld [vmem:[%s12641_s2 + $0x2a4] sm:$0xf]  ;;  %v6351_v52 = vor.u32 %v8208_v43, %v6348_v44 }
  0x57   : > { %1845 = vmatpush.bf16.msrb.mxu1 %v6395_v10  ;;  %v6076_v53 = vld [vmem:[%s12641_s2 + $0x2b0] sm:$0xf0]  ;;  %v8172_v55 = vld [vmem:[%s12641_s2 + $0x3a4] sm:$0xf]  ;;  %v6479_v59 = vor.u32 %v8240_v48, %v6476_v49 }
  0x58   : > { %1886 = vmatpush.bf16.msra.mxu2 %v5903_v4  ;;  %v6204_v56 = vld [vmem:[%s12641_s2 + $0x3b0] sm:$0xf0]  ;;  %v8204_v57 = vld [vmem:[%s12641_s2 + $0x4a4] sm:$0xf]  ;;  %v6079_v60 = vor.u32 %v8140_v51, %v6076_v53 }
  0x59   : > { %1873 = vmatpush.bf16.msrb.mxu3 %v5759_v11  ;;  %v6332_v58 = vld [vmem:[%s12641_s2 + $0x4b0] sm:$0xf0]  ;;  %v6207_v63 = vor.u32 %v8172_v55, %v6204_v56  ;;  %v8236_v0 = vld [vmem:[%s12641_s2 + $0x5a4] sm:$0xf] }
  0x5a   : > { %1832 = vmatpush.bf16.msrb.mxu0 %v6251_v22  ;;  %v6460_v1 = vld [vmem:[%s12641_s2 + $0x5b0] sm:$0xf0]  ;;  %v8136_v2 = vld [vmem:[%s12641_s2 + $0x284] sm:$0xf]  ;;  %v6335_v3 = vor.u32 %v8204_v57, %v6332_v58 }
  0x5b   : > { %1846 = vmatpush.bf16.msrb.mxu1 %v6379_v26  ;;  %v6060_v4 = vld [vmem:[%s12641_s2 + $0x290] sm:$0xf0]  ;;  %v8168_v5 = vld [vmem:[%s12641_s2 + $0x384] sm:$0xf]  ;;  %v6463_v10 = vor.u32 %v8236_v0, %v6460_v1  ;;  %v5858_v0 = vld [vmem:[%s12641_s2 + $0xe8] sm:$0xf] }
  0x5c   : > { %1887 = vmatpush.bf16.msra.mxu2 %v5887_v21  ;;  %v6188_v6 = vld [vmem:[%s12641_s2 + $0x390] sm:$0xf0]  ;;  %v8200_v7 = vld [vmem:[%s12641_s2 + $0x484] sm:$0xf]  ;;  %v6063_v11 = vor.u32 %v8136_v2, %v6060_v4  ;;  %v8087_v1 = vld [vmem:[%s12641_s2 + $0xf4] sm:$0xf0] }
  0x5d   : > { %1874 = vmatpush.bf16.msrb.mxu3 %v5743_v27  ;;  %1833 = vmatmul.bf16.vlgmr.msrb.gmra.mxu0 %v9385_v37  ;;  %v6316_v9 = vld [vmem:[%s12641_s2 + $0x490] sm:$0xf0]  ;;  %v6191_v12 = vor.u32 %v8168_v5, %v6188_v6  ;;  %v8232_v13 = vld [vmem:[%s12641_s2 + $0x584] sm:$0xf]  ;;  %v5986_v2 = vld [vmem:[%s12641_s2 + $0x1e8] sm:$0xf] }
  0x5e   : > { %1895 = vmatpush.bf16.msra.mxu0 %v6111_v31  ;;  %1847 = vmatmul.bf16.vlgmr.msrb.gmra.mxu1 %v9396_v42  ;;  %v6444_v14 = vld [vmem:[%s12641_s2 + $0x590] sm:$0xf0]  ;;  %v8132_v15 = vld [vmem:[%s12641_s2 + $0x264] sm:$0xf]  ;;  %v6319_v16 = vor.u32 %v8200_v7, %v6316_v9  ;;  %v8119_v4 = vld [vmem:[%s12641_s2 + $0x1f4] sm:$0xf0] }
  0x5f   : > { %1909 = vmatpush.bf16.msra.mxu1 %v6239_v32  ;;  %v6044_v17 = vld [vmem:[%s12641_s2 + $0x270] sm:$0xf0]  ;;  %v8164_v18 = vld [vmem:[%s12641_s2 + $0x364] sm:$0xf]  ;;  %v6447_v22 = vor.u32 %v8232_v13, %v6444_v14  ;;  %v5859_v13 = vor.u32 %v8087_v1, %v5858_v0  ;;  %v6114_v14 = vld [vmem:[%s12641_s2 + $0x2e8] sm:$0xf] }
  0x60   : > { %1888 = vmatpush.bf16.msra.mxu2 %v5871_v41  ;;  %1875 = vmatmul.bf16.vlgmr.msrb.gmra.mxu3 %v9189_v61  ;;  %v6172_v19 = vld [vmem:[%s12641_s2 + $0x370] sm:$0xf0]  ;;  %v8196_v20 = vld [vmem:[%s12641_s2 + $0x464] sm:$0xf]  ;;  %v6047_v23 = vor.u32 %v8132_v15, %v6044_v17  ;;  %v8151_v15 = vld [vmem:[%s12641_s2 + $0x2f4] sm:$0xf0]  ;;  %v5987_v17 = vor.u32 %v8119_v4, %v5986_v2 }
  0x61   : > { %1923 = vmatpush.bf16.msra.mxu3 %v6367_v36  ;;  %v6300_v21 = vld [vmem:[%s12641_s2 + $0x470] sm:$0xf0]  ;;  %v6175_v24 = vor.u32 %v8164_v18, %v6172_v19  ;;  %v8228_v25 = vld [vmem:[%s12641_s2 + $0x564] sm:$0xf]  ;;  %v8183_v19 = vld [vmem:[%s12641_s2 + $0x3f4] sm:$0xf0] }
  0x62   : > { %1896 = vmatpush.bf16.msra.mxu0 %v6095_v46  ;;  %v6428_v26 = vld [vmem:[%s12641_s2 + $0x570] sm:$0xf0]  ;;  %v8128_v27 = vld [vmem:[%s12641_s2 + $0x244] sm:$0xf]  ;;  %v6303_v28 = vor.u32 %v8196_v20, %v6300_v21  ;;  %v5842_v20 = vld [vmem:[%s12641_s2 + $0xc8] sm:$0xf] }
  0x63   : > { %1910 = vmatpush.bf16.msra.mxu1 %v6223_v47  ;;  %1889 = vmatmul.bf16.vlgmr.msra.gmra.mxu2 %v9209_v8  ;;  %v6028_v29 = vld [vmem:[%s12641_s2 + $0x250] sm:$0xf0]  ;;  %v8160_v30 = vld [vmem:[%s12641_s2 + $0x344] sm:$0xf]  ;;  %v6431_v34 = vor.u32 %v8228_v25, %v6428_v26  ;;  %v8083_v21 = vld [vmem:[%s12641_s2 + $0xd4] sm:$0xf0]  ;;  %v6115_v25 = vor.u32 %v8151_v15, %v6114_v14 }
  0x64   : > { %1937 = vmatpush.bf16.msrb.mxu2 %v6495_v45  ;;  %v6156_v31 = vld [vmem:[%s12641_s2 + $0x350] sm:$0xf0]  ;;  %v8192_v32 = vld [vmem:[%s12641_s2 + $0x444] sm:$0xf]  ;;  %v6031_v35 = vor.u32 %v8128_v27, %v6028_v29  ;;  %v5843_v27 = vor.u32 %v8083_v21, %v5842_v20  ;;  %v8147_v29 = vld [vmem:[%s12641_s2 + $0x2d4] sm:$0xf0] }
  0x65   : > { %1924 = vmatpush.bf16.msra.mxu3 %v6351_v52  ;;  %v6284_v33 = vld [vmem:[%s12641_s2 + $0x450] sm:$0xf0]  ;;  %v6159_v36 = vor.u32 %v8160_v30, %v6156_v31  ;;  %v8224_v38 = vld [vmem:[%s12641_s2 + $0x544] sm:$0xf]  ;;  %v6226_v30 = vld [vmem:[%s12641_s2 + $0x3c8] sm:$0xf] }
  0x66   : > { %1897 = vmatpush.bf16.msra.mxu0 %v6079_v60  ;;  %v6412_v39 = vld [vmem:[%s12641_s2 + $0x550] sm:$0xf0]  ;;  %v8124_v40 = vld [vmem:[%s12641_s2 + $0x224] sm:$0xf]  ;;  %v6287_v41 = vor.u32 %v8192_v32, %v6284_v33  ;;  %v8179_v32 = vld [vmem:[%s12641_s2 + $0x3d4] sm:$0xf0] }
  0x67   : > { %1911 = vmatpush.bf16.msra.mxu1 %v6207_v63  ;;  %v6012_v43 = vld [vmem:[%s12641_s2 + $0x230] sm:$0xf0]  ;;  %v8156_v44 = vld [vmem:[%s12641_s2 + $0x324] sm:$0xf]  ;;  %v6415_v48 = vor.u32 %v8224_v38, %v6412_v39  ;;  %v5826_v33 = vld [vmem:[%s12641_s2 + $0xa8] sm:$0xf]  ;;  %v6227_v39 = vor.u32 %v8179_v32, %v6226_v30 }
  0x68   : > { %1938 = vmatpush.bf16.msrb.mxu2 %v6479_v59  ;;  %v6140_v45 = vld [vmem:[%s12641_s2 + $0x330] sm:$0xf0]  ;;  %v8188_v46 = vld [vmem:[%s12641_s2 + $0x424] sm:$0xf]  ;;  %v6015_v52 = vor.u32 %v8124_v40, %v6012_v43  ;;  %v8143_v43 = vld [vmem:[%s12641_s2 + $0x2b4] sm:$0xf0] }
  0x69   : > { %1925 = vmatpush.bf16.msra.mxu3 %v6335_v3  ;;  %v6268_v47 = vld [vmem:[%s12641_s2 + $0x430] sm:$0xf0]  ;;  %v8220_v49 = vld [vmem:[%s12641_s2 + $0x524] sm:$0xf]  ;;  %v6143_v53 = vor.u32 %v8156_v44, %v6140_v45  ;;  %v6210_v44 = vld [vmem:[%s12641_s2 + $0x3a8] sm:$0xf] }
  0x6a   : > { %1898 = vmatpush.bf16.msra.mxu0 %v6063_v11  ;;  %v6396_v51 = vld [vmem:[%s12641_s2 + $0x530] sm:$0xf0]  ;;  %v8120_v55 = vld [vmem:[%s12641_s2 + $0x204] sm:$0xf]  ;;  %v6271_v58 = vor.u32 %v8188_v46, %v6268_v47  ;;  %v8175_v46 = vld [vmem:[%s12641_s2 + $0x3b4] sm:$0xf0] }
  0x6b   : > { %1912 = vmatpush.bf16.msra.mxu1 %v6191_v12  ;;  %v5996_v56 = vld [vmem:[%s12641_s2 + $0x210] sm:$0xf0]  ;;  %v8152_v57 = vld [vmem:[%s12641_s2 + $0x304] sm:$0xf]  ;;  %v6399_v3 = vor.u32 %v8220_v49, %v6396_v51  ;;  %v5810_v47 = vld [vmem:[%s12641_s2 + $0x88] sm:$0xf] }
  0x6c   : > { %1939 = vmatpush.bf16.msrb.mxu2 %v6463_v10  ;;  %v6124_v59 = vld [vmem:[%s12641_s2 + $0x310] sm:$0xf0]  ;;  %v8184_v60 = vld [vmem:[%s12641_s2 + $0x404] sm:$0xf]  ;;  %v5999_v7 = vor.u32 %v8120_v55, %v5996_v56  ;;  %v5938_v49 = vld [vmem:[%s12641_s2 + $0x188] sm:$0xf] }
  0x6d   : > { %1926 = vmatpush.bf16.msra.mxu3 %v6319_v16  ;;  %v6252_v63 = vld [vmem:[%s12641_s2 + $0x410] sm:$0xf0]  ;;  %v8248_v5 = vld [vmem:[%s12641_s2 + $0x604] sm:$0xf]  ;;  %v6127_v9 = vor.u32 %v8152_v57, %v6124_v59  ;;  %v6242_v16 = vld [vmem:[%s12641_s2 + $0x3e8] sm:$0xf] }
  0x6e   : > { %1899 = vmatpush.bf16.msra.mxu0 %v6047_v23  ;;  %v6508_v6 = vld [vmem:[%s12641_s2 + $0x610] sm:$0xf0]  ;;  %v8216_v10 = vld [vmem:[%s12641_s2 + $0x504] sm:$0xf]  ;;  %v6255_v12 = vor.u32 %v8184_v60, %v6252_v63  ;;  %v5970_v23 = vld [vmem:[%s12641_s2 + $0x1c8] sm:$0xf]  ;;  %v6243_v26 = vor.u32 %v8183_v19, %v6242_v16 }
  0x6f   : > { %1913 = vmatpush.bf16.msra.mxu1 %v6175_v24  ;;  %v6380_v11 = vld [vmem:[%s12641_s2 + $0x510] sm:$0xf0]  ;;  %v6511_v18 = vor.u32 %v8248_v5, %v6508_v6  ;;  %v8115_v24 = vld [vmem:[%s12641_s2 + $0x1d4] sm:$0xf0]  ;;  %v6066_v56 = vld [vmem:[%s12641_s2 + $0x288] sm:$0xf] }
  0x70   : > { %1940 = vmatpush.bf16.msrb.mxu2 %v6447_v22  ;;  %v6383_v22 = vor.u32 %v8216_v10, %v6380_v11  ;;  %v5971_v31 = vor.u32 %v8115_v24, %v5970_v23  ;;  %v8107_v51 = vld [vmem:[%s12641_s2 + $0x194] sm:$0xf0]  ;;  %v5794_v63 = vld [vmem:[%s12641_s2 + $0x68] sm:$0xf] }
  0x71   : > { %1927 = vmatpush.bf16.msra.mxu3 %v6303_v28  ;;  %v6098_v28 = vld [vmem:[%s12641_s2 + $0x2c8] sm:$0xf]  ;;  %v8139_v57 = vld [vmem:[%s12641_s2 + $0x294] sm:$0xf0]  ;;  %v5939_v59 = vor.u32 %v8107_v51, %v5938_v49 }
  0x72   : > { %1900 = vmatpush.bf16.msra.mxu0 %v6031_v35  ;;  %v5954_v35 = vld [vmem:[%s12641_s2 + $0x1a8] sm:$0xf]  ;;  %v6099_v38 = vor.u32 %v8147_v29, %v6098_v28  ;;  %v8171_v60 = vld [vmem:[%s12641_s2 + $0x394] sm:$0xf0] }
  0x73   : > { %1914 = vmatpush.bf16.msra.mxu1 %v6159_v36  ;;  %v8111_v36 = vld [vmem:[%s12641_s2 + $0x1b4] sm:$0xf0]  ;;  %v5922_v1 = vld [vmem:[%s12641_s2 + $0x168] sm:$0xf] }
  0x74   : > { %1941 = vmatpush.bf16.msrb.mxu2 %v6431_v34  ;;  %v8079_v34 = vld [vmem:[%s12641_s2 + $0xb4] sm:$0xf0]  ;;  %v5955_v45 = vor.u32 %v8111_v36, %v5954_v35  ;;  %v6050_v4 = vld [vmem:[%s12641_s2 + $0x268] sm:$0xf] }
  0x75   : > { %1928 = vmatpush.bf16.msra.mxu3 %v6287_v41  ;;  %v5827_v40 = vor.u32 %v8079_v34, %v5826_v33  ;;  %v6082_v41 = vld [vmem:[%s12641_s2 + $0x2a8] sm:$0xf]  ;;  %v8071_v0 = vld [vmem:[%s12641_s2 + $0x74] sm:$0xf0] }
  0x76   : > { %1901 = vmatpush.bf16.msra.mxu0 %v6015_v52  ;;  %v6083_v52 = vor.u32 %v8143_v43, %v6082_v41  ;;  %v8103_v2 = vld [vmem:[%s12641_s2 + $0x174] sm:$0xf0]  ;;  %v5795_v6 = vor.u32 %v8071_v0, %v5794_v63  ;;  %v5906_v14 = vld [vmem:[%s12641_s2 + $0x148] sm:$0xf] }
  0x77   : > { %1915 = vmatpush.bf16.msra.mxu1 %v6143_v53  ;;  %v6211_v53 = vor.u32 %v8175_v46, %v6210_v44  ;;  %v5923_v10 = vor.u32 %v8103_v2, %v5922_v1  ;;  %v8167_v11 = vld [vmem:[%s12641_s2 + $0x374] sm:$0xf0]  ;;  %v6034_v19 = vld [vmem:[%s12641_s2 + $0x248] sm:$0xf] }
  0x78   : > { %1942 = vmatpush.bf16.msrb.mxu2 %v6415_v48  ;;  %v8075_v48 = vld [vmem:[%s12641_s2 + $0x94] sm:$0xf0]  ;;  %v6162_v21 = vld [vmem:[%s12641_s2 + $0x348] sm:$0xf] }
  0x79   : > { %1929 = vmatpush.bf16.msra.mxu3 %v6271_v58  ;;  %v5811_v55 = vor.u32 %v8075_v48, %v5810_v47  ;;  %v6194_v58 = vld [vmem:[%s12641_s2 + $0x388] sm:$0xf]  ;;  %v8099_v15 = vld [vmem:[%s12641_s2 + $0x154] sm:$0xf0] }
  0x7a   : > { %1902 = vmatpush.bf16.msra.mxu0 %v5999_v7  ;;  %v6195_v5 = vor.u32 %v8171_v60, %v6194_v58  ;;  %v8135_v7 = vld [vmem:[%s12641_s2 + $0x274] sm:$0xf0]  ;;  %v5762_v24 = vld [vmem:[%s12641_s2 + $0x28] sm:$0xf]  ;;  %v5860_v58 = vld [vmem:[%s12641_s2 + $0xf8] sm:$0xf0] }
  0x7b   : > { %1916 = vmatpush.bf16.msra.mxu1 %v6127_v9  ;;  %v6178_v9 = vld [vmem:[%s12641_s2 + $0x368] sm:$0xf]  ;;  %v6051_v16 = vor.u32 %v8135_v7, %v6050_v4  ;;  %v8131_v20 = vld [vmem:[%s12641_s2 + $0x254] sm:$0xf0] }
  0x7c   : > { %1943 = vmatpush.bf16.msrb.mxu2 %v6399_v3  ;;  %v6067_v3 = vor.u32 %v8139_v57, %v6066_v56  ;;  %v8163_v23 = vld [vmem:[%s12641_s2 + $0x354] sm:$0xf0]  ;;  %v6035_v28 = vor.u32 %v8131_v20, %v6034_v19  ;;  %v6018_v29 = vld [vmem:[%s12641_s2 + $0x228] sm:$0xf]  ;;  %v8085_v57 = vld [vmem:[%s12641_s2 + $0xec] sm:$0xf] }
  0x7d   : > { %1930 = vmatpush.bf16.msra.mxu3 %v6255_v12  ;;  %1903 = vmatmul.bf16.vlgmr.msra.gmra.mxu0 %v9181_v54  ;;  %v5778_v12 = vld [vmem:[%s12641_s2 + $0x48] sm:$0xf]  ;;  %v6163_v30 = vor.u32 %v8163_v23, %v6162_v21  ;;  %v8127_v32 = vld [vmem:[%s12641_s2 + $0x234] sm:$0xf0]  ;;  %v5972_v23 = vld [vmem:[%s12641_s2 + $0x1d8] sm:$0xf0] }
  0x7e   : > { %1958 = vmatpush.bf16.msrb.mxu0 %v6511_v18  ;;  %1917 = vmatmul.bf16.vlgmr.msra.gmra.mxu1 %v9191_v62  ;;  %v6146_v33 = vld [vmem:[%s12641_s2 + $0x328] sm:$0xf]  ;;  %v8159_v34 = vld [vmem:[%s12641_s2 + $0x334] sm:$0xf0]  ;;  %v6019_v44 = vor.u32 %v8127_v32, %v6018_v29 }
  0x7f   : > { %1965 = vmatpush.bf16.msrb.mxu1 %v5859_v13  ;;  %v8067_v13 = vld [vmem:[%s12641_s2 + $0x54] sm:$0xf0]  ;;  %v5746_v36 = vld [vmem:[%s12641_s2 + $0x8] sm:$0xf]  ;;  %v6147_v47 = vor.u32 %v8159_v34, %v6146_v33  ;;  %v8109_v34 = vld [vmem:[%s12641_s2 + $0x1ac] sm:$0xf] }
  0x80   : > { %1944 = vmatpush.bf16.msrb.mxu2 %v6383_v22  ;;  %1931 = vmatmul.bf16.vlgmr.msra.gmra.mxu3 %v9385_v37  ;;  %v5779_v18 = vor.u32 %v8067_v13, %v5778_v12  ;;  %v5907_v22 = vor.u32 %v8099_v15, %v5906_v14  ;;  %v6370_v41 = vld [vmem:[%s12641_s2 + $0x4e8] sm:$0xf]  ;;  %v8215_v43 = vld [vmem:[%s12641_s2 + $0x4f4] sm:$0xf0]  ;;  %v5844_v14 = vld [vmem:[%s12641_s2 + $0xd8] sm:$0xf0] }
  0x81   : > { %1979 = vmatpush.bf16.msrb.mxu3 %v5987_v17  ;;  %v6179_v17 = vor.u32 %v8167_v11, %v6178_v9  ;;  %v8247_v46 = vld [vmem:[%s12641_s2 + $0x5f4] sm:$0xf0]  ;;  %v6002_v49 = vld [vmem:[%s12641_s2 + $0x208] sm:$0xf]  ;;  %v8117_v9 = vld [vmem:[%s12641_s2 + $0x1ec] sm:$0xf] }
  0x82   : > { %1993 = vmatpush.bf16.msra.mxu0 %v6115_v25  ;;  %v8063_v25 = vld [vmem:[%s12641_s2 + $0x34] sm:$0xf0]  ;;  %v6354_v60 = vld [vmem:[%s12641_s2 + $0x4c8] sm:$0xf]  ;;  %v8081_v11 = vld [vmem:[%s12641_s2 + $0xcc] sm:$0xf] }
  0x83   : > { %1966 = vmatpush.bf16.msrb.mxu1 %v5843_v27  ;;  %1945 = vmatmul.bf16.vlgmr.msrb.gmra.mxu2 %v9396_v42  ;;  %v8095_v27 = vld [vmem:[%s12641_s2 + $0x134] sm:$0xf0]  ;;  %v6482_v0 = vld [vmem:[%s12641_s2 + $0x5c8] sm:$0xf]  ;;  %v5847_v20 = vor.u32 %v8081_v11, %v5844_v14  ;;  %v8097_v11 = vld [vmem:[%s12641_s2 + $0x14c] sm:$0xf] }
  0x84   : > { %2007 = vmatpush.bf16.msra.mxu2 %v6243_v26  ;;  %v5890_v26 = vld [vmem:[%s12641_s2 + $0x128] sm:$0xf]  ;;  %v8123_v51 = vld [vmem:[%s12641_s2 + $0x214] sm:$0xf0]  ;;  %v5908_v14 = vld [vmem:[%s12641_s2 + $0x158] sm:$0xf0] }
  0x85   : > { %1980 = vmatpush.bf16.msrb.mxu3 %v5971_v31  ;;  %v5763_v31 = vor.u32 %v8063_v25, %v5762_v24  ;;  %v5891_v35 = vor.u32 %v8095_v27, %v5890_v26  ;;  %v8155_v56 = vld [vmem:[%s12641_s2 + $0x314] sm:$0xf0]  ;;  %v6003_v1 = vor.u32 %v8123_v51, %v6002_v49  ;;  %v6338_v15 = vld [vmem:[%s12641_s2 + $0x4a8] sm:$0xf]  ;;  %v8077_v24 = vld [vmem:[%s12641_s2 + $0xac] sm:$0xf] }
  0x86   : > { %1994 = vmatpush.bf16.msra.mxu0 %v6099_v38  ;;  %v8059_v38 = vld [vmem:[%s12641_s2 + $0x14] sm:$0xf0]  ;;  %v5828_v26 = vld [vmem:[%s12641_s2 + $0xb8] sm:$0xf0]  ;;  %v6322_v27 = vld [vmem:[%s12641_s2 + $0x488] sm:$0xf] }
  0x87   : > { %1967 = vmatpush.bf16.msrb.mxu1 %v5827_v40  ;;  %v8091_v40 = vld [vmem:[%s12641_s2 + $0x114] sm:$0xf0]  ;;  %v5747_v48 = vor.u32 %v8059_v38, %v5746_v36  ;;  %v6450_v29 = vld [vmem:[%s12641_s2 + $0x588] sm:$0xf]  ;;  %v5831_v32 = vor.u32 %v8077_v24, %v5828_v26  ;;  %v8073_v36 = vld [vmem:[%s12641_s2 + $0x8c] sm:$0xf]  ;;  %v5911_v24 = vor.u32 %v8097_v11, %v5908_v14 }
  0x88   : > { %2008 = vmatpush.bf16.msra.mxu2 %v6227_v39  ;;  %v5874_v39 = vld [vmem:[%s12641_s2 + $0x108] sm:$0xf]  ;;  %v8211_v63 = vld [vmem:[%s12641_s2 + $0x4d4] sm:$0xf0]  ;;  %v5940_v49 = vld [vmem:[%s12641_s2 + $0x198] sm:$0xf0] }
  0x89   : > { %1981 = vmatpush.bf16.msrb.mxu3 %v5955_v45  ;;  %v6498_v45 = vld [vmem:[%s12641_s2 + $0x5e8] sm:$0xf]  ;;  %v8243_v2 = vld [vmem:[%s12641_s2 + $0x5d4] sm:$0xf0]  ;;  %v6355_v7 = vor.u32 %v8211_v63, %v6354_v60  ;;  %v8069_v51 = vld [vmem:[%s12641_s2 + $0x6c] sm:$0xf] }
  0x8a   : > { %1995 = vmatpush.bf16.msra.mxu0 %v6083_v52  ;;  %v6130_v52 = vld [vmem:[%s12641_s2 + $0x308] sm:$0xf]  ;;  %v8251_v4 = vld [vmem:[%s12641_s2 + $0x614] sm:$0xf0]  ;;  %v6483_v12 = vor.u32 %v8243_v2, %v6482_v0  ;;  %v8101_v0 = vld [vmem:[%s12641_s2 + $0x16c] sm:$0xf] }
  0x8b   : > { %1968 = vmatpush.bf16.msrb.mxu1 %v5811_v55  ;;  %v6371_v55 = vor.u32 %v8215_v43, %v6370_v41  ;;  %v8199_v41 = vld [vmem:[%s12641_s2 + $0x474] sm:$0xf0]  ;;  %v6434_v43 = vld [vmem:[%s12641_s2 + $0x568] sm:$0xf]  ;;  %v8065_v2 = vld [vmem:[%s12641_s2 + $0x4c] sm:$0xf] }
  0x8c   : > { %2009 = vmatpush.bf16.msra.mxu2 %v6211_v53  ;;  %v5875_v53 = vor.u32 %v8091_v40, %v5874_v39  ;;  %v5812_v39 = vld [vmem:[%s12641_s2 + $0x98] sm:$0xf0]  ;;  %v6306_v40 = vld [vmem:[%s12641_s2 + $0x468] sm:$0xf]  ;;  %v8169_v11 = vld [vmem:[%s12641_s2 + $0x38c] sm:$0xf] }
  0x8d   : > { %1982 = vmatpush.bf16.msrb.mxu3 %v5939_v59  ;;  %6521 = vmatmul.msk.bf16.vlgmr.msrb.gmra.mxu0 %vm1765_vm0, %v9296_v50  ;;  %v6499_v59 = vor.u32 %v8247_v46, %v6498_v45  ;;  %v5815_v46 = vor.u32 %v8073_v36, %v5812_v39  ;;  %v6244_v26 = vld [vmem:[%s12641_s2 + $0x3f8] sm:$0xf0]  ;;  %v8145_v39 = vld [vmem:[%s12641_s2 + $0x2cc] sm:$0xf] }
  0x8e   : > { %1996 = vmatpush.bf16.msra.mxu0 %v6067_v3  ;;  %v6514_v3 = vld [vmem:[%s12641_s2 + $0x608] sm:$0xf] }
  0x8f   : > { %1969 = vmatpush.bf16.msrb.mxu1 %v5795_v6  ;;  %v5863_v6 = vor.u32 %v8085_v57, %v5860_v58  ;;  %v6515_v13 = vor.u32 %v8251_v4, %v6514_v3  ;;  %v6418_v57 = vld [vmem:[%s12641_s2 + $0x548] sm:$0xf]  ;;  %v8227_v58 = vld [vmem:[%s12641_s2 + $0x554] sm:$0xf0]  ;;  %v5780_v4 = vld [vmem:[%s12641_s2 + $0x58] sm:$0xf0] }
  0x90   : > { %2010 = vmatpush.bf16.msra.mxu2 %v6195_v5  ;;  %v6131_v5 = vor.u32 %v8155_v56, %v6130_v52  ;;  %v8195_v56 = vld [vmem:[%s12641_s2 + $0x454] sm:$0xf0]  ;;  %v6419_v3 = vor.u32 %v8227_v58, %v6418_v57  ;;  %v8141_v57 = vld [vmem:[%s12641_s2 + $0x2ac] sm:$0xf]  ;;  %v6084_v58 = vld [vmem:[%s12641_s2 + $0x2b8] sm:$0xf0] }
  0x91   : > { %1983 = vmatpush.bf16.msrb.mxu3 %v5923_v10  ;;  %v5988_v10 = vld [vmem:[%s12641_s2 + $0x1f8] sm:$0xf0] }
  0x92   : > { %1997 = vmatpush.bf16.msra.mxu0 %v6051_v16  ;;  %v8207_v16 = vld [vmem:[%s12641_s2 + $0x4b4] sm:$0xf0]  ;;  %v5991_v19 = vor.u32 %v8117_v9, %v5988_v10 }
  0x93   : > { %1970 = vmatpush.bf16.msrb.mxu1 %v5779_v18  ;;  %v8239_v18 = vld [vmem:[%s12641_s2 + $0x5b4] sm:$0xf0]  ;;  %v6339_v21 = vor.u32 %v8207_v16, %v6338_v15  ;;  %v8061_v15 = vld [vmem:[%s12641_s2 + $0x2c] sm:$0xf]  ;;  %v5764_v16 = vld [vmem:[%s12641_s2 + $0x38] sm:$0xf0] }
  0x94   : > { %2011 = vmatpush.bf16.msra.mxu2 %v6179_v17  ;;  %v6466_v17 = vld [vmem:[%s12641_s2 + $0x5a8] sm:$0xf]  ;;  %v8223_v9 = vld [vmem:[%s12641_s2 + $0x534] sm:$0xf0] }
  0x95   : > { %1984 = vmatpush.bf16.msrb.mxu3 %v5907_v22  ;;  %v8113_v22 = vld [vmem:[%s12641_s2 + $0x1cc] sm:$0xf]  ;;  %v6467_v25 = vor.u32 %v8239_v18, %v6466_v17  ;;  %v6258_v18 = vld [vmem:[%s12641_s2 + $0x408] sm:$0xf] }
  0x96   : > { %1998 = vmatpush.bf16.msra.mxu0 %v6035_v28  ;;  %v8203_v28 = vld [vmem:[%s12641_s2 + $0x494] sm:$0xf0] }
  0x97   : > { %1971 = vmatpush.bf16.msrb.mxu1 %v5763_v31  ;;  %v5975_v31 = vor.u32 %v8113_v22, %v5972_v23  ;;  %v6323_v33 = vor.u32 %v8203_v28, %v6322_v27  ;;  %v8149_v22 = vld [vmem:[%s12641_s2 + $0x2ec] sm:$0xf]  ;;  %v6116_v23 = vld [vmem:[%s12641_s2 + $0x2f8] sm:$0xf0]  ;;  %v5767_v27 = vor.u32 %v8061_v15, %v5764_v16 }
  0x98   : > { %2012 = vmatpush.bf16.msra.mxu2 %v6163_v30  ;;  %v8235_v30 = vld [vmem:[%s12641_s2 + $0x594] sm:$0xf0]  ;;  %v8237_v16 = vld [vmem:[%s12641_s2 + $0x5ac] sm:$0xf] }
  0x99   : > { %1985 = vmatpush.bf16.msrb.mxu3 %v5891_v35  ;;  %v5956_v35 = vld [vmem:[%s12641_s2 + $0x1b8] sm:$0xf0]  ;;  %v6451_v38 = vor.u32 %v8235_v30, %v6450_v29  ;;  %v8093_v29 = vld [vmem:[%s12641_s2 + $0x12c] sm:$0xf] }
  0x9a   : > { %1999 = vmatpush.bf16.msra.mxu0 %v6019_v44  ;;  %v8231_v44 = vld [vmem:[%s12641_s2 + $0x574] sm:$0xf0]  ;;  %v5959_v45 = vor.u32 %v8109_v34, %v5956_v35  ;;  %v5892_v30 = vld [vmem:[%s12641_s2 + $0x138] sm:$0xf0]  ;;  %v8213_v35 = vld [vmem:[%s12641_s2 + $0x4ec] sm:$0xf] }
  0x9b   : > { %1972 = vmatpush.bf16.msrb.mxu1 %v5747_v48  ;;  %v8105_v48 = vld [vmem:[%s12641_s2 + $0x18c] sm:$0xf]  ;;  %v6435_v52 = vor.u32 %v8231_v44, %v6434_v43  ;;  %v5748_v34 = vld [vmem:[%s12641_s2 + $0x18] sm:$0xf0] }
  0x9c   : > { %2013 = vmatpush.bf16.msra.mxu2 %v6147_v47  ;;  %v6307_v47 = vor.u32 %v8199_v41, %v6306_v40  ;;  %v6100_v40 = vld [vmem:[%s12641_s2 + $0x2d8] sm:$0xf0]  ;;  %v5895_v41 = vor.u32 %v8093_v29, %v5892_v30  ;;  %v8177_v43 = vld [vmem:[%s12641_s2 + $0x3cc] sm:$0xf] }
  0x9d   : > { %1986 = vmatpush.bf16.msrb.mxu3 %v5875_v53  ;;  %v5796_v53 = vld [vmem:[%s12641_s2 + $0x78] sm:$0xf0] }
  0x9e   : > { %2000 = vmatpush.bf16.msra.mxu0 %v6003_v1  ;;  %1973 = vmatmul.bf16.vlgmr.msrb.gmra.mxu1 %v9189_v61  ;;  %v5799_v60 = vor.u32 %v8069_v51, %v5796_v53  ;;  %v5924_v1 = vld [vmem:[%s12641_s2 + $0x178] sm:$0xf0]  ;;  %v8245_v51 = vld [vmem:[%s12641_s2 + $0x5ec] sm:$0xf] }
  0x9f   : > { %2021 = vmatpush.bf16.msra.mxu1 %v6371_v55  ;;  %v6290_v55 = vld [vmem:[%s12641_s2 + $0x448] sm:$0xf]  ;;  %v5927_v10 = vor.u32 %v8101_v0, %v5924_v1  ;;  %v6228_v44 = vld [vmem:[%s12641_s2 + $0x3d8] sm:$0xf0]  ;;  %v8209_v53 = vld [vmem:[%s12641_s2 + $0x4cc] sm:$0xf] }
  0xa0   : > { %1987 = vmatmul.bf16.vlgmr.msrb.gmra.mxu3 %v9209_v8  ;;  %2014 = vmatpush.bf16.msra.mxu2 %v6131_v5  ;;  %v6291_v63 = vor.u32 %v8195_v56, %v6290_v55  ;;  %v6274_v5 = vld [vmem:[%s12641_s2 + $0x428] sm:$0xf]  ;;  %v6231_v55 = vor.u32 %v8177_v43, %v6228_v44  ;;  %v6356_v56 = vld [vmem:[%s12641_s2 + $0x4d8] sm:$0xf0] }
  0xa1   : > { %2035 = vmatpush.bf16.msra.mxu3 %v6499_v59  ;;  %2001 = vmatmul.bf16.vlgmr.msra.gmra.mxu0 %v9181_v54  ;;  %v5943_v59 = vor.u32 %v8105_v48, %v5940_v49  ;;  %v6103_v49 = vor.u32 %v8145_v39, %v6100_v40  ;;  %v6359_v1 = vor.u32 %v8209_v53, %v6356_v56  ;;  %v6308_v30 = vld [vmem:[%s12641_s2 + $0x478] sm:$0xf0]  ;;  %v8229_v39 = vld [vmem:[%s12641_s2 + $0x56c] sm:$0xf] }
  0xa2   : > { %2056 = vmatpush.bf16.msrb.mxu0 %v6515_v13  ;;  %v6436_v40 = vld [vmem:[%s12641_s2 + $0x578] sm:$0xf0] }
  0xa3   : > { %2022 = vmatpush.bf16.msra.mxu1 %v6355_v7  ;;  %2015 = vmatmul.bf16.vlgmr.msra.gmra.mxu2 %v9191_v62  ;;  %v6402_v7 = vld [vmem:[%s12641_s2 + $0x528] sm:$0xf]  ;;  %v6292_v44 = vld [vmem:[%s12641_s2 + $0x458] sm:$0xf0] }
  0xa4   : > { %2063 = vmatpush.bf16.msrb.mxu2 %v5863_v6  ;;  %v8191_v6 = vld [vmem:[%s12641_s2 + $0x434] sm:$0xf0]  ;;  %v6403_v17 = vor.u32 %v8223_v9, %v6402_v7  ;;  %v6340_v7 = vld [vmem:[%s12641_s2 + $0x4b8] sm:$0xf0]  ;;  %v8137_v9 = vld [vmem:[%s12641_s2 + $0x28c] sm:$0xf] }
  0xa5   : > { %2036 = vmatpush.bf16.msra.mxu3 %v6483_v12  ;;  %v5783_v12 = vor.u32 %v8065_v2, %v5780_v4  ;;  %v6275_v13 = vor.u32 %v8191_v6, %v6274_v5  ;;  %v6087_v2 = vor.u32 %v8141_v57, %v6084_v58  ;;  %v6484_v4 = vld [vmem:[%s12641_s2 + $0x5d8] sm:$0xf0]  ;;  %v8205_v5 = vld [vmem:[%s12641_s2 + $0x4ac] sm:$0xf] }
  0xa6   : > { %2077 = vmatpush.bf16.msra.mxu0 %v5991_v19  ;;  %v8187_v19 = vld [vmem:[%s12641_s2 + $0x414] sm:$0xf0]  ;;  %v6343_v14 = vor.u32 %v8205_v5, %v6340_v7  ;;  %v6420_v56 = vld [vmem:[%s12641_s2 + $0x558] sm:$0xf0]  ;;  %v8189_v57 = vld [vmem:[%s12641_s2 + $0x42c] sm:$0xf] }
  0xa7   : > { %2023 = vmatpush.bf16.msra.mxu1 %v6339_v21  ;;  %v8219_v21 = vld [vmem:[%s12641_s2 + $0x514] sm:$0xf0]  ;;  %v6259_v28 = vor.u32 %v8187_v19, %v6258_v18  ;;  %v8201_v18 = vld [vmem:[%s12641_s2 + $0x48c] sm:$0xf]  ;;  %v6324_v19 = vld [vmem:[%s12641_s2 + $0x498] sm:$0xf0] }
  0xa8   : > { %2064 = vmatpush.bf16.msrb.mxu2 %v5847_v20  ;;  %v6386_v20 = vld [vmem:[%s12641_s2 + $0x508] sm:$0xf]  ;;  %v6276_v58 = vld [vmem:[%s12641_s2 + $0x438] sm:$0xf0] }
  0xa9   : > { %2037 = vmatpush.bf16.msra.mxu3 %v6467_v25  ;;  %v8181_v25 = vld [vmem:[%s12641_s2 + $0x3ec] sm:$0xf]  ;;  %v6516_v5 = vld [vmem:[%s12641_s2 + $0x618] sm:$0xf0] }
  0xaa   : > { %2078 = vmatpush.bf16.msra.mxu0 %v5975_v31  ;;  %v6387_v31 = vor.u32 %v8219_v21, %v6386_v20  ;;  %v6247_v36 = vor.u32 %v8181_v25, %v6244_v26  ;;  %v8133_v20 = vld [vmem:[%s12641_s2 + $0x26c] sm:$0xf]  ;;  %v6052_v21 = vld [vmem:[%s12641_s2 + $0x278] sm:$0xf0]  ;;  %v6327_v25 = vor.u32 %v8201_v18, %v6324_v19 }
  0xab   : > { %2024 = vmatpush.bf16.msra.mxu1 %v6323_v33  ;;  %v8057_v33 = vld [vmem:[%s12641_s2 + $0xc] sm:$0xf]  ;;  %v6055_v26 = vor.u32 %v8133_v20, %v6052_v21  ;;  %v6260_v18 = vld [vmem:[%s12641_s2 + $0x418] sm:$0xf0]  ;;  %v6646_v20 = vld [vmem:[%s12643_s4 + $0xf0] sm:$0xf] }
  0xac   : > { %2065 = vmatpush.bf16.msrb.mxu2 %v5831_v32  ;;  %v6119_v32 = vor.u32 %v8149_v22, %v6116_v23  ;;  %v8165_v22 = vld [vmem:[%s12641_s2 + $0x36c] sm:$0xf]  ;;  %v6180_v23 = vld [vmem:[%s12641_s2 + $0x378] sm:$0xf0]  ;;  %v8283_v21 = vld [vmem:[%s12643_s4 + $0xf4] sm:$0xf0] }
  0xad   : > { %2038 = vmatpush.bf16.msra.mxu3 %v6451_v38  ;;  %v6372_v38 = vld [vmem:[%s12641_s2 + $0x4f8] sm:$0xf0]  ;;  %v6183_v29 = vor.u32 %v8165_v22, %v6180_v23  ;;  %v6574_v23 = vld [vmem:[%s12643_s4 + $0x60] sm:$0xf] }
  0xae   : > { %2079 = vmatpush.bf16.msra.mxu0 %v5959_v45  ;;  %v5751_v45 = vor.u32 %v8057_v33, %v5748_v34  ;;  %v6375_v48 = vor.u32 %v8213_v35, %v6372_v38  ;;  %v8161_v33 = vld [vmem:[%s12641_s2 + $0x34c] sm:$0xf]  ;;  %v6164_v34 = vld [vmem:[%s12641_s2 + $0x358] sm:$0xf0] }
  0xaf   : > { %2025 = vmatpush.bf16.msra.mxu1 %v6307_v47  ;;  %v5876_v47 = vld [vmem:[%s12641_s2 + $0x118] sm:$0xf0]  ;;  %v6167_v43 = vor.u32 %v8161_v33, %v6164_v34  ;;  %v6566_v34 = vld [vmem:[%s12643_s4 + $0x50] sm:$0xf] }
  0xb0   : > { %2066 = vmatpush.bf16.msrb.mxu2 %v5815_v46  ;;  %v8089_v46 = vld [vmem:[%s12641_s2 + $0x10c] sm:$0xf] }
  0xb1   : > { %2039 = vmatpush.bf16.msra.mxu3 %v6435_v52  ;;  %6522 = vmatmul.msk.bf16.vlgmr.msrb.gmra.mxu0 %vm1765_vm0, %v9296_v50  ;;  %v6500_v52 = vld [vmem:[%s12641_s2 + $0x5f8] sm:$0xf0] }
  0xb2   : > { %2080 = vmatpush.bf16.msra.mxu0 %v5943_v59  ;;  %v5879_v59 = vor.u32 %v8089_v46, %v5876_v47  ;;  %v6503_v0 = vor.u32 %v8245_v51, %v6500_v52  ;;  %v6020_v46 = vld [vmem:[%s12641_s2 + $0x238] sm:$0xf0]  ;;  %v8157_v47 = vld [vmem:[%s12641_s2 + $0x32c] sm:$0xf]  ;;  %v10126_v52 = vld [vmem:[%s12642_s3] sm:$0xf] }
  0xb3   : > { %2026 = vmatpush.bf16.msra.mxu1 %v6291_v63  ;;  %v6212_v63 = vld [vmem:[%s12641_s2 + $0x3b8] sm:$0xf0]  ;;  %v8225_v51 = vld [vmem:[%s12641_s2 + $0x54c] sm:$0xf] }
  0xb4   : > { %2067 = vmatpush.bf16.msrb.mxu2 %v5799_v60  ;;  %v8173_v60 = vld [vmem:[%s12641_s2 + $0x3ac] sm:$0xf]  ;;  %v6423_v7 = vor.u32 %v8225_v51, %v6420_v56  ;;  %v6550_v56 = vld [vmem:[%s12643_s4 + $0x30] sm:$0xf] }
  0xb5   : > { %2040 = vmatpush.bf16.msra.mxu3 %v6419_v3  ;;  %v8241_v3 = vld [vmem:[%s12641_s2 + $0x5cc] sm:$0xf]  ;;  %v6215_v6 = vor.u32 %v8173_v60, %v6212_v63 }
  0xb6   : > { %2081 = vmatpush.bf16.msra.mxu0 %v5927_v10  ;;  %v6068_v10 = vld [vmem:[%s12641_s2 + $0x298] sm:$0xf0]  ;;  %v8121_v63 = vld [vmem:[%s12641_s2 + $0x20c] sm:$0xf] }
  0xb7   : > { %2027 = vmatpush.bf16.msra.mxu1 %v6275_v13  ;;  %v6487_v13 = vor.u32 %v8241_v3, %v6484_v4  ;;  %v6071_v15 = vor.u32 %v8137_v9, %v6068_v10  ;;  %v6132_v3 = vld [vmem:[%s12641_s2 + $0x318] sm:$0xf0]  ;;  %v8249_v4 = vld [vmem:[%s12641_s2 + $0x60c] sm:$0xf]  ;;  %v6582_v9 = vld [vmem:[%s12643_s4 + $0x70] sm:$0xf] }
  0xb8   : > { %2068 = vmatpush.bf16.msrb.mxu2 %v5783_v12  ;;  %v6196_v12 = vld [vmem:[%s12641_s2 + $0x398] sm:$0xf0]  ;;  %v8267_v10 = vld [vmem:[%s12643_s4 + $0x74] sm:$0xf0] }
  0xb9   : > { %2041 = vmatpush.bf16.msra.mxu3 %v6403_v17  ;;  %v6468_v17 = vld [vmem:[%s12641_s2 + $0x5b8] sm:$0xf0]  ;;  %v6583_v19 = vor.u32 %v8267_v10, %v6582_v9 }
  0xba   : > { %2082 = vmatpush.bf16.msra.mxu0 %v5911_v24  ;;  %v6471_v24 = vor.u32 %v8237_v16, %v6468_v17  ;;  %v8185_v17 = vld [vmem:[%s12641_s2 + $0x40c] sm:$0xf] }
  0xbb   : > { %2028 = vmatpush.bf16.msra.mxu1 %v6259_v28  ;;  %v8197_v28 = vld [vmem:[%s12641_s2 + $0x46c] sm:$0xf] }
  0xbc   : > { %2069 = vmatpush.bf16.msrb.mxu2 %v5767_v27  ;;  %v8233_v27 = vld [vmem:[%s12641_s2 + $0x58c] sm:$0xf] }
  0xbd   : > { %2042 = vmatpush.bf16.msra.mxu3 %v6387_v31  ;;  %v8129_v31 = vld [vmem:[%s12641_s2 + $0x24c] sm:$0xf] }
  0xbe   : > { %2083 = vmatpush.bf16.msra.mxu0 %v5895_v41  ;;  %2029 = vmatmul.bf16.vlgmr.msra.gmra.mxu1 %v9385_v37  ;;  %v8193_v41 = vld [vmem:[%s12641_s2 + $0x44c] sm:$0xf] }
  0xbf   : > { %2091 = vmatpush.bf16.msrb.mxu1 %v6119_v32  ;;  %v6036_v32 = vld [vmem:[%s12641_s2 + $0x258] sm:$0xf0]  ;;  %v6295_v53 = vor.u32 %v8193_v41, %v6292_v44  ;;  %v6630_v44 = vld [vmem:[%s12643_s4 + $0xd0] sm:$0xf] }
  0xc0   : > { %2043 = vmatmul.bf16.vlgmr.msra.gmra.mxu3 %v9396_v42  ;;  %2070 = vmatpush.bf16.msrb.mxu2 %v5751_v45  ;;  %v6039_v38 = vor.u32 %v8129_v31, %v6036_v32  ;;  %v8125_v45 = vld [vmem:[%s12641_s2 + $0x22c] sm:$0xf]  ;;  %v8281_v31 = vld [vmem:[%s12643_s4 + $0xe4] sm:$0xf0] }
  0xc1   : > { %2105 = vmatpush.bf16.msrb.mxu3 %v6247_v36  ;;  %v6311_v36 = vor.u32 %v8197_v28, %v6308_v30  ;;  %v6647_v28 = vor.u32 %v8283_v21, %v6646_v20  ;;  %v6638_v30 = vld [vmem:[%s12643_s4 + $0xe0] sm:$0xf]  ;;  %v8271_v21 = vld [vmem:[%s12643_s4 + $0x94] sm:$0xf0] }
  0xc2   : > { %2084 = vmatpush.bf16.msra.mxu0 %v5879_v59  ;;  %v1778_v59 = vpop.f32.mrf.mxu0  ;;  %v6639_v41 = vor.u32 %v8281_v31, %v6638_v30  ;;  %v6590_v31 = vld [vmem:[%s12643_s4 + $0x80] sm:$0xf] }
  0xc3   : > { %2092 = vmatpush.bf16.msrb.mxu1 %v6103_v49  ;;  %2071 = vmatmul.bf16.vlgmr.msrb.gmra.mxu2 %v9189_v61  ;;  %v6199_v61 = vor.u32 %v8169_v11, %v6196_v12  ;;  %v6439_v49 = vor.u32 %v8229_v39, %v6436_v40  ;;  %v6279_v11 = vor.u32 %v8189_v57, %v6276_v58  ;;  %v1820_v39 = vpop.f32.mrf.mxu3  ;;  %v8259_v57 = vld [vmem:[%s12643_s4 + $0x34] sm:$0xf0] }
  0xc4   : > { %2119 = vmatpush.bf16.msra.mxu2 %v6375_v48  ;;  %v6148_v48 = vld [vmem:[%s12641_s2 + $0x338] sm:$0xf0] }
  0xc5   : > { %2106 = vmatpush.bf16.msrb.mxu3 %v6231_v55  ;;  %2085 = vmatmul.bf16.vlgmr.msra.gmra.mxu0 %v9209_v8  ;;  %v6452_v8 = vld [vmem:[%s12641_s2 + $0x598] sm:$0xf0]  ;;  %v6023_v55 = vor.u32 %v8125_v45, %v6020_v46  ;;  %v6151_v60 = vor.u32 %v8157_v47, %v6148_v48  ;;  %v8279_v45 = vld [vmem:[%s12643_s4 + $0xd4] sm:$0xf0]  ;;  %v8261_v46 = vld [vmem:[%s12643_s4 + $0x44] sm:$0xf0] }
  0xc6   : > { %2133 = vmatpush.bf16.msrb.mxu0 %v6503_v0  ;;  %v6455_v35 = vor.u32 %v8233_v27, %v6452_v8  ;;  %v6004_v0 = vld [vmem:[%s12641_s2 + $0x218] sm:$0xf0]  ;;  %v6631_v48 = vor.u32 %v8279_v45, %v6630_v44 }
  0xc7   : > { %2093 = vmatpush.bf16.msrb.mxu1 %v6087_v2  ;;  %v1792_v2 = vpop.f32.mrf.mxu1  ;;  %v6007_v12 = vor.u32 %v8121_v63, %v6004_v0  ;;  %v6388_v27 = vld [vmem:[%s12641_s2 + $0x518] sm:$0xf0]  ;;  %v6551_v0 = vor.u32 %v8259_v57, %v6550_v56  ;;  %v8260_v56 = vld [vmem:[%s12643_s4 + $0x44] sm:$0xf]  ;;  %v6560_v57 = vld [vmem:[%s12643_s4 + $0x48] sm:$0xf0] }
  0xc8   : > { %2120 = vmatpush.bf16.msra.mxu2 %v6359_v1  ;;  %v8153_v1 = vld [vmem:[%s12641_s2 + $0x30c] sm:$0xf] }
  0xc9   : > { %2107 = vmatpush.bf16.msrb.mxu3 %v6215_v6  ;;  %v1806_v6 = vpop.f32.mrf.mxu2  ;;  %v6135_v16 = vor.u32 %v8153_v1, %v6132_v3  ;;  %v6614_v1 = vld [vmem:[%s12643_s4 + $0xb0] sm:$0xf] }
  0xca   : > { %2134 = vmatpush.bf16.msrb.mxu0 %v6487_v13  ;;  %v8221_v13 = vld [vmem:[%s12641_s2 + $0x52c] sm:$0xf]  ;;  %v1780_v32 = vpop.f32.mrf.mxu0 }
  0xcb   : > { %2094 = vmatpush.bf16.msrb.mxu1 %v6071_v15  ;;  %v742_v15 = vperm.slane %v10126_v52, 0  ;;  %v1822_v3 = vpop.f32.mrf.mxu3 }
  0xcc   : > { %2121 = vmatpush.bf16.msra.mxu2 %v6343_v14  ;;  %v6404_v14 = vld [vmem:[%s12641_s2 + $0x538] sm:$0xf0] }
  0xcd   : > { %2108 = vmatpush.bf16.msrb.mxu3 %v6199_v61  ;;  %v6519_v61 = vor.u32 %v8249_v4, %v6516_v5  ;;  %v6407_v22 = vor.u32 %v8221_v13, %v6404_v14  ;;  %v1779_v8 = vadd.f32 %v1778_v59, %v742_v15  ;;  %v6542_v5 = vld [vmem:[%s12643_s4 + $0x20] sm:$0xf] }
  0xce   : > { %2135 = vmatpush.bf16.msrb.mxu0 %v6471_v24  ;;  %v8265_v24 = vld [vmem:[%s12643_s4 + $0x64] sm:$0xf0] }
  0xcf   : > { %2095 = vmatpush.bf16.msrb.mxu1 %v6055_v26  ;;  %v8217_v26 = vld [vmem:[%s12641_s2 + $0x50c] sm:$0xf] }
  0xd0   : > { %2122 = vmatpush.bf16.msra.mxu2 %v6327_v25  ;;  %v6263_v25 = vor.u32 %v8185_v17, %v6260_v18  ;;  %v6391_v33 = vor.u32 %v8217_v26, %v6388_v27  ;;  %v8266_v27 = vld [vmem:[%s12643_s4 + $0x74] sm:$0xf] }
  0xd1   : > { %2109 = vmatpush.bf16.msrb.mxu3 %v6183_v29  ;;  %v6575_v29 = vor.u32 %v8265_v24, %v6574_v23  ;;  %v1808_v40 = vpop.f32.mrf.mxu2  ;;  %v6526_v24 = vld [vmem:[%s12643_s4] sm:$0xf] }
  0xd2   : > { %2136 = vmatpush.bf16.msrb.mxu0 %v6455_v35  ;;  %v8263_v35 = vld [vmem:[%s12643_s4 + $0x54] sm:$0xf0] }
  0xd3   : > { %2096 = vmatpush.bf16.msrb.mxu1 %v6039_v38  ;;  %v1793_v38 = vadd.f32 %v1792_v2, %v1779_v8  ;;  %v8275_v2 = vld [vmem:[%s12643_s4 + $0xb4] sm:$0xf0]  ;;  %v6584_v8 = vld [vmem:[%s12643_s4 + $0x78] sm:$0xf0] }
  0xd4   : > { %2123 = vmatpush.bf16.msra.mxu2 %v6311_v36  ;;  %v1794_v36 = vpop.f32.mrf.mxu1 }
  0xd5   : > { %2110 = vmatpush.bf16.msrb.mxu3 %v6167_v43  ;;  %v1781_v43 = vadd.f32 %v1780_v32, %v742_v15  ;;  %v1807_v47 = vadd.f32 %v1806_v6, %v1793_v38  ;;  %v8257_v6 = vld [vmem:[%s12643_s4 + $0x24] sm:$0xf0]  ;;  %v6534_v15 = vld [vmem:[%s12643_s4 + $0x10] sm:$0xf] }
  0xd6   : > { %2137 = vmatpush.bf16.msrb.mxu0 %v6439_v49  ;;  %v6543_v10 = vor.u32 %v8257_v6, %v6542_v5  ;;  %v8269_v32 = vld [vmem:[%s12643_s4 + $0x84] sm:$0xf0] }
  0xd7   : > { %2097 = vmatpush.bf16.msrb.mxu1 %v6023_v55  ;;  %v1795_v49 = vadd.f32 %v1794_v36, %v1781_v43  ;;  %v1821_v58 = vadd.f32 %v1820_v39, %v1807_v47  ;;  %v6648_v36 = vld [vmem:[%s12643_s4 + $0xf8] sm:$0xf0]  ;;  %v8264_v39 = vld [vmem:[%s12643_s4 + $0x64] sm:$0xf]  ;;  %v6591_v43 = vor.u32 %v8269_v32, %v6590_v31  ;;  %v8262_v47 = vld [vmem:[%s12643_s4 + $0x54] sm:$0xf] }
  0xd8   : > { %2124 = vmatpush.bf16.msra.mxu2 %v6295_v53  ;;  %v8277_v53 = vld [vmem:[%s12643_s4 + $0xc4] sm:$0xf0]  ;;  %v8252_v31 = vld [vmem:[%s12643_s4 + $0x4] sm:$0xf]  ;;  %v8270_v32 = vld [vmem:[%s12643_s4 + $0x94] sm:$0xf] }
  0xd9   : > { %2111 = vmatpush.bf16.msrb.mxu3 %v6151_v60  ;;  %v1862_v59 = vpop.f32.mrf.mxu2  ;;  %v1809_v63 = vadd.f32 %v1808_v40, %v1795_v49  ;;  %v6576_v40 = vld [vmem:[%s12643_s4 + $0x68] sm:$0xf0] }
  0xda   : > { %2138 = vmatpush.bf16.msrb.mxu0 %v6423_v7  ;;  %v1834_v55 = vpop.f32.mrf.mxu0  ;;  %v6615_v7 = vor.u32 %v8275_v2, %v6614_v1  ;;  %v6579_v45 = vor.u32 %v8264_v39, %v6576_v40  ;;  %v8258_v1 = vld [vmem:[%s12643_s4 + $0x34] sm:$0xf]  ;;  %v6552_v2 = vld [vmem:[%s12643_s4 + $0x38] sm:$0xf0]  ;;  %v8295_v39 = vld [vmem:[%s12643_s4 + $0x154] sm:$0xf0] }
  0xdb   : > { %2098 = vmatpush.bf16.msrb.mxu1 %v6007_v12  ;;  %v1835_v4 = vadd.f32 %v1834_v55, %v1821_v58  ;;  %v1823_v9 = vadd.f32 %v1822_v3, %v1809_v63  ;;  %v8273_v12 = vld [vmem:[%s12643_s4 + $0xa4] sm:$0xf0]  ;;  %v743_v55 = vperm.slane %v10126_v52, 1  ;;  %v6624_v63 = vld [vmem:[%s12643_s4 + $0xc8] sm:$0xf0]  ;;  %v6555_v6 = vor.u32 %v8258_v1, %v6552_v2 }
  0xdc   : > { %2125 = vmatpush.bf16.msra.mxu2 %v6279_v11  ;;  %v6606_v11 = vld [vmem:[%s12643_s4 + $0xa0] sm:$0xf] }
  0xdd   : > { %2112 = vmatpush.bf16.msrb.mxu3 %v6135_v16  ;;  %v8255_v16 = vld [vmem:[%s12643_s4 + $0x14] sm:$0xf0] }
  0xde   : > { %2139 = vmatpush.bf16.msrb.mxu0 %v6407_v22  ;;  %2099 = vmatmul.bf16.vlgmr.msrb.gmra.mxu1 %v9181_v54  ;;  %v6567_v54 = vor.u32 %v8263_v35, %v6566_v34  ;;  %v6535_v20 = vor.u32 %v8255_v16, %v6534_v15  ;;  %v6587_v34 = vor.u32 %v8266_v27, %v6584_v8  ;;  %v8282_v35 = vld [vmem:[%s12643_s4 + $0xf4] sm:$0xf]  ;;  %v6710_v15 = vld [vmem:[%s12643_s4 + $0x170] sm:$0xf]  ;;  %v8299_v16 = vld [vmem:[%s12643_s4 + $0x174] sm:$0xf0] }
  0xdf   : > { %2154 = vmatpush.bf16.msra.mxu1 %v6519_v61  ;;  %v6607_v61 = vor.u32 %v8273_v12, %v6606_v11 }
  0xe0   : > { %2113 = vmatmul.bf16.vlgmr.msrb.gmra.mxu3 %v9191_v62  ;;  %2126 = vmatpush.bf16.msra.mxu2 %v6263_v25  ;;  %v6558_v62 = vld [vmem:[%s12643_s4 + $0x40] sm:$0xf]  ;;  %v8253_v25 = vld [vmem:[%s12643_s4 + $0x4] sm:$0xf0] }
  0xe1   : > { %2563 = vmatpush.bf16.msra.mxu3 %v6583_v19  ;;  %v6559_v51 = vor.u32 %v8261_v46, %v6558_v62  ;;  %v1864_v23 = vpop.f32.mrf.mxu2  ;;  %v6527_v30 = vor.u32 %v8253_v25, %v6526_v24  ;;  %v8280_v62 = vld [vmem:[%s12643_s4 + $0xe4] sm:$0xf]  ;;  %v6640_v46 = vld [vmem:[%s12643_s4 + $0xe8] sm:$0xf0]  ;;  %v6536_v24 = vld [vmem:[%s12643_s4 + $0x18] sm:$0xf0] }
  0xe2   : > { %2140 = vmatpush.bf16.msrb.mxu0 %v6391_v33  ;;  %v1836_v14 = vpop.f32.mrf.mxu0  ;;  %v6643_v49 = vor.u32 %v8280_v62, %v6640_v46  ;;  %v6702_v25 = vld [vmem:[%s12643_s4 + $0x160] sm:$0xf]  ;;  %v6592_v62 = vld [vmem:[%s12643_s4 + $0x88] sm:$0xf0] }
  0xe3   : > { %2577 = vmatpush.bf16.msrb.mxu1 %v6647_v28  ;;  %2127 = vmatmul.bf16.vlgmr.msra.gmra.mxu2 %v9385_v37  ;;  %v6622_v37 = vld [vmem:[%s12643_s4 + $0xc0] sm:$0xf]  ;;  %v1837_v17 = vadd.f32 %v1836_v14, %v1823_v9  ;;  %v1876_v38 = vpop.f32.mrf.mxu3  ;;  %v8274_v9 = vld [vmem:[%s12643_s4 + $0xb4] sm:$0xf]  ;;  %v6544_v14 = vld [vmem:[%s12643_s4 + $0x28] sm:$0xf0] }
  0xe4   : > { %v6623_v60 = vor.u32 %v8277_v53, %v6622_v37  ;;  %v8278_v37 = vld [vmem:[%s12643_s4 + $0xd4] sm:$0xf]  ;;  %v6632_v53 = vld [vmem:[%s12643_s4 + $0xd8] sm:$0xf0] }
  0xe5   : > { %2564 = vmatpush.bf16.msra.mxu3 %v6575_v29  ;;  %2141 = vmatmul.bf16.vlgmr.msrb.gmra.mxu0 %v9396_v42  ;;  %v1848_v42 = vpop.f32.mrf.mxu1  ;;  %v6635_v58 = vor.u32 %v8278_v37, %v6632_v53 }
  0xe6   : > { %v1849_v13 = vadd.f32 %v1848_v42, %v1835_v4 }
  0xe7   : > { %2578 = vmatpush.bf16.msrb.mxu1 %v6639_v41 }
  0xe8   : > { %v1863_v22 = vadd.f32 %v1862_v59, %v1849_v13  ;;  %v6563_v59 = vor.u32 %v8260_v56, %v6560_v57  ;;  %v6678_v56 = vld [vmem:[%s12643_s4 + $0x130] sm:$0xf]  ;;  %v8291_v57 = vld [vmem:[%s12643_s4 + $0x134] sm:$0xf0] }
  0xe9   : > { %2565 = vmatpush.bf16.msra.mxu3 %v6567_v54  ;;  %v6651_v54 = vor.u32 %v8282_v35, %v6648_v36  ;;  %v1890_v44 = vpop.f32.mrf.mxu2  ;;  %v6528_v36 = vld [vmem:[%s12643_s4 + $0x8] sm:$0xf0] }
  0xea   : > { %v2161_v33 = vmax.f32 %v1863_v22, 0.0 }
  0xeb   : > { %2579 = vmatpush.bf16.msrb.mxu1 %v6631_v48  ;;  %v6568_v48 = vld [vmem:[%s12643_s4 + $0x58] sm:$0xf0]  ;;  %v1878_v42 = vpop.f32.mrf.mxu3 }
  0xec   : > { %v1879_v12 = vadd.f32 %v1878_v42, %v743_v55  ;;  %v6679_v42 = vor.u32 %v8291_v57, %v6678_v56 }
  0xed   : > { %2566 = vmatpush.bf16.msra.mxu3 %v6559_v51  ;;  %v1850_v18 = vpop.f32.mrf.mxu1  ;;  %v6571_v51 = vor.u32 %v8262_v47, %v6568_v48  ;;  %v6686_v48 = vld [vmem:[%s12643_s4 + $0x140] sm:$0xf] }
  0xee   : > { %6523 = vmatmul.msk.bf16.vlgmr.msra.gmra.mxu1 %vm1765_vm0, %v9296_v50  ;;  %v1851_v19 = vadd.f32 %v1850_v18, %v1837_v17  ;;  %v6598_v50 = vld [vmem:[%s12643_s4 + $0x90] sm:$0xf]  ;;  %v6711_v17 = vor.u32 %v8299_v16, %v6710_v15  ;;  %v8298_v15 = vld [vmem:[%s12643_s4 + $0x174] sm:$0xf]  ;;  %v6712_v16 = vld [vmem:[%s12643_s4 + $0x178] sm:$0xf0] }
  0xef   : > { %2580 = vmatpush.bf16.msrb.mxu1 %v6623_v60  ;;  %v6599_v28 = vor.u32 %v8271_v21, %v6598_v50  ;;  %v8276_v60 = vld [vmem:[%s12643_s4 + $0xc4] sm:$0xf]  ;;  %v6608_v50 = vld [vmem:[%s12643_s4 + $0xa8] sm:$0xf0] }
  0xf0   : > { %v1865_v26 = vadd.f32 %v1864_v23, %v1851_v19  ;;  %v6627_v5 = vor.u32 %v8276_v60, %v6624_v63  ;;  %v8254_v19 = vld [vmem:[%s12643_s4 + $0x14] sm:$0xf]  ;;  %2591 = vmatpush.bf16.msrb.mxu2 %v6711_v17  ;;  %v6670_v60 = vld [vmem:[%s12643_s4 + $0x120] sm:$0xf]  ;;  %v8289_v63 = vld [vmem:[%s12643_s4 + $0x124] sm:$0xf0]  ;;  %v6715_v17 = vor.u32 %v8298_v15, %v6712_v16 }
  0xf1   : > { %2567 = vmatpush.bf16.msra.mxu3 %v6551_v0  ;;  %v1877_v0 = vadd.f32 %v1876_v38, %v743_v55  ;;  %v1892_v4 = vpop.f32.mrf.mxu2  ;;  %v6694_v38 = vld [vmem:[%s12643_s4 + $0x150] sm:$0xf]  ;;  %v6671_v1 = vor.u32 %v8289_v63, %v6670_v60 }
  0xf2   : > { %v2165_v29 = vmax.f32 %v1865_v26, 0.0  ;;  %v1893_v22 = vadd.f32 %v1892_v4, %v1879_v12  ;;  %v8297_v26 = vld [vmem:[%s12643_s4 + $0x164] sm:$0xf0]  ;;  %v6654_v12 = vld [vmem:[%s12643_s4 + $0x100] sm:$0xf] }
  0xf3   : > { %2581 = vmatpush.bf16.msrb.mxu1 %v6615_v7  ;;  %v8256_v7 = vld [vmem:[%s12643_s4 + $0x24] sm:$0xf]  ;;  %v1891_v11 = vadd.f32 %v1890_v44, %v1877_v0  ;;  %v6703_v8 = vor.u32 %v8297_v26, %v6702_v25  ;;  %v6531_v44 = vor.u32 %v8252_v31, %v6528_v36  ;;  %v6696_v25 = vld [vmem:[%s12643_s4 + $0x158] sm:$0xf0] }
  0xf4   : > { %v10294_v41 = vpack.c.bf16 %v2165_v29, %v2161_v33  ;;  %v6600_v33 = vld [vmem:[%s12643_s4 + $0x98] sm:$0xf0] }
  0xf5   : > { %2568 = vmatpush.bf16.msra.mxu3 %v6543_v10  ;;  %v6616_v10 = vld [vmem:[%s12643_s4 + $0xb8] sm:$0xf0]  ;;  %2592 = vmatpush.bf16.msrb.mxu2 %v6703_v8  ;;  %v8313_v8 = vld [vmem:[%s12643_s4 + $0x1e4] sm:$0xf0] }
  0xf6   : > { %v6619_v18 = vor.u32 %v8274_v9, %v6616_v10  ;;  %v6662_v9 = vld [vmem:[%s12643_s4 + $0x110] sm:$0xf]  ;;  %v8287_v10 = vld [vmem:[%s12643_s4 + $0x114] sm:$0xf0] }
  0xf7   : > { %2582 = vmatpush.bf16.msrb.mxu1 %v6607_v61  ;;  %v6547_v61 = vor.u32 %v8256_v7, %v6544_v14 }
  0xf9   : > { %2569 = vmatpush.bf16.msra.mxu3 %v6535_v20  ;;  %v8272_v20 = vld [vmem:[%s12643_s4 + $0xa4] sm:$0xf] }
  0xfa   : > { %v1904_v3 = vpop.f32.mrf.mxu0 }
  0xfb   : > { %2583 = vmatpush.bf16.msrb.mxu1 %v6599_v28  ;;  %v1918_v13 = vpop.f32.mrf.mxu1  ;;  %v1905_v21 = vadd.f32 %v1904_v3, %v1891_v11  ;;  %v6611_v28 = vor.u32 %v8272_v20, %v6608_v50  ;;  %v6663_v11 = vor.u32 %v8287_v10, %v6662_v9  ;;  %v6774_v20 = vld [vmem:[%s12643_s4 + $0x1f0] sm:$0xf]  ;;  %v8315_v50 = vld [vmem:[%s12643_s4 + $0x1f4] sm:$0xf0] }
  0xfc   : > { %v6726_v10 = vld [vmem:[%s12643_s4 + $0x190] sm:$0xf] }
  0xfd   : > { %2570 = vmatpush.bf16.msra.mxu3 %v6527_v30  ;;  %v6539_v30 = vor.u32 %v8254_v19, %v6536_v24  ;;  %v6775_v24 = vor.u32 %v8315_v50, %v6774_v20  ;;  %v8314_v50 = vld [vmem:[%s12643_s4 + $0x1f4] sm:$0xf] }
  0xff   : > { %2584 = vmatpush.bf16.msrb.mxu1 %v6591_v43  ;;  %v6695_v43 = vor.u32 %v8295_v39, %v6694_v38  ;;  %2605 = vmatpush.bf16.msra.mxu0 %v6775_v24  ;;  %v8290_v38 = vld [vmem:[%s12643_s4 + $0x134] sm:$0xf]  ;;  %v6680_v39 = vld [vmem:[%s12643_s4 + $0x138] sm:$0xf0] }
 0x100   : > { %2571 = vmatmul.bf16.vlgmr.msra.gmra.mxu3 %v10294_v41 }
 0x101   : > { %2619 = vmatpush.bf16.msrb.mxu3 %v6587_v34  ;;  %v1919_v34 = vadd.f32 %v1918_v13, %v1905_v21  ;;  %2593 = vmatpush.bf16.msrb.mxu2 %v6695_v43  ;;  %v8285_v13 = vld [vmem:[%s12643_s4 + $0x104] sm:$0xf0]  ;;  %v8294_v21 = vld [vmem:[%s12643_s4 + $0x154] sm:$0xf]  ;;  %v6750_v43 = vld [vmem:[%s12643_s4 + $0x1c0] sm:$0xf] }
 0x102   : > { %v1906_v27 = vpop.f32.mrf.mxu0  ;;  %v6655_v14 = vor.u32 %v8285_v13, %v6654_v12  ;;  %v6699_v26 = vor.u32 %v8294_v21, %v6696_v25  ;;  %v6776_v21 = vld [vmem:[%s12643_s4 + $0x1f8] sm:$0xf0] }
 0x103   : > { %2633 = vmatpush.bf16.msra.mxu1 %v6651_v54  ;;  %v1932_v23 = vpop.f32.mrf.mxu3  ;;  %v1907_v35 = vadd.f32 %v1906_v27, %v1893_v22  ;;  %v1920_v40 = vpop.f32.mrf.mxu1  ;;  %v6603_v54 = vor.u32 %v8270_v32, %v6600_v33  ;;  %v6766_v27 = vld [vmem:[%s12643_s4 + $0x1e0] sm:$0xf]  ;;  %v6758_v33 = vld [vmem:[%s12643_s4 + $0x1d0] sm:$0xf]  ;;  %v6779_v24 = vor.u32 %v8314_v50, %v6776_v21 }
 0x104   : > { %v1933_v46 = vadd.f32 %v1932_v23, %v1919_v34  ;;  %v8311_v34 = vld [vmem:[%s12643_s4 + $0x1d4] sm:$0xf0] }
 0x105   : > { %2620 = vmatpush.bf16.msrb.mxu3 %v6579_v45  ;;  %v8268_v45 = vld [vmem:[%s12643_s4 + $0x84] sm:$0xf]  ;;  %v1921_v47 = vadd.f32 %v1920_v40, %v1907_v35  ;;  %v744_v35 = vperm.slane %v10126_v52, 2  ;;  %v6759_v36 = vor.u32 %v8311_v34, %v6758_v33  ;;  %v6683_v40 = vor.u32 %v8290_v38, %v6680_v39  ;;  %v6760_v33 = vld [vmem:[%s12643_s4 + $0x1d8] sm:$0xf0] }
 0x106   : > { %v1946_v29 = vpop.f32.mrf.mxu2  ;;  %v6595_v55 = vor.u32 %v8268_v45, %v6592_v62 }
 0x107   : > { %2634 = vmatpush.bf16.msra.mxu1 %v6643_v49  ;;  %v8293_v49 = vld [vmem:[%s12643_s4 + $0x144] sm:$0xf0] }
 0x108   : > { %v6687_v53 = vor.u32 %v8293_v49, %v6686_v48 }
 0x109   : > { %2621 = vmatpush.bf16.msrb.mxu3 %v6571_v51 }
 0x10a   : > { %v1960_v37 = vpop.f32.mrf.mxu0  ;;  %2594 = vmatpush.bf16.msrb.mxu2 %v6687_v53  ;;  %v8286_v53 = vld [vmem:[%s12643_s4 + $0x114] sm:$0xf] }
 0x10b   : > { %2635 = vmatpush.bf16.msra.mxu1 %v6635_v58  ;;  %v1934_v51 = vpop.f32.mrf.mxu3  ;;  %v1947_v58 = vadd.f32 %v1946_v29, %v1933_v46  ;;  %v6767_v29 = vor.u32 %v8313_v8, %v6766_v27  ;;  %v8312_v27 = vld [vmem:[%s12643_s4 + $0x1e4] sm:$0xf]  ;;  %v6768_v8 = vld [vmem:[%s12643_s4 + $0x1e8] sm:$0xf0] }
 0x10d   : > { %2622 = vmatpush.bf16.msrb.mxu3 %v6563_v59  ;;  %v1935_v59 = vadd.f32 %v1934_v51, %v1921_v47  ;;  %v1961_v2 = vadd.f32 %v1960_v37, %v1947_v58  ;;  %2606 = vmatpush.bf16.msra.mxu0 %v6767_v29  ;;  %v6672_v47 = vld [vmem:[%s12643_s4 + $0x128] sm:$0xf0]  ;;  %v6742_v51 = vld [vmem:[%s12643_s4 + $0x1b0] sm:$0xf]  ;;  %v8307_v37 = vld [vmem:[%s12643_s4 + $0x1b4] sm:$0xf0] }
 0x10e   : > { %v1948_v0 = vpop.f32.mrf.mxu2  ;;  %2595 = vmatpush.bf16.msrb.mxu2 %v6679_v42  ;;  %v6743_v57 = vor.u32 %v8307_v37, %v6742_v51  ;;  %v6664_v42 = vld [vmem:[%s12643_s4 + $0x118] sm:$0xf0]  ;;  %v8304_v37 = vld [vmem:[%s12643_s4 + $0x1a4] sm:$0xf] }
 0x10f   : > { %2636 = vmatpush.bf16.msra.mxu1 %v6627_v5  ;;  %v1949_v3 = vadd.f32 %v1948_v0, %v1935_v59  ;;  %v6667_v60 = vor.u32 %v8286_v53, %v6664_v42  ;;  %v6736_v53 = vld [vmem:[%s12643_s4 + $0x1a8] sm:$0xf0] }
 0x111   : > { %2623 = vmatpush.bf16.msrb.mxu3 %v6555_v6  ;;  %v2162_v6 = vmax.f32 %v1961_v2, 0.0  ;;  %2607 = vmatpush.bf16.msra.mxu0 %v6759_v36  ;;  %v8305_v2 = vld [vmem:[%s12643_s4 + $0x1a4] sm:$0xf0] }
 0x112   : > { %v1962_v4 = vpop.f32.mrf.mxu0  ;;  %2596 = vmatpush.bf16.msrb.mxu2 %v6671_v1  ;;  %v6734_v1 = vld [vmem:[%s12643_s4 + $0x1a0] sm:$0xf] }
 0x113   : > { %2637 = vmatpush.bf16.msra.mxu1 %v6619_v18  ;;  %v1963_v5 = vadd.f32 %v1962_v4, %v1949_v3  ;;  %v8296_v18 = vld [vmem:[%s12643_s4 + $0x164] sm:$0xf]  ;;  %v6735_v4 = vor.u32 %v8305_v2, %v6734_v1  ;;  %v6720_v2 = vld [vmem:[%s12643_s4 + $0x188] sm:$0xf0] }
 0x114   : > { %v8284_v3 = vld [vmem:[%s12643_s4 + $0x104] sm:$0xf] }
 0x115   : > { %2624 = vmatpush.bf16.msrb.mxu3 %v6547_v61  ;;  %v2166_v7 = vmax.f32 %v1963_v5, 0.0  ;;  %v6704_v61 = vld [vmem:[%s12643_s4 + $0x168] sm:$0xf0]  ;;  %v8300_v1 = vld [vmem:[%s12643_s4 + $0x184] sm:$0xf] }
 0x116   : > { %2597 = vmatpush.bf16.msrb.mxu2 %v6663_v11  ;;  %v6707_v19 = vor.u32 %v8296_v18, %v6704_v61  ;;  %v6656_v5 = vld [vmem:[%s12643_s4 + $0x108] sm:$0xf0]  ;;  %v8303_v11 = vld [vmem:[%s12643_s4 + $0x194] sm:$0xf0]  ;;  %v8301_v18 = vld [vmem:[%s12643_s4 + $0x184] sm:$0xf0] }
 0x117   : > { %2638 = vmatpush.bf16.msra.mxu1 %v6611_v28  ;;  %v8292_v28 = vld [vmem:[%s12643_s4 + $0x144] sm:$0xf]  ;;  %v6659_v9 = vor.u32 %v8284_v3, %v6656_v5  ;;  %v6727_v12 = vor.u32 %v8303_v11, %v6726_v10 }
 0x119   : > { %2625 = vmatpush.bf16.msrb.mxu3 %v6539_v30  ;;  %v6688_v30 = vld [vmem:[%s12643_s4 + $0x148] sm:$0xf0] }
 0x11a   : > { %2598 = vmatpush.bf16.msrb.mxu2 %v6655_v14  ;;  %v6691_v31 = vor.u32 %v8292_v28, %v6688_v30  ;;  %v6771_v30 = vor.u32 %v8312_v27, %v6768_v8  ;;  %v8331_v27 = vld [vmem:[%s12645_s6 + $0x78] sm:$0xff]  ;;  %v8318_v8 = vld [vmem:[%s12645_s6 + $0x10] sm:$0xff] }
 0x11b   : > { %2639 = vmatpush.bf16.msra.mxu1 %v6603_v54  ;;  %v1974_v22 = vpop.f32.mrf.mxu1  ;;  %v8309_v54 = vld [vmem:[%s12643_s4 + $0x1c4] sm:$0xf0] }
 0x11c   : > { %v6751_v46 = vor.u32 %v8309_v54, %v6750_v43  ;;  %v1975_v49 = vadd.f32 %v1974_v22, %v744_v35  ;;  %v8308_v43 = vld [vmem:[%s12643_s4 + $0x1c4] sm:$0xf]  ;;  %v6752_v54 = vld [vmem:[%s12643_s4 + $0x1c8] sm:$0xf0] }
 0x11d   : > { %2626 = vmatpush.bf16.msrb.mxu3 %v6531_v44  ;;  %v8288_v44 = vld [vmem:[%s12643_s4 + $0x124] sm:$0xf] }
 0x11e   : > { %2647 = vmatpush.bf16.msra.mxu2 %v6715_v17  ;;  %v2002_v23 = vpop.f32.mrf.mxu0  ;;  %v6675_v48 = vor.u32 %v8288_v44, %v6672_v47  ;;  %2608 = vmatpush.bf16.msra.mxu0 %v6751_v46  ;;  %v6718_v17 = vld [vmem:[%s12643_s4 + $0x180] sm:$0xf]  ;;  %v6755_v44 = vor.u32 %v8308_v43, %v6752_v54  ;;  %v745_v46 = vperm.slane %v10126_v52, 3  ;;  %v8302_v52 = vld [vmem:[%s12643_s4 + $0x194] sm:$0xf] }
 0x11f   : > { %2640 = vmatpush.bf16.msra.mxu1 %v6595_v55  ;;  %v6719_v20 = vor.u32 %v8301_v18, %v6718_v17  ;;  %v8324_v43 = vld [vmem:[%s12645_s6 + $0x40] sm:$0xff] }
 0x120   : > { %2627 = vmatmul.bf16.vlgmr.msrb.gmra.mxu3 %v10294_v41  ;;  %v2170_v41 = vpack.c.bf16 %v2166_v7, %v2162_v6 }
 0x122   : > { %2585 = vmatmul.bf16.vlgmr.msrb.gmra.mxu1 %v2170_v41  ;;  %2648 = vmatpush.bf16.msra.mxu2 %v6707_v19 }
 0x123   : > { %v1988_v32 = vpop.f32.mrf.mxu3  ;;  %v1976_v45 = vpop.f32.mrf.mxu1  ;;  %2609 = vmatpush.bf16.msra.mxu0 %v6743_v57  ;;  %v6728_v57 = vld [vmem:[%s12643_s4 + $0x198] sm:$0xf0]  ;;  %2827 = vmatpush.bf16.msrb.mxu1 %v8331_v27 }
 0x124   : > { %v1989_v58 = vadd.f32 %v1988_v32, %v1975_v49  ;;  %v1977_v59 = vadd.f32 %v1976_v45, %v744_v35  ;;  %v8310_v32 = vld [vmem:[%s12643_s4 + $0x1d4] sm:$0xf]  ;;  %v6731_v42 = vor.u32 %v8302_v52, %v6728_v57 }
 0x125   : > { %v6763_v36 = vor.u32 %v8310_v32, %v6760_v33  ;;  %v8306_v45 = vld [vmem:[%s12643_s4 + $0x1b4] sm:$0xf]  ;;  %v8328_v32 = vld [vmem:[%s12645_s6 + $0x60] sm:$0xff]  ;;  %v8327_v33 = vld [vmem:[%s12645_s6 + $0x58] sm:$0xff] }
 0x126   : > { %2649 = vmatpush.bf16.msra.mxu2 %v6699_v26  ;;  %v2004_v62 = vpop.f32.mrf.mxu0  ;;  %v2016_v55 = vpop.f32.mrf.mxu2  ;;  %v2003_v6 = vadd.f32 %v2002_v23, %v1989_v58 }
 0x127   : > { %2610 = vmatpush.bf16.msra.mxu0 %v6735_v4  ;;  %v6723_v4 = vor.u32 %v8300_v1, %v6720_v2 }
 0x128   : > { %v2017_v13 = vadd.f32 %v2016_v55, %v2003_v6 }
 0x12a   : > { %2650 = vmatpush.bf16.msra.mxu2 %v6691_v31 }
 0x12b   : > { %v1990_v56 = vpop.f32.mrf.mxu3  ;;  %2611 = vmatpush.bf16.msra.mxu0 %v6727_v12 }
 0x12c   : > { %v1991_v7 = vadd.f32 %v1990_v56, %v1977_v59  ;;  %v6739_v56 = vor.u32 %v8304_v37, %v6736_v53 }
 0x12e   : > { %2651 = vmatpush.bf16.msra.mxu2 %v6683_v40  ;;  %v2058_v0 = vpop.f32.mrf.mxu0  ;;  %v2005_v14 = vadd.f32 %v2004_v62, %v1991_v7  ;;  %v2018_v15 = vpop.f32.mrf.mxu2  ;;  %v6744_v62 = vld [vmem:[%s12643_s4 + $0x1b8] sm:$0xf0] }
 0x12f   : > { %2612 = vmatpush.bf16.msra.mxu0 %v6719_v20  ;;  %v6747_v47 = vor.u32 %v8306_v45, %v6744_v62 }
 0x130   : > { %v2019_v22 = vadd.f32 %v2018_v15, %v2005_v14 }
 0x132   : > { %2641 = vmatmul.bf16.vlgmr.msra.gmra.mxu1 %v2170_v41  ;;  %2652 = vmatpush.bf16.msra.mxu2 %v6675_v48 }
 0x133   : > { %2661 = vmatpush.bf16.msrb.mxu0 %v6779_v24  ;;  %v8321_v24 = vld [vmem:[%s12645_s6 + $0x28] sm:$0xff] }
 0x136   : > { %2653 = vmatpush.bf16.msra.mxu2 %v6667_v60  ;;  %v2060_v19 = vpop.f32.mrf.mxu0 }
 0x137   : > { %2662 = vmatpush.bf16.msrb.mxu0 %v6771_v30  ;;  %v8329_v30 = vld [vmem:[%s12645_s6 + $0x68] sm:$0xff] }
 0x13a   : > { %2654 = vmatpush.bf16.msra.mxu2 %v6659_v9 }
 0x13b   : > { %v2030_v63 = vpop.f32.mrf.mxu1  ;;  %2663 = vmatpush.bf16.msrb.mxu0 %v6763_v36 }
 0x13c   : > { %v2031_v16 = vadd.f32 %v2030_v63, %v2017_v13 }
 0x13f   : > { %2664 = vmatpush.bf16.msrb.mxu0 %v6755_v44 }
 0x142   : > { %v2086_v39 = vpop.f32.mrf.mxu0 }
 0x143   : > { %v2044_v41 = vpop.f32.mrf.mxu3  ;;  %v2032_v61 = vpop.f32.mrf.mxu1  ;;  %2665 = vmatpush.bf16.msrb.mxu0 %v6747_v47 }
 0x144   : > { %v2045_v23 = vadd.f32 %v2044_v41, %v2031_v16  ;;  %v2033_v25 = vadd.f32 %v2032_v61, %v2019_v22  ;;  %v8323_v22 = vld [vmem:[%s12645_s6 + $0x38] sm:$0xff] }
 0x145   : > { %2813 = vmatpush.bf16.msra.mxu3 %v8323_v22  ;;  %v8673_v22 = vld [vmem:[%s12646_s7] ss:$0 sm:$0xff] }
 0x146   : > { %v2059_v28 = vadd.f32 %v2058_v0, %v2045_v23  ;;  %v2072_v38 = vpop.f32.mrf.mxu2  ;;  %v8322_v23 = vld [vmem:[%s12645_s6 + $0x30] sm:$0xff] }
 0x147   : > { %v2073_v55 = vadd.f32 %v2072_v38, %v745_v46  ;;  %2666 = vmatpush.bf16.msrb.mxu0 %v6739_v56 }
 0x148   : > { %v2163_v34 = vmax.f32 %v2059_v28, 0.0  ;;  %v8330_v28 = vld [vmem:[%s12645_s6 + $0x70] sm:$0xff] }
 0x149   : > { %v2087_v58 = vadd.f32 %v2086_v39, %v2073_v55  ;;  %2814 = vmatpush.bf16.msra.mxu3 %v8322_v23  ;;  %2828 = vmatpush.bf16.msrb.mxu1 %v8330_v28  ;;  %v8325_v39 = vld [vmem:[%s12645_s6 + $0x48] sm:$0xff] }
 0x14a   : > { %v2088_v51 = vpop.f32.mrf.mxu0 }
 0x14b   : > { %v2046_v26 = vpop.f32.mrf.mxu3  ;;  %2667 = vmatpush.bf16.msrb.mxu0 %v6731_v42 }
 0x14c   : > { %v2047_v29 = vadd.f32 %v2046_v26, %v2033_v25  ;;  %v8320_v25 = vld [vmem:[%s12645_s6 + $0x20] sm:$0xff]  ;;  %v8319_v26 = vld [vmem:[%s12645_s6 + $0x18] sm:$0xff] }
 0x14d   : > { %2815 = vmatpush.bf16.msra.mxu3 %v8321_v24  ;;  %2829 = vmatpush.bf16.msrb.mxu1 %v8329_v30 }
 0x14e   : > { %v2061_v31 = vadd.f32 %v2060_v19, %v2047_v29  ;;  %v2074_v49 = vpop.f32.mrf.mxu2  ;;  %v8317_v29 = vld [vmem:[%s12645_s6 + $0x8] sm:$0xff] }
 0x14f   : > { %v2075_v60 = vadd.f32 %v2074_v49, %v745_v46  ;;  %2668 = vmatpush.bf16.msrb.mxu0 %v6723_v4 }
 0x150   : > { %v2167_v35 = vmax.f32 %v2061_v31, 0.0  ;;  %v8316_v31 = vld [vmem:[%s12645_s6] sm:$0xff] }
 0x151   : > { %v2089_v5 = vadd.f32 %v2088_v51, %v2075_v60  ;;  %2816 = vmatpush.bf16.msra.mxu3 %v8320_v25  ;;  %2830 = vmatpush.bf16.msrb.mxu1 %v8328_v32 }
 0x152   : > { %v2171_v40 = vpack.c.bf16 %v2167_v35, %v2163_v34  ;;  %v8326_v34 = vld [vmem:[%s12645_s6 + $0x50] sm:$0xff] }
 0x154   : > { %2599 = vmatmul.bf16.vlgmr.msrb.gmra.mxu2 %v2171_v40 }
 0x155   : > { %2817 = vmatpush.bf16.msra.mxu3 %v8319_v26  ;;  %2831 = vmatpush.bf16.msrb.mxu1 %v8327_v33 }
 0x159   : > { %2818 = vmatpush.bf16.msra.mxu3 %v8318_v8  ;;  %2832 = vmatpush.bf16.msrb.mxu1 %v8326_v34 }
 0x15b   : > { %v2100_v48 = vpop.f32.mrf.mxu1 }
 0x15c   : > { %v2101_v3 = vadd.f32 %v2100_v48, %v2087_v58 }
 0x15d   : > { %2819 = vmatpush.bf16.msra.mxu3 %v8317_v29  ;;  %2833 = vmatpush.bf16.msrb.mxu1 %v8325_v39 }
 0x161   : > { %2820 = vmatpush.bf16.msra.mxu3 %v8316_v31  ;;  %2834 = vmatpush.bf16.msrb.mxu1 %v8324_v43  ;;  %v6854_v43 = vld [vmem:[%s12647_s8 + $0x10] sm:$0xf] }
 0x162   : > { %v2142_v6 = vpop.f32.mrf.mxu0 }
 0x163   : > { %v2114_v59 = vpop.f32.mrf.mxu3  ;;  %v2102_v63 = vpop.f32.mrf.mxu1 }
 0x164   : > { %2655 = vmatmul.bf16.vlgmr.msra.gmra.mxu2 %v2171_v40  ;;  %v2115_v7 = vadd.f32 %v2114_v59, %v2101_v3  ;;  %v2103_v9 = vadd.f32 %v2102_v63, %v2089_v5  ;;  %v2237_v40 = vld [vmem:[%s12644_s5] sm:$0x3] }
 0x165   : > { %v2239_v54 = vperm.slane %v2237_v40, 0  ;;  %v2240_v63 = vperm.slane %v2237_v40, 1  ;;  %v6864_v40 = vld [vmem:[%s12647_s8 + $0x28] sm:$0xf0] }
 0x166   : > { %v2128_v0 = vpop.f32.mrf.mxu2 }
 0x167   : > { %v2129_v12 = vadd.f32 %v2128_v0, %v2115_v7 }
 0x169   : > { %v2143_v15 = vadd.f32 %v2142_v6, %v2129_v12 }
 0x16a   : > { %v2144_v16 = vpop.f32.mrf.mxu0 }
 0x16b   : > { %v2116_v10 = vpop.f32.mrf.mxu3  ;;  %v2156_v41 = vpop.f32.mrf.mxu1 }
 0x16c   : > { %v2117_v11 = vadd.f32 %v2116_v10, %v2103_v9  ;;  %v2157_v17 = vadd.f32 %v2156_v41, %v2143_v15 }
 0x16e   : > { %v2130_v13 = vpop.f32.mrf.mxu2  ;;  %v2164_v20 = vmax.f32 %v2157_v17, 0.0  ;;  %v6870_v17 = vld [vmem:[%s12647_s8 + $0x30] sm:$0xf] }
 0x16f   : > { %v2131_v14 = vadd.f32 %v2130_v13, %v2117_v11 }
 0x171   : > { %v2145_v18 = vadd.f32 %v2144_v16, %v2131_v14 }
 0x173   : > { %v2158_v61 = vpop.f32.mrf.mxu1 }
 0x174   : > { %v2159_v19 = vadd.f32 %v2158_v61, %v2145_v18  ;;  %v8339_v18 = vld [vmem:[%s12647_s8 + $0x34] sm:$0xf0]  ;;  %v8338_v61 = vld [vmem:[%s12647_s8 + $0x34] sm:$0xf] }
 0x176   : > { %v2168_v50 = vmax.f32 %v2159_v19, 0.0  ;;  %v6871_v19 = vor.u32 %v8339_v18, %v6870_v17  ;;  %v8364_v17 = vld [vmem:[%s12649_s10 + $0xc4] sm:$0xf]  ;;  %v6978_v18 = vld [vmem:[%s12649_s10 + $0xd0] sm:$0xf0] }
 0x178   : > { %v2172_v21 = vpack.c.bf16 %v2168_v50, %v2164_v20  ;;  %v6872_v20 = vld [vmem:[%s12647_s8 + $0x38] sm:$0xf0]  ;;  %2924 = vmatpush.bf16.msrb.mxu2 %v6871_v19  ;;  %v6981_v19 = vor.u32 %v8364_v17, %v6978_v18  ;;  %v7010_v17 = vld [vmem:[%s12649_s10 + $0x110] sm:$0xf0] }
 0x179   : > { %v6875_v50 = vor.u32 %v8338_v61, %v6872_v20  ;;  %v7072_v20 = vld [vmem:[%s12649_s10 + $0x180] sm:$0xf] }
 0x17a   : > { %2613 = vmatmul.bf16.vlgmr.msra.gmra.mxu0 %v2172_v21 }
 0x17b   : > { %2938 = vmatpush.bf16.msra.mxu0 %v6875_v50  ;;  %v8390_v50 = vld [vmem:[%s12649_s10 + $0x18c] sm:$0xf0] }
 0x183   : > { %v2572_v35 = vpop.f32.mrf.mxu3 }
 0x184   : > { %v2573_v47 = vadd.f32 %v2572_v35, %v2239_v54  ;;  %v6862_v35 = vld [vmem:[%s12647_s8 + $0x20] sm:$0xf] }
 0x18a   : > { %2669 = vmatmul.bf16.vlgmr.msrb.gmra.mxu0 %v2172_v21 }
 0x18b   : > { %v2574_v44 = vpop.f32.mrf.mxu3 }
 0x18c   : > { %v2575_v48 = vadd.f32 %v2574_v44, %v2239_v54  ;;  %v8335_v54 = vld [vmem:[%s12647_s8 + $0x14] sm:$0xf0] }
 0x19f   : > { %v2586_v36 = vpop.f32.mrf.mxu1 }
 0x1a0   : > { %v2587_v49 = vadd.f32 %v2586_v36, %v2573_v47  ;;  %v8337_v36 = vld [vmem:[%s12647_s8 + $0x24] sm:$0xf0] }
 0x1a1   : > { %v6863_v39 = vor.u32 %v8337_v36, %v6862_v35  ;;  %v6946_v35 = vld [vmem:[%s12649_s10 + $0x90] sm:$0xf0] }
 0x1a3   : > { %v2628_v53 = vpop.f32.mrf.mxu3  ;;  %2925 = vmatpush.bf16.msrb.mxu2 %v6863_v39  ;;  %v8386_v39 = vld [vmem:[%s12649_s10 + $0x16c] sm:$0xf0] }
 0x1a4   : > { %v2629_v3 = vadd.f32 %v2628_v53, %v2240_v63  ;;  %v6848_v53 = vld [vmem:[%s12647_s8 + $0x8] sm:$0xf0] }
 0x1a7   : > { %v2588_v45 = vpop.f32.mrf.mxu1 }
 0x1a8   : > { %v2589_v51 = vadd.f32 %v2588_v45, %v2575_v48  ;;  %v8334_v45 = vld [vmem:[%s12647_s8 + $0x14] sm:$0xf]  ;;  %v6846_v48 = vld [vmem:[%s12647_s8] sm:$0xf] }
 0x1ab   : > { %v2630_v1 = vpop.f32.mrf.mxu3 }
 0x1ac   : > { %v2631_v5 = vadd.f32 %v2630_v1, %v2240_v63  ;;  %v7106_v1 = vld [vmem:[%s12649_s10 + $0x1d0] sm:$0xf0] }
 0x1af   : > { %v2642_v52 = vpop.f32.mrf.mxu1 }
 0x1b0   : > { %v2643_v6 = vadd.f32 %v2642_v52, %v2629_v3  ;;  %v8402_v52 = vld [vmem:[%s12649_s10 + $0x1ec] sm:$0xf0] }
 0x1b7   : > { %v2644_v4 = vpop.f32.mrf.mxu1 }
 0x1b8   : > { %v2645_v9 = vadd.f32 %v2644_v4, %v2631_v5  ;;  %v8370_v4 = vld [vmem:[%s12649_s10 + $0xec] sm:$0xf0]  ;;  %v8368_v5 = vld [vmem:[%s12649_s10 + $0xe4] sm:$0xf] }
 0x1d7   : > { %v2600_v38 = vpop.f32.mrf.mxu2 }
 0x1d8   : > { %v2601_v37 = vadd.f32 %v2600_v38, %v2587_v49  ;;  %v8336_v38 = vld [vmem:[%s12647_s8 + $0x24] sm:$0xf]  ;;  %v8333_v49 = vld [vmem:[%s12647_s8 + $0x4] sm:$0xf0] }
 0x1d9   : > { %v6867_v44 = vor.u32 %v8336_v38, %v6864_v40  ;;  %v7056_v38 = vld [vmem:[%s12649_s10 + $0x160] sm:$0xf]  ;;  %v8384_v40 = vld [vmem:[%s12649_s10 + $0x164] sm:$0xf] }
 0x1db   : > { %2939 = vmatpush.bf16.msra.mxu0 %v6867_v44 }
 0x1df   : > { %v2602_v62 = vpop.f32.mrf.mxu2 }
 0x1e0   : > { %v2603_v55 = vadd.f32 %v2602_v62, %v2589_v51  ;;  %v6856_v62 = vld [vmem:[%s12647_s8 + $0x18] sm:$0xf0]  ;;  %v8332_v51 = vld [vmem:[%s12647_s8 + $0x4] sm:$0xf] }
 0x1e1   : > { %v6859_v47 = vor.u32 %v8334_v45, %v6856_v62  ;;  %v6928_v45 = vld [vmem:[%s12649_s10 + $0x60] sm:$0xf]  ;;  %v7057_v62 = vor.u32 %v8386_v39, %v7056_v38  ;;  %v8342_v39 = vld [vmem:[%s12649_s10 + $0xc] sm:$0xf0] }
 0x1e2   : > { %v6880_v38 = vld [vmem:[%s12649_s10] sm:$0xf] }
 0x1e3   : > { %2940 = vmatpush.bf16.msra.mxu0 %v6859_v47  ;;  %v8352_v47 = vld [vmem:[%s12649_s10 + $0x64] sm:$0xf] }
 0x1e7   : > { %v2656_v58 = vpop.f32.mrf.mxu2 }
 0x1e8   : > { %v2657_v10 = vadd.f32 %v2656_v58, %v2643_v6  ;;  %v7122_v58 = vld [vmem:[%s12649_s10 + $0x1f0] sm:$0xf0] }
 0x1e9   : > { %v6994_v6 = vld [vmem:[%s12649_s10 + $0xf0] sm:$0xf0] }
 0x1ef   : > { %v2658_v7 = vpop.f32.mrf.mxu2 }
 0x1f0   : > { %v2659_v11 = vadd.f32 %v2658_v7, %v2645_v9 }
 0x1f7   : > { %v2614_v46 = vpop.f32.mrf.mxu0 }
 0x1f8   : > { %v2615_v56 = vadd.f32 %v2614_v46, %v2601_v37  ;;  %v6855_v46 = vor.u32 %v8335_v54, %v6854_v43  ;;  %v6847_v37 = vor.u32 %v8333_v49, %v6846_v48  ;;  %v7058_v43 = vld [vmem:[%s12649_s10 + $0x170] sm:$0xf0] }
 0x1f9   : > { %v6930_v48 = vld [vmem:[%s12649_s10 + $0x70] sm:$0xf0]  ;;  %v7061_v49 = vor.u32 %v8384_v40, %v7058_v43  ;;  %v6881_v43 = vor.u32 %v8342_v39, %v6880_v38  ;;  %v8377_v38 = vld [vmem:[%s12649_s10 + $0x12c] sm:$0xf]  ;;  %v7034_v39 = vld [vmem:[%s12649_s10 + $0x138] sm:$0xf0] }
 0x1fa   : > { %v2675_v59 = vmax.f32 %v2615_v56, 0.0  ;;  %2926 = vmatpush.bf16.msrb.mxu2 %v6855_v46  ;;  %v7120_v56 = vld [vmem:[%s12649_s10 + $0x1e0] sm:$0xf]  ;;  %v8354_v46 = vld [vmem:[%s12649_s10 + $0x6c] sm:$0xf0] }
 0x1fe   : > { %2927 = vmatpush.bf16.msrb.mxu2 %v6847_v37  ;;  %v8382_v37 = vld [vmem:[%s12649_s10 + $0x14c] sm:$0xf0] }
 0x1ff   : > { %v2616_v57 = vpop.f32.mrf.mxu0 }
 0x200   : > { %v2617_v42 = vadd.f32 %v2616_v57, %v2603_v55  ;;  %v6851_v55 = vor.u32 %v8332_v51, %v6848_v53  ;;  %v8400_v57 = vld [vmem:[%s12649_s10 + $0x1e4] sm:$0xf]  ;;  %v7040_v51 = vld [vmem:[%s12649_s10 + $0x140] sm:$0xf] }
 0x201   : > { %v7125_v63 = vor.u32 %v8400_v57, %v7122_v58  ;;  %v6933_v57 = vor.u32 %v8352_v47, %v6930_v48  ;;  %v7041_v58 = vor.u32 %v8382_v37, %v7040_v51  ;;  %v8369_v47 = vld [vmem:[%s12649_s10 + $0xec] sm:$0xf]  ;;  %v7096_v51 = vld [vmem:[%s12649_s10 + $0x1a8] sm:$0xf]  ;;  %v8395_v37 = vld [vmem:[%s12649_s10 + $0x1b4] sm:$0xf0] }
 0x202   : > { %v2677_v60 = vmax.f32 %v2617_v42, 0.0  ;;  %2941 = vmatpush.bf16.msra.mxu0 %v6851_v55  ;;  %v7121_v42 = vor.u32 %v8402_v52, %v7120_v56  ;;  %v8380_v55 = vld [vmem:[%s12649_s10 + $0x144] sm:$0xf]  ;;  %v7042_v56 = vld [vmem:[%s12649_s10 + $0x150] sm:$0xf0]  ;;  %v6929_v52 = vor.u32 %v8354_v46, %v6928_v45 }
 0x203   : > { %3390 = vmatpush.bf16.msra.mxu1 %v7125_v63  ;;  %v6914_v63 = vld [vmem:[%s12649_s10 + $0x50] sm:$0xf0]  ;;  %v8371_v46 = vld [vmem:[%s12649_s10 + $0xf4] sm:$0xf0] }
 0x204   : > { %v2679_v0 = vpack.c.bf16 %v2677_v60, %v2675_v59  ;;  %v7104_v59 = vld [vmem:[%s12649_s10 + $0x1c0] sm:$0xf]  ;;  %v8398_v60 = vld [vmem:[%s12649_s10 + $0x1cc] sm:$0xf0]  ;;  %3362 = vmatpush.bf16.msrb.mxu3 %v7121_v42 }
 0x205   : > { %v7105_v3 = vor.u32 %v8398_v60, %v7104_v59  ;;  %v6912_v42 = vld [vmem:[%s12649_s10 + $0x40] sm:$0xf]  ;;  %v8350_v59 = vld [vmem:[%s12649_s10 + $0x4c] sm:$0xf0]  ;;  %v8348_v60 = vld [vmem:[%s12649_s10 + $0x44] sm:$0xf] }
 0x206   : > { %2821 = vmatmul.bf16.vlgmr.msra.gmra.mxu3 %v2679_v0  ;;  %v8396_v0 = vld [vmem:[%s12649_s10 + $0x1c4] sm:$0xf] }
 0x207   : > { %v2670_v2 = vpop.f32.mrf.mxu0  ;;  %v7109_v7 = vor.u32 %v8396_v0, %v7106_v1  ;;  %v7045_v0 = vor.u32 %v8380_v55, %v7042_v56  ;;  %v7024_v1 = vld [vmem:[%s12649_s10 + $0x120] sm:$0xf]  ;;  %v7097_v55 = vor.u32 %v8395_v37, %v7096_v51  ;;  %v8393_v56 = vld [vmem:[%s12649_s10 + $0x1ac] sm:$0xf]  ;;  %v7018_v37 = vld [vmem:[%s12649_s10 + $0x118] sm:$0xf0] }
 0x208   : > { %v2671_v41 = vadd.f32 %v2670_v2, %v2657_v10  ;;  %v6992_v2 = vld [vmem:[%s12649_s10 + $0xe0] sm:$0xf]  ;;  %v6997_v10 = vor.u32 %v8368_v5, %v6994_v6  ;;  %3363 = vmatpush.bf16.msrb.mxu3 %v7105_v3  ;;  %v7026_v5 = vld [vmem:[%s12649_s10 + $0x130] sm:$0xf0]  ;;  %v6913_v6 = vor.u32 %v8350_v59, %v6912_v42  ;;  %v6984_v42 = vld [vmem:[%s12649_s10 + $0xc8] sm:$0xf] }
 0x209   : > { %v6993_v9 = vor.u32 %v8370_v4, %v6992_v2  ;;  %3391 = vmatpush.bf16.msra.mxu1 %v7109_v7  ;;  %v8378_v2 = vld [vmem:[%s12649_s10 + $0x12c] sm:$0xf0]  ;;  %v2841_v3 = vld [vmem:[%s526_s30] sm:$0xff]  ;;  %v6917_v7 = vor.u32 %v8348_v60, %v6914_v63  ;;  %v8365_v59 = vld [vmem:[%s12649_s10 + $0xcc] sm:$0xf] }
 0x20a   : > { %v2676_v14 = vmax.f32 %v2671_v41, 0.0  ;;  %v8394_v41 = vld [vmem:[%s12649_s10 + $0x1ac] sm:$0xf0]  ;;  %3376 = vmatpush.bf16.msrb.mxu0 %v6997_v10  ;;  %v8376_v4 = vld [vmem:[%s12649_s10 + $0x124] sm:$0xf]  ;;  %v7025_v10 = vor.u32 %v8378_v2, %v7024_v1 }
 0x20b   : > { %3348 = vmatpush.bf16.msra.mxu2 %v6993_v9  ;;  %v2842_v9 = vld [vmem:[%s526_s30 + $0x8] sm:$0xff]  ;;  %v6986_v63 = vld [vmem:[%s12649_s10 + $0xd8] sm:$0xf0]  ;;  %v8391_v2 = vld [vmem:[%s12649_s10 + $0x194] sm:$0xf0]  ;;  %s12524_s30 = scalar_lea.vmem [#allocation2], %s8628_s20 }
 0x20c   : > { %v7080_v1 = vld [vmem:[%s12649_s10 + $0x188] sm:$0xf]  ;;  %s5592_s22 = sshll.u32 %s12524_s30, 4  ;;  %s8754_s20 = scalar_lea.hbm %s12653_s14, 112  ;;  %s5593_s22 = int_to_ptr.vmem [resolvable:$true] %s5592_s22 }
 0x20e   : > { %3377 = vmatpush.bf16.msrb.mxu0 %v6981_v19 }
 0x20f   : > { %v2672_v12 = vpop.f32.mrf.mxu0 }
 0x210   : > { %v2673_v13 = vadd.f32 %v2672_v12, %v2659_v11  ;;  %v7088_v11 = vld [vmem:[%s12649_s10 + $0x1a0] sm:$0xf]  ;;  %v8392_v12 = vld [vmem:[%s12649_s10 + $0x1a4] sm:$0xf] }
 0x211   : > { %v7089_v61 = vor.u32 %v8394_v41, %v7088_v11  ;;  %v7029_v41 = vor.u32 %v8376_v4, %v7026_v5  ;;  %v7081_v4 = vor.u32 %v8391_v2, %v7080_v1  ;;  %v7082_v5 = vld [vmem:[%s12649_s10 + $0x198] sm:$0xf0] }
 0x212   : > { %v2678_v15 = vmax.f32 %v2673_v13, 0.0  ;;  %v7090_v13 = vld [vmem:[%s12649_s10 + $0x1b0] sm:$0xf0] }
 0x213   : > { %3364 = vmatpush.bf16.msrb.mxu3 %v7089_v61 }
 0x214   : > { %v2680_v16 = vpack.c.bf16 %v2678_v15, %v2676_v14  ;;  %v6976_v14 = vld [vmem:[%s12649_s10 + $0xc0] sm:$0xf]  ;;  %v8366_v15 = vld [vmem:[%s12649_s10 + $0xcc] sm:$0xf0] }
 0x216   : > { %2835 = vmatmul.bf16.vlgmr.msrb.gmra.mxu1 %v2680_v16  ;;  %v6977_v16 = vor.u32 %v8366_v15, %v6976_v14 }
 0x218   : > { %3349 = vmatpush.bf16.msra.mxu2 %v6977_v16  ;;  %v8372_v16 = vld [vmem:[%s12649_s10 + $0x104] sm:$0xf] }
 0x289   : > { %v2822_v21 = vpop.f32.mrf.mxu3 }
 0x28a   : > { %v2823_v23 = vadd.f32 %v8673_v22, %v2822_v21  ;;  %v7093_v21 = vor.u32 %v8392_v12, %v7090_v13  ;;  %v7008_v12 = vld [vmem:[%s12649_s10 + $0x100] sm:$0xf]  ;;  %v8374_v13 = vld [vmem:[%s12649_s10 + $0x10c] sm:$0xf0] }
 0x28b   : > { %v7009_v18 = vor.u32 %v8374_v13, %v7008_v12  ;;  %v7064_v13 = vld [vmem:[%s12649_s10 + $0x168] sm:$0xf] }
 0x28c   : > { %3392 = vmatpush.bf16.msra.mxu1 %v7093_v21  ;;  %v7128_v21 = vld [vmem:[%s12649_s10 + $0x1e8] sm:$0xf] }
 0x291   : > { %v2824_v27 = vpop.f32.mrf.mxu3 }
 0x292   : > { %v2825_v28 = vadd.f32 %v8673_v22, %v2824_v27  ;;  %v6960_v22 = vld [vmem:[%s12649_s10 + $0xa0] sm:$0xf]  ;;  %v7074_v27 = vld [vmem:[%s12649_s10 + $0x190] sm:$0xf0] }
 0x293   : > { %v2836_v24 = vpop.f32.mrf.mxu1 }
 0x294   : > { %v10643_v25 = vadd.f32 %v2836_v24, %v2823_v23  ;;  %v8362_v23 = vld [vmem:[%s12649_s10 + $0xac] sm:$0xf0]  ;;  %v8360_v24 = vld [vmem:[%s12649_s10 + $0xa4] sm:$0xf] }
 0x296   : > { %v2843_v26 = vmul.f32 0.5, %v10643_v25  ;;  %5571 = vst [vmem:[%s533_s17] sm:$0xff] %v10643_v25 }
 0x298   : > { %v2845_v8 = vmul.f32 1.442695, %v2843_v26  ;;  %v8388_v26 = vld [vmem:[%s12649_s10 + $0x184] sm:$0xf] }
 0x299   : > { %v7077_v36 = vor.u32 %v8388_v26, %v7074_v27  ;;  %v8346_v26 = vld [vmem:[%s12649_s10 + $0x2c] sm:$0xf0] }
 0x29a   : > { %8674 = vpow2.f32 %v2845_v8  ;;  %v6962_v8 = vld [vmem:[%s12649_s10 + $0xb0] sm:$0xf0] }
 0x29b   : > { %v2838_v29 = vpop.f32.mrf.mxu1  ;;  %3393 = vmatpush.bf16.msra.mxu1 %v7077_v36  ;;  %v7114_v36 = vld [vmem:[%s12649_s10 + $0x1d8] sm:$0xf0] }
 0x29c   : > { %v10647_v30 = vadd.f32 %v2838_v29, %v2825_v28  ;;  %v6961_v28 = vor.u32 %v8362_v23, %v6960_v22  ;;  %v6965_v29 = vor.u32 %v8360_v24, %v6962_v8  ;;  %v8403_v22 = vld [vmem:[%s12649_s10 + $0x1f4] sm:$0xf0]  ;;  %v7130_v23 = vld [vmem:[%s12649_s10 + $0x1f8] sm:$0xf0]  ;;  %v6896_v24 = vld [vmem:[%s12649_s10 + $0x20] sm:$0xf] }
 0x29d   : > { %v6897_v8 = vor.u32 %v8346_v26, %v6896_v24  ;;  %v7050_v26 = vld [vmem:[%s12649_s10 + $0x158] sm:$0xf0] }
 0x29e   : > { %v2844_v31 = vmul.f32 0.5, %v10647_v30  ;;  %5572 = vst [vmem:[%s533_s17 + $0x8] sm:$0xff] %v10647_v30  ;;  %3350 = vmatpush.bf16.msra.mxu2 %v6961_v28  ;;  %3378 = vmatpush.bf16.msrb.mxu0 %v6965_v29  ;;  %v8344_v28 = vld [vmem:[%s12649_s10 + $0x24] sm:$0xf]  ;;  %v6898_v29 = vld [vmem:[%s12649_s10 + $0x30] sm:$0xf0] }
 0x29f   : > { %3394 = vmatpush.bf16.msra.mxu1 %v7061_v49  ;;  %v7002_v49 = vld [vmem:[%s12649_s10 + $0xf8] sm:$0xf0]  ;;  %s8748_s17 = sshra.s32 %s5595_s26, 4  ;;  %s8749_s17 = int_to_ptr.hbm [resolvable:$true] %s8748_s17 }
 0x2a0   : > { %v8675_v32 = vpop.eup %8674  ;;  %v2847_v33 = vmul.f32 1.442695, %v2844_v31  ;;  %v6944_v31 = vld [vmem:[%s12649_s10 + $0x80] sm:$0xf]  ;;  %p8755_p0 = scmp.lt.s32.totalorder %s8749_s17, %s12653_s14 }
 0x2a1   : > { %2851 = vrot.lane.b32.xlu0 %v8675_v32, %s8798_s25  ;;  %v7073_v32 = vor.u32 %v8390_v50, %v7072_v20  ;;  %v7013_v20 = vor.u32 %v8372_v16, %v7010_v17  ;;  %v7066_v17 = vld [vmem:[%s12649_s10 + $0x178] sm:$0xf0] }
 0x2a2   : > { %8676 = vpow2.f32 %v2847_v33  ;;  %v8358_v33 = vld [vmem:[%s12649_s10 + $0x8c] sm:$0xf0] }
 0x2a3   : > { %v6945_v54 = vor.u32 %v8358_v33, %v6944_v31  ;;  %3365 = vmatpush.bf16.msrb.mxu3 %v7073_v32  ;;  %3395 = vmatpush.bf16.msra.mxu1 %v7045_v0  ;;  %v6901_v31 = vor.u32 %v8344_v28, %v6898_v29  ;;  %v7112_v32 = vld [vmem:[%s12649_s10 + $0x1c8] sm:$0xf]  ;;  %v8399_v33 = vld [vmem:[%s12649_s10 + $0x1d4] sm:$0xf0]  ;;  %v6989_v0 = vor.u32 %v8365_v59, %v6986_v63  ;;  %v8353_v29 = vld [vmem:[%s12649_s10 + $0x6c] sm:$0xf] }
 0x2a4   : > { %v8355_v28 = vld [vmem:[%s12649_s10 + $0x74] sm:$0xf0]  ;;  %v6888_v59 = vld [vmem:[%s12649_s10 + $0x8] sm:$0xf]  ;;  %v8341_v63 = vld [vmem:[%s12649_s10 + $0xc] sm:$0xf] }
 0x2a5   : > { %3351 = vmatpush.bf16.msra.mxu2 %v6945_v54  ;;  %v8340_v54 = vld [vmem:[%s12649_s10 + $0x4] sm:$0xf] }
 0x2a7   : > { %3366 = vmatpush.bf16.msrb.mxu3 %v7057_v62  ;;  %3396 = vmatpush.bf16.msra.mxu1 %v7029_v41  ;;  %v7000_v62 = vld [vmem:[%s12649_s10 + $0xe8] sm:$0xf]  ;;  %v6970_v41 = vld [vmem:[%s12649_s10 + $0xb8] sm:$0xf0] }
 0x2a8   : > { %v8677_v34 = vpop.eup %8676  ;;  %v7001_v48 = vor.u32 %v8371_v46, %v7000_v62  ;;  %v7016_v46 = vld [vmem:[%s12649_s10 + $0x108] sm:$0xf] }
 0x2a9   : > { %2853 = vrot.lane.b32.xlu0 %v8677_v34, %s8798_s25  ;;  %v8356_v34 = vld [vmem:[%s12649_s10 + $0x84] sm:$0xf]  ;;  %3352 = vmatpush.bf16.msra.mxu2 %v6929_v52  ;;  %v7098_v52 = vld [vmem:[%s12649_s10 + $0x1b8] sm:$0xf0]  ;;  %s8750_s25 = scalar_lea.hbm %s8749_s17, 56 }
 0x2aa   : > { %v6949_v44 = vor.u32 %v8356_v34, %v6946_v35  ;;  %v8397_v34 = vld [vmem:[%s12649_s10 + $0x1cc] sm:$0xf]  ;;  %v7113_v35 = vor.u32 %v8399_v33, %v7112_v32  ;;  %v6938_v32 = vld [vmem:[%s12649_s10 + $0x78] sm:$0xf0]  ;;  %v7032_v33 = vld [vmem:[%s12649_s10 + $0x128] sm:$0xf]  ;;  %p8751_p11 = scmp.ne.s32.totalorder %s8749_s17, %s8750_s25  ;;  %p8756_p1 = scmp.lt.s32.totalorder %s8754_s20, %s8750_s25 }
 0x2ab   : > { %3367 = vmatpush.bf16.msrb.mxu3 %v7041_v58  ;;  %3397 = vmatpush.bf16.msra.mxu1 %v7013_v20  ;;  %v7117_v40 = vor.u32 %v8397_v34, %v7114_v36  ;;  %v8367_v58 = vld [vmem:[%s12649_s10 + $0xd4] sm:$0xf0]  ;;  %v8357_v20 = vld [vmem:[%s12649_s10 + $0x8c] sm:$0xf] }
 0x2ac   : > { %3379 = vmatpush.bf16.msrb.mxu0 %v6949_v44  ;;  %v6882_v44 = vld [vmem:[%s12649_s10 + $0x10] sm:$0xf0]  ;;  %v6985_v60 = vor.u32 %v8367_v58, %v6984_v42  ;;  %v8379_v34 = vld [vmem:[%s12649_s10 + $0x134] sm:$0xf0]  ;;  %p8752_p12 = pnand %p8751_p11, %p8919_p5  ;;  %p8757_p2 = por %p8756_p1, %p8755_p0 }
 0x2ad   : > { %3353 = vmatpush.bf16.msra.mxu2 %v6913_v6  ;;  %v6885_v45 = vor.u32 %v8340_v54, %v6882_v44  ;;  %v7033_v36 = vor.u32 %v8379_v34, %v7032_v33  ;;  %v8351_v54 = vld [vmem:[%s12649_s10 + $0x54] sm:$0xf0]  ;;  %v8349_v44 = vld [vmem:[%s12649_s10 + $0x4c] sm:$0xf] }
 0x2ae   : > { %v7948_v34 = vld [vmem:[%s12651_s12 + $0x658] sm:$0xf]  ;;  %p8753_p13 = pneg %p8752_p12 }
 0x2af   : > { %3368 = vmatpush.bf16.msrb.mxu3 %v7025_v10  ;;  %v8361_v10 = vld [vmem:[%s12649_s10 + $0xac] sm:$0xf] }
 0x2b0   : > { %3380 = vmatpush.bf16.msrb.mxu0 %v6933_v57  ;;  %v7101_v57 = vor.u32 %v8393_v56, %v7098_v52  ;;  %v6973_v12 = vor.u32 %v8361_v10, %v6970_v41  ;;  %v8345_v52 = vld [vmem:[%s12649_s10 + $0x2c] sm:$0xf]  ;;  %v7556_v41 = vld [vmem:[%s12651_s12 + $0x348] sm:$0xf]  ;;  %p8758_p3 = pnand %p8757_p2, %p8753_p13 }
 0x2b1   : > { %3354 = vmatpush.bf16.msra.mxu2 %v6897_v8  ;;  %v6936_v8 = vld [vmem:[%s12649_s10 + $0x68] sm:$0xf] }
 0x2b3   : > { %3369 = vmatpush.bf16.msrb.mxu3 %v7009_v18 }
 0x2b4   : > { %3381 = vmatpush.bf16.msrb.mxu0 %v6917_v7  ;;  %v6968_v7 = vld [vmem:[%s12649_s10 + $0xa8] sm:$0xf] }
 0x2b5   : > { %3355 = vmatpush.bf16.msra.mxu2 %v6881_v43  ;;  %v7037_v43 = vor.u32 %v8377_v38, %v7034_v39  ;;  %v7304_v38 = vld [vmem:[%s12651_s12 + $0x150] sm:$0xf] }
 0x2b8   : > { %3382 = vmatpush.bf16.msrb.mxu0 %v6901_v31  ;;  %v6937_v31 = vor.u32 %v8355_v28, %v6936_v8  ;;  %v7500_v28 = vld [vmem:[%s12651_s12 + $0x2d8] sm:$0xf] }
 0x2bc   : > { %3383 = vmatpush.bf16.msrb.mxu0 %v6885_v45  ;;  %v6922_v45 = vld [vmem:[%s12649_s10 + $0x58] sm:$0xf0] }
 0x313   : > { %v2852_v53 = vpop.permute.xlu0 %2851 }
 0x314   : > { %v2857_v11 = vmul.f32 %v2852_v53, %v2841_v3  ;;  %v7005_v53 = vor.u32 %v8369_v47, %v7002_v49  ;;  %v8389_v3 = vld [vmem:[%s12649_s10 + $0x18c] sm:$0xf]  ;;  %v8375_v47 = vld [vmem:[%s12649_s10 + $0x114] sm:$0xf0]  ;;  %v6925_v49 = vor.u32 %v8349_v44, %v6922_v45 }
 0x315   : > { %v7085_v6 = vor.u32 %v8389_v3, %v7082_v5  ;;  %v7017_v51 = vor.u32 %v8375_v47, %v7016_v46  ;;  %v6890_v3 = vld [vmem:[%s12649_s10 + $0x18] sm:$0xf0]  ;;  %v8561_v44 = vld [vmem:[%s12651_s12 + $0x4e8] sm:$0xf0] }
 0x316   : > { %v2859_v61 = vadd.f32 %v2857_v11, %v10643_v25  ;;  %v8401_v25 = vld [vmem:[%s12649_s10 + $0x1ec] sm:$0xf]  ;;  %v8491_v47 = vld [vmem:[%s12651_s12 + $0x2b8] sm:$0xf0] }
 0x317   : > { %v7133_v27 = vor.u32 %v8401_v25, %v7130_v23  ;;  %v7048_v25 = vld [vmem:[%s12649_s10 + $0x148] sm:$0xf]  ;;  %v8381_v23 = vld [vmem:[%s12649_s10 + $0x14c] sm:$0xf] }
 0x319   : > { %3446 = vmatpush.bf16.msrb.mxu1 %v7133_v27  ;;  %v7053_v27 = vor.u32 %v8381_v23, %v7050_v26  ;;  %v7780_v26 = vld [vmem:[%s12651_s12 + $0x508] sm:$0xf] }
 0x31b   : > { %v2854_v14 = vpop.permute.xlu0 %2853 }
 0x31c   : > { %v2858_v15 = vmul.f32 %v2854_v14, %v2842_v9  ;;  %v8363_v9 = vld [vmem:[%s12649_s10 + $0xb4] sm:$0xf0] }
 0x31d   : > { %3447 = vmatpush.bf16.msrb.mxu1 %v7117_v40  ;;  %v6969_v11 = vor.u32 %v8363_v9, %v6968_v7  ;;  %v8387_v14 = vld [vmem:[%s12649_s10 + $0x174] sm:$0xf0]  ;;  %v6920_v40 = vld [vmem:[%s12649_s10 + $0x48] sm:$0xf] }
 0x31e   : > { %v2860_v19 = vadd.f32 %v2858_v15, %v10647_v30  ;;  %v7129_v30 = vor.u32 %v8403_v22, %v7128_v21  ;;  %v8385_v15 = vld [vmem:[%s12649_s10 + $0x16c] sm:$0xf]  ;;  %v7065_v16 = vor.u32 %v8387_v14, %v7064_v13  ;;  %v6954_v21 = vld [vmem:[%s12649_s10 + $0x98] sm:$0xf0]  ;;  %v6921_v62 = vor.u32 %v8351_v54, %v6920_v40  ;;  %v8004_v13 = vld [vmem:[%s12651_s12 + $0x6c8] sm:$0xf] }
 0x31f   : > { %v7069_v18 = vor.u32 %v8385_v15, %v7066_v17  ;;  %v6957_v22 = vor.u32 %v8357_v20, %v6954_v21  ;;  %v7976_v21 = vld [vmem:[%s12651_s12 + $0x690] sm:$0xf] }
 0x320   : > { %v2861_v50 = vpack.c.bf16 %v2860_v19, %v2859_v61  ;;  %3418 = vmatpush.bf16.msra.mxu3 %v7129_v30  ;;  %v6952_v61 = vld [vmem:[%s12649_s10 + $0x88] sm:$0xf]  ;;  %v8359_v19 = vld [vmem:[%s12649_s10 + $0x94] sm:$0xf0]  ;;  %v7752_v54 = vld [vmem:[%s12651_s12 + $0x4d0] sm:$0xf] }
 0x321   : > { %3448 = vmatpush.bf16.msrb.mxu1 %v7101_v57  ;;  %v8383_v30 = vld [vmem:[%s12649_s10 + $0x154] sm:$0xf0]  ;;  %v6906_v57 = vld [vmem:[%s12649_s10 + $0x38] sm:$0xf0] }
 0x322   : > { %6876 = vmatmul.msk.bf16.vlgmr.msrb.gmra.mxu2 %vm2916_vm1, %v2861_v50  ;;  %6877 = vmatmul.msk.bf16.vlgmr.msra.gmra.mxu0 %vm2916_vm1, %v2861_v50  ;;  %v6953_v50 = vor.u32 %v8359_v19, %v6952_v61  ;;  %v7049_v24 = vor.u32 %v8383_v30, %v7048_v25  ;;  %v6909_v58 = vor.u32 %v8345_v52, %v6906_v57  ;;  %v7332_v30 = vld [vmem:[%s12651_s12 + $0x188] sm:$0xf]  ;;  %v8554_v52 = vld [vmem:[%s12651_s12 + $0x4b0] sm:$0xf0] }
 0x323   : > { %3404 = vmatpush.bf16.msrb.mxu2 %v7001_v48  ;;  %3432 = vmatpush.bf16.msra.mxu0 %v7005_v53  ;;  %v8373_v48 = vld [vmem:[%s12649_s10 + $0x10c] sm:$0xf]  ;;  %v6904_v53 = vld [vmem:[%s12649_s10 + $0x28] sm:$0xf] }
 0x324   : > { %3419 = vmatpush.bf16.msra.mxu3 %v7113_v35  ;;  %v6941_v35 = vor.u32 %v8353_v29, %v6938_v32  ;;  %v7021_v56 = vor.u32 %v8373_v48, %v7018_v37  ;;  %v8498_v29 = vld [vmem:[%s12651_s12 + $0x2f0] sm:$0xf0]  ;;  %v7920_v48 = vld [vmem:[%s12651_s12 + $0x620] sm:$0xf]  ;;  %v7276_v37 = vld [vmem:[%s12651_s12 + $0x118] sm:$0xf] }
 0x325   : > { %3449 = vmatpush.bf16.msrb.mxu1 %v7085_v6  ;;  %v7501_v45 = vor.u32 %v8498_v29, %v7500_v28  ;;  %v7530_v28 = vld [vmem:[%s12651_s12 + $0x32c] sm:$0xf0]  ;;  %v7136_v29 = vld [vmem:[%s12651_s12] sm:$0xf] }
 0x327   : > { %3405 = vmatpush.bf16.msrb.mxu2 %v6985_v60  ;;  %3433 = vmatpush.bf16.msra.mxu0 %v6989_v0  ;;  %v8343_v60 = vld [vmem:[%s12649_s10 + $0x14] sm:$0xf0]  ;;  %v2870_v0 = vld [vmem:[%s12648_s9] sm:$0x3] }
 0x328   : > { %3420 = vmatpush.bf16.msra.mxu3 %v7097_v55  ;;  %v8347_v55 = vld [vmem:[%s12649_s10 + $0x34] sm:$0xf0]  ;;  %v6889_v2 = vor.u32 %v8343_v60, %v6888_v59  ;;  %v2873_v5 = vperm.slane %v2870_v0, 1  ;;  %v2872_v10 = vperm.slane %v2870_v0, 0  ;;  %v8484_v59 = vld [vmem:[%s12651_s12 + $0x280] sm:$0xf0] }
 0x329   : > { %3450 = vmatpush.bf16.msrb.mxu1 %v7069_v18  ;;  %v6905_v42 = vor.u32 %v8347_v55, %v6904_v53  ;;  %v7528_v18 = vld [vmem:[%s12651_s12 + $0x310] sm:$0xf]  ;;  %v7753_v53 = vor.u32 %v8561_v44, %v7752_v54  ;;  %v8442_v55 = vld [vmem:[%s12651_s12 + $0x130] sm:$0xf0]  ;;  %v7892_v60 = vld [vmem:[%s12651_s12 + $0x5e8] sm:$0xf] }
 0x32a   : > { %v7277_v0 = vor.u32 %v8442_v55, %v7276_v37  ;;  %v7502_v54 = vld [vmem:[%s12651_s12 + $0x2f4] sm:$0xf0]  ;;  %v7668_v44 = vld [vmem:[%s12651_s12 + $0x428] sm:$0xf]  ;;  %v8582_v37 = vld [vmem:[%s12651_s12 + $0x590] sm:$0xf0] }
 0x32b   : > { %3406 = vmatpush.bf16.msrb.mxu2 %v6969_v11  ;;  %3434 = vmatpush.bf16.msra.mxu0 %v6973_v12  ;;  %v8512_v12 = vld [vmem:[%s12651_s12 + $0x360] sm:$0xf0] }
 0x32c   : > { %3421 = vmatpush.bf16.msra.mxu3 %v7081_v4  ;;  %v6893_v4 = vor.u32 %v8341_v63, %v6890_v3  ;;  %v7557_v17 = vor.u32 %v8512_v12, %v7556_v41  ;;  %v8596_v63 = vld [vmem:[%s12651_s12 + $0x600] sm:$0xf0]  ;;  %v8435_v3 = vld [vmem:[%s12651_s12 + $0xf8] sm:$0xf0]  ;;  %v7220_v12 = vld [vmem:[%s12651_s12 + $0xa8] sm:$0xf] }
 0x32d   : > { %3451 = vmatpush.bf16.msrb.mxu1 %v7053_v27  ;;  %v8568_v27 = vld [vmem:[%s12651_s12 + $0x520] sm:$0xf0] }
 0x32e   : > { %v7781_v39 = vor.u32 %v8568_v27, %v7780_v26  ;;  %v8488_v55 = vld [vmem:[%s12651_s12 + $0x2a4] sm:$0xf] }
 0x32f   : > { %3407 = vmatpush.bf16.msrb.mxu2 %v6953_v50  ;;  %3435 = vmatpush.bf16.msra.mxu0 %v6957_v22  ;;  %v8505_v50 = vld [vmem:[%s12651_s12 + $0x328] sm:$0xf0] }
 0x330   : > { %3422 = vmatpush.bf16.msra.mxu3 %v7065_v16  ;;  %v8624_v16 = vld [vmem:[%s12651_s12 + $0x6e0] sm:$0xf0]  ;;  %v8617_v22 = vld [vmem:[%s12651_s12 + $0x6a8] sm:$0xf0]  ;;  %v7529_v8 = vor.u32 %v8505_v50, %v7528_v18  ;;  %v7192_v18 = vld [vmem:[%s12651_s12 + $0x70] sm:$0xf] }
 0x331   : > { %3452 = vmatpush.bf16.msrb.mxu1 %v7037_v43  ;;  %v8005_v61 = vor.u32 %v8624_v16, %v8004_v13  ;;  %v8449_v43 = vld [vmem:[%s12651_s12 + $0x168] sm:$0xf0]  ;;  %v8428_v13 = vld [vmem:[%s12651_s12 + $0xc0] sm:$0xf0]  ;;  %v8470_v16 = vld [vmem:[%s12651_s12 + $0x210] sm:$0xf0] }
 0x332   : > { %v8463_v50 = vld [vmem:[%s12651_s12 + $0x1d8] sm:$0xf0] }
 0x333   : > { %3408 = vmatpush.bf16.msrb.mxu2 %v6937_v31  ;;  %3436 = vmatpush.bf16.msra.mxu0 %v6941_v35  ;;  %v7977_v31 = vor.u32 %v8617_v22, %v7976_v21  ;;  %v8610_v35 = vld [vmem:[%s12651_s12 + $0x670] sm:$0xf0]  ;;  %v8509_v22 = vld [vmem:[%s12651_s12 + $0x34c] sm:$0xf] }
 0x334   : > { %3423 = vmatpush.bf16.msra.mxu3 %v7049_v24  ;;  %v8456_v24 = vld [vmem:[%s12651_s12 + $0x1a0] sm:$0xf0]  ;;  %v7949_v46 = vor.u32 %v8610_v35, %v7948_v34  ;;  %v8453_v34 = vld [vmem:[%s12651_s12 + $0x18c] sm:$0xf]  ;;  %v7334_v35 = vld [vmem:[%s12651_s12 + $0x1a4] sm:$0xf0] }
 0x335   : > { %3453 = vmatpush.bf16.msrb.mxu1 %v7021_v56  ;;  %v7724_v56 = vld [vmem:[%s12651_s12 + $0x498] sm:$0xf] }
 0x337   : > { %3409 = vmatpush.bf16.msrb.mxu2 %v6921_v62  ;;  %3437 = vmatpush.bf16.msra.mxu0 %v6925_v49  ;;  %v7472_v62 = vld [vmem:[%s12651_s12 + $0x2a0] sm:$0xf]  ;;  %v8603_v49 = vld [vmem:[%s12651_s12 + $0x638] sm:$0xf0] }
 0x338   : > { %3424 = vmatpush.bf16.msra.mxu3 %v7033_v36  ;;  %v7333_v36 = vor.u32 %v8456_v24, %v7332_v30  ;;  %v7473_v57 = vor.u32 %v8491_v47, %v7472_v62  ;;  %v7164_v30 = vld [vmem:[%s12651_s12 + $0x38] sm:$0xf]  ;;  %v8540_v62 = vld [vmem:[%s12651_s12 + $0x440] sm:$0xf0]  ;;  %v7306_v47 = vld [vmem:[%s12651_s12 + $0x16c] sm:$0xf0] }
 0x33b   : > { %3410 = vmatpush.bf16.msrb.mxu2 %v6905_v42  ;;  %3438 = vmatpush.bf16.msra.mxu0 %v6909_v58  ;;  %v7444_v42 = vld [vmem:[%s12651_s12 + $0x268] sm:$0xf]  ;;  %v7921_v58 = vor.u32 %v8603_v49, %v7920_v48  ;;  %v7669_v48 = vor.u32 %v8540_v62, %v7668_v44 }
 0x33c   : > { %3425 = vmatpush.bf16.msra.mxu3 %v7017_v51  ;;  %v7305_v51 = vor.u32 %v8449_v43, %v7304_v38  ;;  %v7864_v38 = vld [vmem:[%s12651_s12 + $0x5b0] sm:$0xf]  ;;  %v8495_v43 = vld [vmem:[%s12651_s12 + $0x2dc] sm:$0xf] }
 0x33f   : > { %3411 = vmatpush.bf16.msrb.mxu2 %v6889_v2  ;;  %3439 = vmatpush.bf16.msra.mxu0 %v6893_v4  ;;  %v7725_v2 = vor.u32 %v8554_v52, %v7724_v56  ;;  %v7696_v4 = vld [vmem:[%s12651_s12 + $0x460] sm:$0xf] }
 0x340   : > { %v7474_v56 = vld [vmem:[%s12651_s12 + $0x2bc] sm:$0xf0] }
 0x341   : > { %v7477_v52 = vor.u32 %v8488_v55, %v7474_v56  ;;  %v7894_v55 = vld [vmem:[%s12651_s12 + $0x604] sm:$0xf0] }
 0x39f   : > { %v2943_v1 = vpop.f32.mrf.mxu0 }
 0x3a0   : > { %v2944_v7 = vadd.f32 %v2943_v1, %v2873_v5  ;;  %v7248_v1 = vld [vmem:[%s12651_s12 + $0xe0] sm:$0xf] }
 0x3a2   : > { %v2949_v14 = vmax.f32 %v2944_v7, 0.0  ;;  %v7893_v7 = vor.u32 %v8596_v63, %v7892_v60  ;;  %v7278_v60 = vld [vmem:[%s12651_s12 + $0x134] sm:$0xf0] }
 0x3a5   : > { %v2929_v6 = vpop.f32.mrf.mxu2 }
 0x3a6   : > { %v2930_v19 = vadd.f32 %v2929_v6, %v2872_v10  ;;  %v7445_v6 = vor.u32 %v8484_v59, %v7444_v42  ;;  %v8533_v42 = vld [vmem:[%s12651_s12 + $0x408] sm:$0xf0]  ;;  %v8439_v59 = vld [vmem:[%s12651_s12 + $0x11c] sm:$0xf] }
 0x3a7   : > { %v2945_v9 = vpop.f32.mrf.mxu0  ;;  %v7281_v63 = vor.u32 %v8439_v59, %v7278_v60  ;;  %v7698_v59 = vld [vmem:[%s12651_s12 + $0x47c] sm:$0xf0] }
 0x3a8   : > { %v2946_v11 = vadd.f32 %v2945_v9, %v2873_v5  ;;  %v2948_v32 = vmax.f32 %v2930_v19, 0.0  ;;  %v8547_v5 = vld [vmem:[%s12651_s12 + $0x478] sm:$0xf0]  ;;  %v7416_v9 = vld [vmem:[%s12651_s12 + $0x230] sm:$0xf] }
 0x3a9   : > { %v7697_v41 = vor.u32 %v8547_v5, %v7696_v4  ;;  %v7446_v4 = vld [vmem:[%s12651_s12 + $0x284] sm:$0xf0]  ;;  %v8621_v5 = vld [vmem:[%s12651_s12 + $0x6cc] sm:$0xf] }
 0x3aa   : > { %v2951_v15 = vmax.f32 %v2946_v11, 0.0  ;;  %v7249_v11 = vor.u32 %v8435_v3, %v7248_v1  ;;  %v8575_v1 = vld [vmem:[%s12651_s12 + $0x558] sm:$0xf0]  ;;  %v8481_v3 = vld [vmem:[%s12651_s12 + $0x26c] sm:$0xf] }
 0x3ac   : > { %v11096_v20 = vpack.c.bf16 %v2951_v15, %v2949_v14  ;;  %v7388_v15 = vld [vmem:[%s12651_s12 + $0x1f8] sm:$0xf] }
 0x3ad   : > { %v2931_v25 = vpop.f32.mrf.mxu2  ;;  %v7389_v19 = vor.u32 %v8470_v16, %v7388_v15  ;;  %v8474_v15 = vld [vmem:[%s12651_s12 + $0x234] sm:$0xf]  ;;  %v7418_v16 = vld [vmem:[%s12651_s12 + $0x24c] sm:$0xf0] }
 0x3ae   : > { %v2932_v23 = vadd.f32 %v2931_v25, %v2872_v10  ;;  %3370 = vmatmul.bf16.vlgmr.msrb.gmra.mxu3 %v11096_v20  ;;  %3398 = vmatmul.bf16.vlgmr.msra.gmra.mxu1 %v11096_v20  ;;  %v8477_v10 = vld [vmem:[%s12651_s12 + $0x248] sm:$0xf0]  ;;  %v7558_v25 = vld [vmem:[%s12651_s12 + $0x364] sm:$0xf0] }
 0x3af   : > { %4910 = vmatpush.bf16.msrb.mxu3 %v7557_v17  ;;  %4938 = vmatpush.bf16.msra.mxu1 %v8005_v61  ;;  %v7417_v14 = vor.u32 %v8477_v10, %v7416_v9  ;;  %v7221_v17 = vor.u32 %v8428_v13, %v7220_v12  ;;  %v8421_v61 = vld [vmem:[%s12651_s12 + $0x88] sm:$0xf0]  ;;  %v7561_v26 = vor.u32 %v8509_v22, %v7558_v25  ;;  %v7612_v9 = vld [vmem:[%s12651_s12 + $0x3b8] sm:$0xf]  ;;  %v8526_v10 = vld [vmem:[%s12651_s12 + $0x3d0] sm:$0xf0] }
 0x3b0   : > { %v2950_v33 = vmax.f32 %v2932_v23, 0.0  ;;  %v7193_v21 = vor.u32 %v8421_v61, %v7192_v18  ;;  %v8414_v23 = vld [vmem:[%s12651_s12 + $0x50] sm:$0xf0]  ;;  %v8432_v12 = vld [vmem:[%s12651_s12 + $0xe4] sm:$0xf]  ;;  %v7421_v18 = vor.u32 %v8474_v15, %v7418_v16 }
 0x3b1   : > { %v7165_v27 = vor.u32 %v8414_v23, %v7164_v30  ;;  %v7250_v13 = vld [vmem:[%s12651_s12 + $0xfc] sm:$0xf0]  ;;  %v7978_v61 = vld [vmem:[%s12651_s12 + $0x6ac] sm:$0xf0]  ;;  %v8425_v22 = vld [vmem:[%s12651_s12 + $0xac] sm:$0xf] }
 0x3b2   : > { %v11136_v40 = vpack.c.bf16 %v2950_v33, %v2948_v32  ;;  %v7222_v25 = vld [vmem:[%s12651_s12 + $0xc4] sm:$0xf0]  ;;  %v8565_v30 = vld [vmem:[%s12651_s12 + $0x50c] sm:$0xf] }
 0x3b3   : > { %4911 = vmatpush.bf16.msrb.mxu3 %v7529_v8  ;;  %4939 = vmatpush.bf16.msra.mxu1 %v7977_v31  ;;  %v8502_v8 = vld [vmem:[%s12651_s12 + $0x314] sm:$0xf]  ;;  %v8407_v31 = vld [vmem:[%s12651_s12 + $0x18] sm:$0xf0]  ;;  %v7225_v23 = vor.u32 %v8425_v22, %v7222_v25 }
 0x3b4   : > { %3356 = vmatmul.bf16.vlgmr.msra.gmra.mxu2 %v11136_v40  ;;  %3384 = vmatmul.bf16.vlgmr.msrb.gmra.mxu0 %v11136_v40  ;;  %v7533_v32 = vor.u32 %v8502_v8, %v7530_v28  ;;  %v7137_v33 = vor.u32 %v8407_v31, %v7136_v29  ;;  %v7390_v8 = vld [vmem:[%s12651_s12 + $0x214] sm:$0xf0]  ;;  %v8607_v28 = vld [vmem:[%s12651_s12 + $0x65c] sm:$0xf] }
 0x3b5   : > { %4896 = vmatpush.bf16.msra.mxu2 %v7333_v36  ;;  %4924 = vmatpush.bf16.msrb.mxu0 %v7781_v39  ;;  %v7337_v36 = vor.u32 %v8453_v34, %v7334_v35  ;;  %v8589_v39 = vld [vmem:[%s12651_s12 + $0x5c8] sm:$0xf0]  ;;  %v7950_v31 = vld [vmem:[%s12651_s12 + $0x674] sm:$0xf0]  ;;  %v7194_v34 = vld [vmem:[%s12651_s12 + $0x8c] sm:$0xf0] }
 0x3b6   : > { %v8558_v35 = vld [vmem:[%s12651_s12 + $0x4d4] sm:$0xf] }
 0x3b7   : > { %4912 = vmatpush.bf16.msrb.mxu3 %v7501_v45  ;;  %4940 = vmatpush.bf16.msra.mxu1 %v7949_v46  ;;  %v7505_v45 = vor.u32 %v8495_v43, %v7502_v54  ;;  %v8446_v46 = vld [vmem:[%s12651_s12 + $0x154] sm:$0xf]  ;;  %v7362_v43 = vld [vmem:[%s12651_s12 + $0x1dc] sm:$0xf0]  ;;  %v8600_v54 = vld [vmem:[%s12651_s12 + $0x624] sm:$0xf] }
 0x3b8   : > { %v7309_v49 = vor.u32 %v8446_v46, %v7306_v47  ;;  %v8411_v46 = vld [vmem:[%s12651_s12 + $0x3c] sm:$0xf]  ;;  %v7166_v47 = vld [vmem:[%s12651_s12 + $0x54] sm:$0xf0] }
 0x3b9   : > { %4897 = vmatpush.bf16.msra.mxu2 %v7305_v51  ;;  %4925 = vmatpush.bf16.msrb.mxu0 %v7753_v53  ;;  %v7836_v51 = vld [vmem:[%s12651_s12 + $0x578] sm:$0xf] }
 0x3ba   : > { %v7837_v53 = vor.u32 %v8582_v37, %v7836_v51  ;;  %v7726_v51 = vld [vmem:[%s12651_s12 + $0x4b4] sm:$0xf0] }
 0x3bb   : > { %4913 = vmatpush.bf16.msrb.mxu3 %v7473_v57  ;;  %4941 = vmatpush.bf16.msra.mxu1 %v7921_v58  ;;  %v7640_v57 = vld [vmem:[%s12651_s12 + $0x3f0] sm:$0xf] }
 0x3bc   : > { %v7641_v58 = vor.u32 %v8533_v42, %v7640_v57  ;;  %v7138_v57 = vld [vmem:[%s12651_s12 + $0x1c] sm:$0xf0]  ;;  %v8544_v42 = vld [vmem:[%s12651_s12 + $0x464] sm:$0xf] }
 0x3bd   : > { %4898 = vmatpush.bf16.msra.mxu2 %v7277_v0  ;;  %4926 = vmatpush.bf16.msrb.mxu0 %v7725_v2  ;;  %v7808_v0 = vld [vmem:[%s12651_s12 + $0x540] sm:$0xf]  ;;  %v7701_v60 = vor.u32 %v8544_v42, %v7698_v59  ;;  %v8450_v59 = vld [vmem:[%s12651_s12 + $0x170] sm:$0xf0] }
 0x3be   : > { %3426 = vmatmul.bf16.vlgmr.msra.gmra.mxu3 %v11096_v20  ;;  %3454 = vmatmul.bf16.vlgmr.msrb.gmra.mxu1 %v11096_v20  ;;  %v7360_v20 = vld [vmem:[%s12651_s12 + $0x1c0] sm:$0xf]  ;;  %v7809_v2 = vor.u32 %v8575_v1, %v7808_v0  ;;  %v7866_v0 = vld [vmem:[%s12651_s12 + $0x5cc] sm:$0xf0] }
 0x3bf   : > { %4914 = vmatpush.bf16.msrb.mxu3 %v7445_v6  ;;  %4942 = vmatpush.bf16.msra.mxu1 %v7893_v7  ;;  %v7361_v24 = vor.u32 %v8463_v50, %v7360_v20  ;;  %v7449_v6 = vor.u32 %v8481_v3, %v7446_v4  ;;  %v8006_v7 = vld [vmem:[%s12651_s12 + $0x6e4] sm:$0xf0]  ;;  %v8519_v20 = vld [vmem:[%s12651_s12 + $0x398] sm:$0xf0] }
 0x3c0   : > { %v7670_v3 = vld [vmem:[%s12651_s12 + $0x444] sm:$0xf0] }
 0x3c1   : > { %4899 = vmatpush.bf16.msra.mxu2 %v7249_v11  ;;  %4927 = vmatpush.bf16.msrb.mxu0 %v7697_v41  ;;  %v8009_v11 = vor.u32 %v8621_v5, %v8006_v7  ;;  %v7613_v41 = vor.u32 %v8526_v10, %v7612_v9  ;;  %v8579_v5 = vld [vmem:[%s12651_s12 + $0x57c] sm:$0xf]  ;;  %v8530_v10 = vld [vmem:[%s12651_s12 + $0x3f4] sm:$0xf] }
 0x3c3   : > { %4915 = vmatpush.bf16.msrb.mxu3 %v7417_v14  ;;  %v7253_v14 = vor.u32 %v8432_v12, %v7250_v13  ;;  %v11462_v12 = vld [vmem:[%s12650_s11] sm:$0xf]  ;;  %v8572_v13 = vld [vmem:[%s12651_s12 + $0x544] sm:$0xf] }
 0x3c4   : > { %3412 = vmatmul.bf16.vlgmr.msrb.gmra.mxu2 %v11136_v40  ;;  %3440 = vmatmul.bf16.vlgmr.msra.gmra.mxu0 %v11136_v40  ;;  %v7865_v40 = vor.u32 %v8589_v39, %v7864_v38  ;;  %v7754_v38 = vld [vmem:[%s12651_s12 + $0x4ec] sm:$0xf0] }
 0x3c5   : > { %4900 = vmatpush.bf16.msra.mxu2 %v7221_v17  ;;  %4928 = vmatpush.bf16.msrb.mxu0 %v7669_v48  ;;  %v8614_v17 = vld [vmem:[%s12651_s12 + $0x694] sm:$0xf]  ;;  %v7757_v39 = vor.u32 %v8558_v35, %v7754_v38  ;;  %v7169_v48 = vor.u32 %v8411_v46, %v7166_v47  ;;  %v3023_v47 = vperm.slane %v11462_v12, 3 }
 0x3c6   : > { %4943 = vmatpush.bf16.msra.mxu1 %v7865_v40  ;;  %v7981_v50 = vor.u32 %v8614_v17, %v7978_v61  ;;  %v8460_v40 = vld [vmem:[%s12651_s12 + $0x1c4] sm:$0xf]  ;;  %v8523_v17 = vld [vmem:[%s12651_s12 + $0x3bc] sm:$0xf]  ;;  %v3021_v61 = vperm.slane %v11462_v12, 1 }
 0x3c7   : > { %4916 = vmatpush.bf16.msrb.mxu3 %v7389_v19  ;;  %v7584_v19 = vld [vmem:[%s12651_s12 + $0x380] sm:$0xf]  ;;  %v7365_v44 = vor.u32 %v8460_v40, %v7362_v43 }
 0x3c9   : > { %4901 = vmatpush.bf16.msra.mxu2 %v7193_v21  ;;  %4929 = vmatpush.bf16.msrb.mxu0 %v7641_v58  ;;  %v7585_v21 = vor.u32 %v8519_v20, %v7584_v19 }
 0x3ca   : > { %4944 = vmatpush.bf16.msra.mxu1 %v7837_v53  ;;  %v8593_v53 = vld [vmem:[%s12651_s12 + $0x5ec] sm:$0xf] }
 0x3cb   : > { %4917 = vmatpush.bf16.msrb.mxu3 %v7361_v24  ;;  %v7782_v24 = vld [vmem:[%s12651_s12 + $0x524] sm:$0xf0]  ;;  %v7897_v56 = vor.u32 %v8593_v53, %v7894_v55  ;;  %v7508_v55 = vld [vmem:[%s12651_s12 + $0x2e0] sm:$0xf] }
 0x3cd   : > { %4902 = vmatpush.bf16.msra.mxu2 %v7165_v27  ;;  %4930 = vmatpush.bf16.msrb.mxu0 %v7613_v41  ;;  %v8467_v27 = vld [vmem:[%s12651_s12 + $0x1fc] sm:$0xf] }
 0x3ce   : > { %4945 = vmatpush.bf16.msra.mxu1 %v7809_v2  ;;  %v7393_v29 = vor.u32 %v8467_v27, %v7390_v8  ;;  %v8537_v2 = vld [vmem:[%s12651_s12 + $0x42c] sm:$0xf] }
 0x3cf   : > { %4966 = vmatpush.bf16.msra.mxu3 %v7561_v26  ;;  %v7785_v26 = vor.u32 %v8565_v30, %v7782_v24  ;;  %v7673_v4 = vor.u32 %v8537_v2, %v7670_v3  ;;  %v3020_v24 = vperm.slane %v11462_v12, 0  ;;  %v7480_v2 = vld [vmem:[%s12651_s12 + $0x2a8] sm:$0xf]  ;;  %v8492_v3 = vld [vmem:[%s12651_s12 + $0x2c0] sm:$0xf0] }
 0x3d1   : > { %4903 = vmatpush.bf16.msra.mxu2 %v7137_v33  ;;  %4931 = vmatpush.bf16.msrb.mxu0 %v7585_v21  ;;  %v8418_v33 = vld [vmem:[%s12651_s12 + $0x74] sm:$0xf]  ;;  %v7586_v21 = vld [vmem:[%s12651_s12 + $0x39c] sm:$0xf0] }
 0x3d2   : > { %4994 = vmatpush.bf16.msrb.mxu1 %v8009_v11  ;;  %v7642_v11 = vld [vmem:[%s12651_s12 + $0x40c] sm:$0xf0] }
 0x3d3   : > { %4967 = vmatpush.bf16.msra.mxu3 %v7533_v32  ;;  %v7953_v32 = vor.u32 %v8607_v28, %v7950_v31  ;;  %v7645_v41 = vor.u32 %v8530_v10, %v7642_v11  ;;  %v7564_v31 = vld [vmem:[%s12651_s12 + $0x350] sm:$0xf]  ;;  %v8443_v10 = vld [vmem:[%s12651_s12 + $0x138] sm:$0xf0] }
 0x3d5   : > { %4952 = vmatpush.bf16.msrb.mxu2 %v7337_v36  ;;  %4980 = vmatpush.bf16.msra.mxu0 %v7785_v26  ;;  %v7197_v36 = vor.u32 %v8418_v33, %v7194_v34 }
 0x3d6   : > { %4995 = vmatpush.bf16.msrb.mxu1 %v7981_v50  ;;  %v8516_v50 = vld [vmem:[%s12651_s12 + $0x384] sm:$0xf] }
 0x3d7   : > { %4968 = vmatpush.bf16.msra.mxu3 %v7505_v45  ;;  %v7922_v45 = vld [vmem:[%s12651_s12 + $0x63c] sm:$0xf0]  ;;  %v7589_v25 = vor.u32 %v8516_v50, %v7586_v21  ;;  %v8436_v50 = vld [vmem:[%s12651_s12 + $0x100] sm:$0xf0] }
 0x3d8   : > { %v7925_v62 = vor.u32 %v8600_v54, %v7922_v45  ;;  %v7536_v54 = vld [vmem:[%s12651_s12 + $0x318] sm:$0xf] }
 0x3d9   : > { %4953 = vmatpush.bf16.msrb.mxu2 %v7309_v49  ;;  %4981 = vmatpush.bf16.msra.mxu0 %v7757_v39  ;;  %v8551_v49 = vld [vmem:[%s12651_s12 + $0x49c] sm:$0xf] }
 0x3da   : > { %4996 = vmatpush.bf16.msrb.mxu1 %v7953_v32  ;;  %v7729_v37 = vor.u32 %v8551_v49, %v7726_v51  ;;  %v8513_v32 = vld [vmem:[%s12651_s12 + $0x368] sm:$0xf0] }
 0x3db   : > { %4969 = vmatpush.bf16.msra.mxu3 %v7477_v52  ;;  %v8404_v52 = vld [vmem:[%s12651_s12 + $0x4] sm:$0xf]  ;;  %v7565_v38 = vor.u32 %v8513_v32, %v7564_v31  ;;  %v8457_v49 = vld [vmem:[%s12651_s12 + $0x1a8] sm:$0xf0]  ;;  %v7228_v32 = vld [vmem:[%s12651_s12 + $0xb0] sm:$0xf] }
 0x3dc   : > { %v7141_v58 = vor.u32 %v8404_v52, %v7138_v57 }
 0x3dd   : > { %4954 = vmatpush.bf16.msrb.mxu2 %v7281_v63  ;;  %4982 = vmatpush.bf16.msra.mxu0 %v7729_v37  ;;  %v8586_v63 = vld [vmem:[%s12651_s12 + $0x5b4] sm:$0xf] }
 0x3de   : > { %4997 = vmatpush.bf16.msrb.mxu1 %v7925_v62  ;;  %v7869_v1 = vor.u32 %v8586_v63, %v7866_v0 }
 0x3df   : > { %4970 = vmatpush.bf16.msra.mxu3 %v7449_v6  ;;  %v7838_v6 = vld [vmem:[%s12651_s12 + $0x594] sm:$0xf0] }
 0x3e0   : > { %v7841_v7 = vor.u32 %v8579_v5, %v7838_v6 }
 0x3e1   : > { %4955 = vmatpush.bf16.msrb.mxu2 %v7253_v14  ;;  %4983 = vmatpush.bf16.msra.mxu0 %v7701_v60  ;;  %v7810_v14 = vld [vmem:[%s12651_s12 + $0x55c] sm:$0xf0] }
 0x3e2   : > { %4998 = vmatpush.bf16.msrb.mxu1 %v7897_v56  ;;  %v7813_v15 = vor.u32 %v8572_v13, %v7810_v14  ;;  %v8499_v56 = vld [vmem:[%s12651_s12 + $0x2f8] sm:$0xf0] }
 0x3e3   : > { %4971 = vmatpush.bf16.msra.mxu3 %v7421_v18  ;;  %v7614_v18 = vld [vmem:[%s12651_s12 + $0x3d4] sm:$0xf0]  ;;  %v7509_v0 = vor.u32 %v8499_v56, %v7508_v55  ;;  %v8562_v55 = vld [vmem:[%s12651_s12 + $0x4f0] sm:$0xf0] }
 0x3e4   : > { %v7617_v19 = vor.u32 %v8523_v17, %v7614_v18  ;;  %v8625_v17 = vld [vmem:[%s12651_s12 + $0x6e8] sm:$0xf0] }
 0x3e5   : > { %4956 = vmatpush.bf16.msrb.mxu2 %v7225_v23  ;;  %4984 = vmatpush.bf16.msra.mxu0 %v7673_v4 }
 0x3e6   : > { %4999 = vmatpush.bf16.msrb.mxu1 %v7869_v1  ;;  %v3022_v1 = vperm.slane %v11462_v12, 2  ;;  %v7452_v12 = vld [vmem:[%s12651_s12 + $0x270] sm:$0xf] }
 0x3e7   : > { %4972 = vmatpush.bf16.msra.mxu3 %v7393_v29 }
 0x3e9   : > { %4957 = vmatpush.bf16.msrb.mxu2 %v7197_v36  ;;  %4985 = vmatpush.bf16.msra.mxu0 %v7645_v41  ;;  %v7481_v41 = vor.u32 %v8492_v3, %v7480_v2  ;;  %v7566_v2 = vld [vmem:[%s12651_s12 + $0x36c] sm:$0xf0]  ;;  %v7172_v3 = vld [vmem:[%s12651_s12 + $0x40] sm:$0xf] }
 0x3ea   : > { %5000 = vmatpush.bf16.msrb.mxu1 %v7841_v7 }
 0x3eb   : > { %4973 = vmatpush.bf16.msra.mxu3 %v7365_v44  ;;  %v8506_v44 = vld [vmem:[%s12651_s12 + $0x330] sm:$0xf0] }
 0x3ec   : > { %v7537_v51 = vor.u32 %v8506_v44, %v7536_v54  ;;  %v8471_v54 = vld [vmem:[%s12651_s12 + $0x218] sm:$0xf0] }
 0x3ed   : > { %4958 = vmatpush.bf16.msrb.mxu2 %v7169_v48  ;;  %4986 = vmatpush.bf16.msra.mxu0 %v7617_v19  ;;  %v7340_v48 = vld [vmem:[%s12651_s12 + $0x190] sm:$0xf] }
 0x3ee   : > { %5001 = vmatpush.bf16.msrb.mxu1 %v7813_v15  ;;  %v7341_v52 = vor.u32 %v8457_v49, %v7340_v48  ;;  %v8485_v15 = vld [vmem:[%s12651_s12 + $0x288] sm:$0xf0]  ;;  %v7200_v49 = vld [vmem:[%s12651_s12 + $0x78] sm:$0xf] }
 0x3f1   : > { %4959 = vmatpush.bf16.msrb.mxu2 %v7141_v58  ;;  %4987 = vmatpush.bf16.msra.mxu0 %v7589_v25  ;;  %v7312_v58 = vld [vmem:[%s12651_s12 + $0x158] sm:$0xf] }
 0x3f2   : > { %v7313_v5 = vor.u32 %v8450_v59, %v7312_v58  ;;  %v8464_v58 = vld [vmem:[%s12651_s12 + $0x1e0] sm:$0xf0]  ;;  %v7928_v59 = vld [vmem:[%s12651_s12 + $0x628] sm:$0xf] }
 0x42b   : > { %v3399_v9 = vpop.f32.mrf.mxu1 }
 0x431   : > { %v3385_v16 = vpop.f32.mrf.mxu0  ;;  %v3371_v20 = vpop.f32.mrf.mxu3 }
 0x432   : > { %v3386_v22 = vadd.f32 %v3385_v16, %v3021_v61  ;;  %v8012_v16 = vld [vmem:[%s12651_s12 + $0x6d0] sm:$0xf] }
 0x433   : > { %v3401_v30 = vpop.f32.mrf.mxu1  ;;  %v8013_v25 = vor.u32 %v8625_v17, %v8012_v16  ;;  %v7144_v16 = vld [vmem:[%s12651_s12 + $0x8] sm:$0xf]  ;;  %v8408_v17 = vld [vmem:[%s12651_s12 + $0x20] sm:$0xf0] }
 0x434   : > { %v3400_v27 = vadd.f32 %v3399_v9, %v3386_v22  ;;  %v7284_v9 = vld [vmem:[%s12651_s12 + $0x120] sm:$0xf]  ;;  %v7453_v22 = vor.u32 %v8485_v15, %v7452_v12  ;;  %v7538_v15 = vld [vmem:[%s12651_s12 + $0x334] sm:$0xf0] }
 0x435   : > { %v7285_v18 = vor.u32 %v8443_v10, %v7284_v9 }
 0x436   : > { %v3461_v34 = vmax.f32 %v3400_v27, 0.0  ;;  %v8478_v27 = vld [vmem:[%s12651_s12 + $0x250] sm:$0xf0] }
 0x437   : > { %v3357_v23 = vpop.f32.mrf.mxu2 }
 0x438   : > { %v3358_v28 = vadd.f32 %v3357_v23, %v3020_v24 }
 0x439   : > { %v3387_v26 = vpop.f32.mrf.mxu0  ;;  %v3373_v33 = vpop.f32.mrf.mxu3 }
 0x43a   : > { %v3388_v8 = vadd.f32 %v3387_v26, %v3021_v61  ;;  %v3372_v39 = vadd.f32 %v3371_v20, %v3358_v28  ;;  %v7256_v20 = vld [vmem:[%s12651_s12 + $0xe8] sm:$0xf]  ;;  %v8618_v28 = vld [vmem:[%s12651_s12 + $0x6b0] sm:$0xf0] }
 0x43b   : > { %v3455_v45 = vpop.f32.mrf.mxu1  ;;  %v7257_v31 = vor.u32 %v8436_v50, %v7256_v20  ;;  %v8454_v20 = vld [vmem:[%s12651_s12 + $0x194] sm:$0xf]  ;;  %v7342_v50 = vld [vmem:[%s12651_s12 + $0x1ac] sm:$0xf0] }
 0x43c   : > { %v3402_v29 = vadd.f32 %v3401_v30, %v3388_v8  ;;  %v3460_v37 = vmax.f32 %v3372_v39, 0.0  ;;  %v7424_v30 = vld [vmem:[%s12651_s12 + $0x238] sm:$0xf] }
 0x43d   : > { %v7984_v8 = vld [vmem:[%s12651_s12 + $0x698] sm:$0xf] }
 0x43e   : > { %v3465_v35 = vmax.f32 %v3402_v29, 0.0  ;;  %v7985_v39 = vor.u32 %v8618_v28, %v7984_v8  ;;  %v7345_v8 = vor.u32 %v8454_v20, %v7342_v50  ;;  %v7676_v28 = vld [vmem:[%s12651_s12 + $0x430] sm:$0xf]  ;;  %v8608_v20 = vld [vmem:[%s12651_s12 + $0x664] sm:$0xf] }
 0x43f   : > { %v3359_v36 = vpop.f32.mrf.mxu2  ;;  %v7958_v50 = vld [vmem:[%s12651_s12 + $0x67c] sm:$0xf0] }
 0x440   : > { %v11490_v40 = vpack.c.bf16 %v3465_v35, %v3461_v34  ;;  %v3360_v43 = vadd.f32 %v3359_v36, %v3020_v24  ;;  %v8429_v34 = vld [vmem:[%s12651_s12 + $0xc8] sm:$0xf0]  ;;  %v7788_v35 = vld [vmem:[%s12651_s12 + $0x510] sm:$0xf] }
 0x441   : > { %v3441_v62 = vpop.f32.mrf.mxu0  ;;  %v3427_v60 = vpop.f32.mrf.mxu3  ;;  %v8569_v36 = vld [vmem:[%s12651_s12 + $0x528] sm:$0xf0] }
 0x442   : > { %v3374_v46 = vadd.f32 %v3373_v33, %v3360_v43  ;;  %4918 = vmatmul.bf16.vlgmr.msrb.gmra.mxu3 %v11490_v40  ;;  %v3442_v42 = vadd.f32 %v3441_v62, %v3023_v47  ;;  %v7396_v43 = vld [vmem:[%s12651_s12 + $0x200] sm:$0xf]  ;;  %v7789_v48 = vor.u32 %v8569_v36, %v7788_v35  ;;  %v8583_v36 = vld [vmem:[%s12651_s12 + $0x598] sm:$0xf0] }
 0x443   : > { %5022 = vmatpush.bf16.msrb.mxu3 %v7565_v38  ;;  %v3457_v11 = vpop.f32.mrf.mxu1  ;;  %v7425_v38 = vor.u32 %v8478_v27, %v7424_v30  ;;  %v7956_v62 = vld [vmem:[%s12651_s12 + $0x660] sm:$0xf]  ;;  %v7397_v56 = vor.u32 %v8471_v54, %v7396_v43  ;;  %v7145_v30 = vor.u32 %v8408_v17, %v7144_v16  ;;  %v7482_v43 = vld [vmem:[%s12651_s12 + $0x2c4] sm:$0xf0] }
 0x444   : > { %v3464_v53 = vmax.f32 %v3374_v46, 0.0  ;;  %v3456_v6 = vadd.f32 %v3455_v45, %v3442_v42  ;;  %v8611_v46 = vld [vmem:[%s12651_s12 + $0x678] sm:$0xf0]  ;;  %v7368_v42 = vld [vmem:[%s12651_s12 + $0x1c8] sm:$0xf] }
 0x445   : > { %v7510_v27 = vld [vmem:[%s12651_s12 + $0x2fc] sm:$0xf0] }
 0x446   : > { %v11512_v57 = vpack.c.bf16 %v3464_v53, %v3460_v37  ;;  %v3463_v61 = vmax.f32 %v3456_v6, 0.0  ;;  %v8422_v37 = vld [vmem:[%s12651_s12 + $0x90] sm:$0xf0]  ;;  %v7760_v53 = vld [vmem:[%s12651_s12 + $0x4d8] sm:$0xf] }
 0x447   : > { %5023 = vmatpush.bf16.msrb.mxu3 %v7537_v51  ;;  %v3413_v63 = vpop.f32.mrf.mxu2  ;;  %v8555_v6 = vld [vmem:[%s12651_s12 + $0x4b8] sm:$0xf0]  ;;  %v7844_v35 = vld [vmem:[%s12651_s12 + $0x580] sm:$0xf] }
 0x448   : > { %4904 = vmatmul.bf16.vlgmr.msra.gmra.mxu2 %v11512_v57  ;;  %v3414_v13 = vadd.f32 %v3413_v63, %v3022_v1  ;;  %v7201_v63 = vor.u32 %v8422_v37, %v7200_v49  ;;  %v7816_v49 = vld [vmem:[%s12651_s12 + $0x548] sm:$0xf]  ;;  %v8576_v37 = vld [vmem:[%s12651_s12 + $0x560] sm:$0xf0] }
 0x449   : > { %5008 = vmatpush.bf16.msra.mxu2 %v7341_v52  ;;  %v3443_v4 = vpop.f32.mrf.mxu0  ;;  %v3429_v29 = vpop.f32.mrf.mxu3  ;;  %v7957_v52 = vor.u32 %v8611_v46, %v7956_v62  ;;  %v7845_v62 = vor.u32 %v8583_v36, %v7844_v35  ;;  %v8440_v46 = vld [vmem:[%s12651_s12 + $0x124] sm:$0xf]  ;;  %v7572_v35 = vld [vmem:[%s12651_s12 + $0x358] sm:$0xf]  ;;  %v8514_v36 = vld [vmem:[%s12651_s12 + $0x370] sm:$0xf0] }
 0x44a   : > { %v3444_v7 = vadd.f32 %v3443_v4, %v3023_v47  ;;  %v3428_v23 = vadd.f32 %v3427_v60, %v3414_v13  ;;  %v7229_v47 = vor.u32 %v8429_v34, %v7228_v32  ;;  %v8604_v60 = vld [vmem:[%s12651_s12 + $0x640] sm:$0xf0]  ;;  %v8415_v4 = vld [vmem:[%s12651_s12 + $0x58] sm:$0xf0] }
 0x44b   : > { %5024 = vmatpush.bf16.msrb.mxu3 %v7509_v0  ;;  %v7761_v0 = vor.u32 %v8562_v55, %v7760_v53  ;;  %v7929_v9 = vor.u32 %v8604_v60, %v7928_v59  ;;  %v7173_v12 = vor.u32 %v8415_v4, %v7172_v3  ;;  %v8447_v32 = vld [vmem:[%s12651_s12 + $0x15c] sm:$0xf]  ;;  %v8482_v53 = vld [vmem:[%s12651_s12 + $0x274] sm:$0xf]  ;;  %v7620_v59 = vld [vmem:[%s12651_s12 + $0x3c0] sm:$0xf] }
 0x44c   : > { %v3458_v14 = vadd.f32 %v3457_v11, %v3444_v7  ;;  %v3462_v44 = vmax.f32 %v3428_v23, 0.0  ;;  %v7369_v7 = vor.u32 %v8464_v58, %v7368_v42  ;;  %v7900_v11 = vld [vmem:[%s12651_s12 + $0x5f0] sm:$0xf]  ;;  %v8527_v60 = vld [vmem:[%s12651_s12 + $0x3d8] sm:$0xf0] }
 0x44d   : > { %5009 = vmatpush.bf16.msra.mxu2 %v7313_v5  ;;  %v7732_v5 = vld [vmem:[%s12651_s12 + $0x4a0] sm:$0xf]  ;;  %v8014_v42 = vld [vmem:[%s12651_s12 + $0x6ec] sm:$0xf0]  ;;  %v8475_v4 = vld [vmem:[%s12651_s12 + $0x23c] sm:$0xf] }
 0x44e   : > { %v3467_v19 = vmax.f32 %v3458_v14, 0.0  ;;  %v7733_v13 = vor.u32 %v8555_v6, %v7732_v5  ;;  %v8503_v14 = vld [vmem:[%s12651_s12 + $0x31c] sm:$0xf]  ;;  %v7621_v5 = vor.u32 %v8527_v60, %v7620_v59  ;;  %v7426_v6 = vld [vmem:[%s12651_s12 + $0x254] sm:$0xf0] }
 0x44f   : > { %5025 = vmatpush.bf16.msrb.mxu3 %v7481_v41  ;;  %v3415_v21 = vpop.f32.mrf.mxu2  ;;  %v8597_v41 = vld [vmem:[%s12651_s12 + $0x608] sm:$0xf0]  ;;  %v7429_v16 = vor.u32 %v8475_v4, %v7426_v6  ;;  %v7348_v59 = vld [vmem:[%s12651_s12 + $0x198] sm:$0xf]  ;;  %v8458_v60 = vld [vmem:[%s12651_s12 + $0x1b0] sm:$0xf0] }
 0x450   : > { %v11555_v24 = vpack.c.bf16 %v3467_v19, %v3463_v61  ;;  %v3416_v26 = vadd.f32 %v3415_v21, %v3022_v1  ;;  %v8510_v1 = vld [vmem:[%s12651_s12 + $0x354] sm:$0xf]  ;;  %v8548_v61 = vld [vmem:[%s12651_s12 + $0x480] sm:$0xf0]  ;;  %v7901_v19 = vor.u32 %v8597_v41, %v7900_v11  ;;  %v7541_v21 = vor.u32 %v8503_v14, %v7538_v15  ;;  %v7592_v11 = vld [vmem:[%s12651_s12 + $0x388] sm:$0xf] }
 0x451   : > { %5010 = vmatpush.bf16.msra.mxu2 %v7285_v18  ;;  %v7569_v10 = vor.u32 %v8510_v1, %v7566_v2  ;;  %v7704_v18 = vld [vmem:[%s12651_s12 + $0x468] sm:$0xf]  ;;  %v8520_v41 = vld [vmem:[%s12651_s12 + $0x3a0] sm:$0xf0]  ;;  %v8566_v14 = vld [vmem:[%s12651_s12 + $0x514] sm:$0xf]  ;;  %v7349_v6 = vor.u32 %v8458_v60, %v7348_v59 }
 0x452   : > { %v3430_v33 = vadd.f32 %v3429_v29, %v3416_v26  ;;  %4946 = vmatmul.bf16.vlgmr.msra.gmra.mxu1 %v11555_v24  ;;  %4974 = vmatmul.bf16.vlgmr.msra.gmra.mxu3 %v11490_v40  ;;  %v7705_v23 = vor.u32 %v8548_v61, %v7704_v18  ;;  %v8496_v26 = vld [vmem:[%s12651_s12 + $0x2e4] sm:$0xf]  ;;  %v8541_v29 = vld [vmem:[%s12651_s12 + $0x448] sm:$0xf0]  ;;  %v7258_v1 = vld [vmem:[%s12651_s12 + $0x104] sm:$0xf0]  ;;  %v7593_v61 = vor.u32 %v8520_v41, %v7592_v11 }
 0x453   : > { %5026 = vmatpush.bf16.msrb.mxu3 %v7453_v22  ;;  %5050 = vmatpush.bf16.msra.mxu1 %v8013_v25  ;;  %v7872_v22 = vld [vmem:[%s12651_s12 + $0x5b8] sm:$0xf]  ;;  %v8590_v25 = vld [vmem:[%s12651_s12 + $0x5d0] sm:$0xf0]  ;;  %v7513_v34 = vor.u32 %v8496_v26, %v7510_v27  ;;  %v7790_v15 = vld [vmem:[%s12651_s12 + $0x52c] sm:$0xf0] }
 0x454   : > { %v3466_v45 = vmax.f32 %v3430_v33, 0.0  ;;  %v7314_v33 = vld [vmem:[%s12651_s12 + $0x174] sm:$0xf0]  ;;  %v8468_v18 = vld [vmem:[%s12651_s12 + $0x204] sm:$0xf] }
 0x455   : > { %5011 = vmatpush.bf16.msra.mxu2 %v7257_v31  ;;  %v7873_v31 = vor.u32 %v8590_v25, %v7872_v22  ;;  %v7317_v54 = vor.u32 %v8447_v32, %v7314_v33  ;;  %v7793_v22 = vor.u32 %v8566_v14, %v7790_v15  ;;  %v8419_v25 = vld [vmem:[%s12651_s12 + $0x7c] sm:$0xf]  ;;  %v7762_v26 = vld [vmem:[%s12651_s12 + $0x4f4] sm:$0xf0]  ;;  %v7930_v32 = vld [vmem:[%s12651_s12 + $0x644] sm:$0xf0] }
 0x456   : > { %v11595_v51 = vpack.c.bf16 %v3466_v45, %v3462_v44  ;;  %v7648_v44 = vld [vmem:[%s12651_s12 + $0x3f8] sm:$0xf]  ;;  %v8534_v45 = vld [vmem:[%s12651_s12 + $0x410] sm:$0xf0]  ;;  %v7516_v4 = vld [vmem:[%s12651_s12 + $0x2e8] sm:$0xf] }
 0x457   : > { %5027 = vmatpush.bf16.msrb.mxu3 %v7425_v38  ;;  %5051 = vmatpush.bf16.msra.mxu1 %v7985_v39  ;;  %v7677_v38 = vor.u32 %v8541_v29, %v7676_v28  ;;  %v8489_v39 = vld [vmem:[%s12651_s12 + $0x2ac] sm:$0xf]  ;;  %v7649_v55 = vor.u32 %v8534_v45, %v7648_v44  ;;  %v7370_v29 = vld [vmem:[%s12651_s12 + $0x1e4] sm:$0xf0]  ;;  %v7320_v11 = vld [vmem:[%s12651_s12 + $0x160] sm:$0xf] }
 0x458   : > { %4932 = vmatmul.bf16.vlgmr.msrb.gmra.mxu0 %v11595_v51  ;;  %4960 = vmatmul.bf16.vlgmr.msrb.gmra.mxu2 %v11512_v57  ;;  %v8461_v28 = vld [vmem:[%s12651_s12 + $0x1cc] sm:$0xf]  ;;  %v8451_v41 = vld [vmem:[%s12651_s12 + $0x178] sm:$0xf0]  ;;  %v7846_v14 = vld [vmem:[%s12651_s12 + $0x59c] sm:$0xf0] }
 0x459   : > { %5012 = vmatpush.bf16.msra.mxu2 %v7229_v47  ;;  %5036 = vmatpush.bf16.msrb.mxu0 %v7789_v48  ;;  %v7286_v47 = vld [vmem:[%s12651_s12 + $0x13c] sm:$0xf0]  ;;  %v7485_v48 = vor.u32 %v8489_v39, %v7482_v43  ;;  %v8552_v43 = vld [vmem:[%s12651_s12 + $0x4a4] sm:$0xf]  ;;  %v7373_v44 = vor.u32 %v8461_v28, %v7370_v29  ;;  %v8626_v28 = vld [vmem:[%s12651_s12 + $0x6f0] sm:$0xf0] }
 0x45a   : > { %v7289_v58 = vor.u32 %v8440_v46, %v7286_v47  ;;  %v7174_v39 = vld [vmem:[%s12651_s12 + $0x5c] sm:$0xf0]  ;;  %v8594_v46 = vld [vmem:[%s12651_s12 + $0x5f4] sm:$0xf]  ;;  %v7902_v47 = vld [vmem:[%s12651_s12 + $0x60c] sm:$0xf0] }
 0x45b   : > { %5028 = vmatpush.bf16.msrb.mxu3 %v7397_v56  ;;  %5052 = vmatpush.bf16.msra.mxu1 %v7957_v52  ;;  %v7454_v56 = vld [vmem:[%s12651_s12 + $0x28c] sm:$0xf0]  ;;  %v8622_v52 = vld [vmem:[%s12651_s12 + $0x6d4] sm:$0xf] }
 0x45c   : > { %v7457_v2 = vor.u32 %v8482_v53, %v7454_v56  ;;  %v8017_v3 = vor.u32 %v8622_v52, %v8014_v42  ;;  %v8507_v53 = vld [vmem:[%s12651_s12 + $0x338] sm:$0xf0]  ;;  %v7146_v56 = vld [vmem:[%s12651_s12 + $0x24] sm:$0xf0]  ;;  %v8545_v52 = vld [vmem:[%s12651_s12 + $0x46c] sm:$0xf] }
 0x45d   : > { %5013 = vmatpush.bf16.msra.mxu2 %v7201_v63  ;;  %5037 = vmatpush.bf16.msrb.mxu0 %v7761_v0  ;;  %v7817_v63 = vor.u32 %v8576_v37, %v7816_v49  ;;  %v8433_v0 = vld [vmem:[%s12651_s12 + $0xec] sm:$0xf]  ;;  %v7544_v37 = vld [vmem:[%s12651_s12 + $0x320] sm:$0xf]  ;;  %v7706_v42 = vld [vmem:[%s12651_s12 + $0x484] sm:$0xf0] }
 0x45f   : > { %5029 = vmatpush.bf16.msrb.mxu3 %v7369_v7  ;;  %5053 = vmatpush.bf16.msra.mxu1 %v7929_v9  ;;  %v8615_v7 = vld [vmem:[%s12651_s12 + $0x69c] sm:$0xf]  ;;  %v7986_v9 = vld [vmem:[%s12651_s12 + $0x6b4] sm:$0xf0] }
 0x460   : > { %v7989_v17 = vor.u32 %v8615_v7, %v7986_v9  ;;  %v8538_v7 = vld [vmem:[%s12651_s12 + $0x434] sm:$0xf]  ;;  %v7678_v9 = vld [vmem:[%s12651_s12 + $0x44c] sm:$0xf0] }
 0x461   : > { %5014 = vmatpush.bf16.msra.mxu2 %v7173_v12  ;;  %5038 = vmatpush.bf16.msrb.mxu0 %v7733_v13  ;;  %v8426_v12 = vld [vmem:[%s12651_s12 + $0xb4] sm:$0xf]  ;;  %v7230_v13 = vld [vmem:[%s12651_s12 + $0xcc] sm:$0xf0]  ;;  %v7681_v15 = vor.u32 %v8538_v7, %v7678_v9  ;;  %v8465_v9 = vld [vmem:[%s12651_s12 + $0x1e8] sm:$0xf0] }
 0x462   : > { %5002 = vmatmul.bf16.vlgmr.msrb.gmra.mxu1 %v11555_v24  ;;  %5030 = vmatmul.bf16.vlgmr.msrb.gmra.mxu3 %v11490_v40 }
 0x463   : > { %5078 = vmatpush.bf16.msra.mxu3 %v7569_v10  ;;  %5054 = vmatpush.bf16.msra.mxu1 %v7901_v19  ;;  %v7261_v10 = vor.u32 %v8433_v0, %v7258_v1  ;;  %v7398_v19 = vld [vmem:[%s12651_s12 + $0x21c] sm:$0xf0]  ;;  %v8587_v0 = vld [vmem:[%s12651_s12 + $0x5bc] sm:$0xf]  ;;  %v7874_v1 = vld [vmem:[%s12651_s12 + $0x5d4] sm:$0xf0] }
 0x464   : > { %v7401_v27 = vor.u32 %v8468_v18, %v7398_v19  ;;  %v7321_v18 = vor.u32 %v8451_v41, %v7320_v11  ;;  %v7650_v19 = vld [vmem:[%s12651_s12 + $0x414] sm:$0xf0]  ;;  %v8605_v11 = vld [vmem:[%s12651_s12 + $0x648] sm:$0xf0] }
 0x465   : > { %5015 = vmatpush.bf16.msra.mxu2 %v7145_v30  ;;  %5039 = vmatpush.bf16.msrb.mxu0 %v7705_v23  ;;  %v7202_v30 = vld [vmem:[%s12651_s12 + $0x94] sm:$0xf0]  ;;  %v8559_v23 = vld [vmem:[%s12651_s12 + $0x4dc] sm:$0xf] }
 0x466   : > { %v7205_v33 = vor.u32 %v8419_v25, %v7202_v30  ;;  %v8573_v25 = vld [vmem:[%s12651_s12 + $0x54c] sm:$0xf]  ;;  %v7818_v30 = vld [vmem:[%s12651_s12 + $0x564] sm:$0xf0] }
 0x467   : > { %5079 = vmatpush.bf16.msra.mxu3 %v7541_v21  ;;  %5055 = vmatpush.bf16.msra.mxu1 %v7873_v31  ;;  %v7233_v21 = vor.u32 %v8426_v12, %v7230_v13  ;;  %v8601_v31 = vld [vmem:[%s12651_s12 + $0x62c] sm:$0xf]  ;;  %v8580_v13 = vld [vmem:[%s12651_s12 + $0x584] sm:$0xf] }
 0x468   : > { %4988 = vmatmul.bf16.vlgmr.msra.gmra.mxu0 %v11595_v51  ;;  %5016 = vmatmul.bf16.vlgmr.msra.gmra.mxu2 %v11512_v57  ;;  %v7933_v45 = vor.u32 %v8601_v31, %v7930_v32  ;;  %v8524_v31 = vld [vmem:[%s12651_s12 + $0x3c4] sm:$0xf]  ;;  %v7622_v32 = vld [vmem:[%s12651_s12 + $0x3dc] sm:$0xf0] }
 0x469   : > { %5064 = vmatpush.bf16.msrb.mxu2 %v7345_v8  ;;  %5040 = vmatpush.bf16.msrb.mxu0 %v7677_v38  ;;  %v7961_v8 = vor.u32 %v8608_v20, %v7958_v50  ;;  %v8412_v38 = vld [vmem:[%s12651_s12 + $0x44] sm:$0xf]  ;;  %v7849_v20 = vor.u32 %v8580_v13, %v7846_v14  ;;  %v7292_v50 = vld [vmem:[%s12651_s12 + $0x128] sm:$0xf]  ;;  %v8511_v13 = vld [vmem:[%s12651_s12 + $0x35c] sm:$0xf] }
 0x46a   : > { %v7574_v14 = vld [vmem:[%s12651_s12 + $0x374] sm:$0xf0] }
 0x46b   : > { %5080 = vmatpush.bf16.msra.mxu3 %v7513_v34  ;;  %5056 = vmatpush.bf16.msra.mxu1 %v7845_v62  ;;  %v7765_v34 = vor.u32 %v8559_v23, %v7762_v26  ;;  %v7573_v62 = vor.u32 %v8514_v36, %v7572_v35  ;;  %v7460_v23 = vld [vmem:[%s12651_s12 + $0x278] sm:$0xf]  ;;  %v8437_v35 = vld [vmem:[%s12651_s12 + $0x108] sm:$0xf0] }
 0x46d   : > { %5065 = vmatpush.bf16.msrb.mxu2 %v7317_v54  ;;  %5041 = vmatpush.bf16.msrb.mxu0 %v7649_v55  ;;  %v7734_v54 = vld [vmem:[%s12651_s12 + $0x4bc] sm:$0xf0]  ;;  %v8405_v55 = vld [vmem:[%s12651_s12 + $0xc] sm:$0xf] }
 0x46e   : > { %v7737_v49 = vor.u32 %v8552_v43, %v7734_v54  ;;  %v7625_v43 = vor.u32 %v8524_v31, %v7622_v32  ;;  %v8479_v54 = vld [vmem:[%s12651_s12 + $0x258] sm:$0xf0]  ;;  %v7350_v31 = vld [vmem:[%s12651_s12 + $0x1b4] sm:$0xf0] }
 0x46f   : > { %5081 = vmatpush.bf16.msra.mxu3 %v7485_v48  ;;  %5057 = vmatpush.bf16.msra.mxu1 %v7817_v63  ;;  %v7177_v48 = vor.u32 %v8412_v38, %v7174_v39  ;;  %v7545_v63 = vor.u32 %v8507_v53, %v7544_v37  ;;  %v7432_v39 = vld [vmem:[%s12651_s12 + $0x240] sm:$0xf]  ;;  %v7796_v37 = vld [vmem:[%s12651_s12 + $0x518] sm:$0xf]  ;;  %v8570_v53 = vld [vmem:[%s12651_s12 + $0x530] sm:$0xf0] }
 0x470   : > { %v7797_v60 = vor.u32 %v8570_v53, %v7796_v37  ;;  %v7852_v37 = vld [vmem:[%s12651_s12 + $0x588] sm:$0xf]  ;;  %v8584_v53 = vld [vmem:[%s12651_s12 + $0x5a0] sm:$0xf0] }
 0x471   : > { %5066 = vmatpush.bf16.msrb.mxu2 %v7289_v58  ;;  %5042 = vmatpush.bf16.msrb.mxu0 %v7621_v5  ;;  %v7905_v58 = vor.u32 %v8594_v46, %v7902_v47  ;;  %v8500_v5 = vld [vmem:[%s12651_s12 + $0x300] sm:$0xf0]  ;;  %v8517_v46 = vld [vmem:[%s12651_s12 + $0x38c] sm:$0xf]  ;;  %v7594_v47 = vld [vmem:[%s12651_s12 + $0x3a4] sm:$0xf0] }
 0x472   : > { %5058 = vmatmul.bf16.vlgmr.msra.gmra.mxu1 %v11555_v24  ;;  %v7517_v12 = vor.u32 %v8500_v5, %v7516_v4  ;;  %v8563_v4 = vld [vmem:[%s12651_s12 + $0x4f8] sm:$0xf0] }
 0x473   : > { %5082 = vmatpush.bf16.msra.mxu3 %v7457_v2  ;;  %5106 = vmatpush.bf16.msrb.mxu1 %v8017_v3  ;;  %v7149_v2 = vor.u32 %v8405_v55, %v7146_v56  ;;  %v7709_v3 = vor.u32 %v8545_v52, %v7706_v42  ;;  %v7433_v55 = vor.u32 %v8479_v54, %v7432_v39  ;;  %v7404_v42 = vld [vmem:[%s12651_s12 + $0x208] sm:$0xf]  ;;  %v8497_v39 = vld [vmem:[%s12651_s12 + $0x2ec] sm:$0xf] }
 0x474   : > { %v7597_v52 = vor.u32 %v8517_v46, %v7594_v47  ;;  %v7518_v54 = vld [vmem:[%s12651_s12 + $0x304] sm:$0xf0]  ;;  %v7322_v46 = vld [vmem:[%s12651_s12 + $0x17c] sm:$0xf0] }
 0x475   : > { %5067 = vmatpush.bf16.msrb.mxu2 %v7261_v10  ;;  %5043 = vmatpush.bf16.msrb.mxu0 %v7593_v61  ;;  %v7877_v10 = vor.u32 %v8587_v0, %v7874_v1  ;;  %v8531_v61 = vld [vmem:[%s12651_s12 + $0x3fc] sm:$0xf]  ;;  %v8612_v0 = vld [vmem:[%s12651_s12 + $0x680] sm:$0xf0]  ;;  %v7208_v1 = vld [vmem:[%s12651_s12 + $0x80] sm:$0xf] }
 0x476   : > { %v7653_v26 = vor.u32 %v8531_v61, %v7650_v19 }
 0x477   : > { %5083 = vmatpush.bf16.msra.mxu3 %v7429_v16  ;;  %5107 = vmatpush.bf16.msrb.mxu1 %v7989_v17  ;;  %v7488_v16 = vld [vmem:[%s12651_s12 + $0x2b0] sm:$0xf]  ;;  %v8493_v17 = vld [vmem:[%s12651_s12 + $0x2c8] sm:$0xf0] }
 0x478   : > { %5044 = vmatmul.bf16.vlgmr.msrb.gmra.mxu0 %v11595_v51 }
 0x479   : > { %5068 = vmatpush.bf16.msrb.mxu2 %v7233_v21  ;;  %5092 = vmatpush.bf16.msra.mxu0 %v7793_v22  ;;  %v8444_v21 = vld [vmem:[%s12651_s12 + $0x140] sm:$0xf0]  ;;  %v7489_v22 = vor.u32 %v8493_v17, %v7488_v16  ;;  %v7740_v17 = vld [vmem:[%s12651_s12 + $0x4a8] sm:$0xf] }
 0x47a   : > { %v7293_v29 = vor.u32 %v8444_v21, %v7292_v50  ;;  %v8416_v16 = vld [vmem:[%s12651_s12 + $0x60] sm:$0xf0]  ;;  %v7908_v50 = vld [vmem:[%s12651_s12 + $0x5f8] sm:$0xf]  ;;  %v8598_v21 = vld [vmem:[%s12651_s12 + $0x610] sm:$0xf0] }
 0x47b   : > { %5084 = vmatpush.bf16.msra.mxu3 %v7401_v27  ;;  %5108 = vmatpush.bf16.msrb.mxu1 %v7961_v8  ;;  %v8486_v27 = vld [vmem:[%s12651_s12 + $0x290] sm:$0xf0]  ;;  %v8020_v8 = vld [vmem:[%s12651_s12 + $0x6d8] sm:$0xf]  ;;  %v7909_v32 = vor.u32 %v8598_v21, %v7908_v50  ;;  %v7600_v50 = vld [vmem:[%s12651_s12 + $0x390] sm:$0xf] }
 0x47c   : > { %v7461_v36 = vor.u32 %v8486_v27, %v7460_v23  ;;  %v8021_v38 = vor.u32 %v8626_v28, %v8020_v8  ;;  %v7546_v23 = vld [vmem:[%s12651_s12 + $0x33c] sm:$0xf0]  ;;  %v8409_v27 = vld [vmem:[%s12651_s12 + $0x28] sm:$0xf0]  ;;  %v7712_v8 = vld [vmem:[%s12651_s12 + $0x470] sm:$0xf] }
 0x47d   : > { %5069 = vmatpush.bf16.msrb.mxu2 %v7205_v33  ;;  %5093 = vmatpush.bf16.msra.mxu0 %v7765_v34  ;;  %v7821_v33 = vor.u32 %v8573_v25, %v7818_v30  ;;  %v7264_v34 = vld [vmem:[%s12651_s12 + $0xf0] sm:$0xf]  ;;  %v8504_v30 = vld [vmem:[%s12651_s12 + $0x324] sm:$0xf]  ;;  %v8549_v28 = vld [vmem:[%s12651_s12 + $0x488] sm:$0xf0] }
 0x47e   : > { %v8521_v21 = vld [vmem:[%s12651_s12 + $0x3a8] sm:$0xf0] }
 0x47f   : > { %5085 = vmatpush.bf16.msra.mxu3 %v7373_v44  ;;  %5109 = vmatpush.bf16.msrb.mxu1 %v7933_v45  ;;  %v7992_v44 = vld [vmem:[%s12651_s12 + $0x6a0] sm:$0xf]  ;;  %v8619_v45 = vld [vmem:[%s12651_s12 + $0x6b8] sm:$0xf0] }
 0x480   : > { %v7993_v56 = vor.u32 %v8619_v45, %v7992_v44  ;;  %v7684_v44 = vld [vmem:[%s12651_s12 + $0x438] sm:$0xf]  ;;  %v8542_v45 = vld [vmem:[%s12651_s12 + $0x450] sm:$0xf0] }
 0x481   : > { %5070 = vmatpush.bf16.msrb.mxu2 %v7177_v48  ;;  %5094 = vmatpush.bf16.msra.mxu0 %v7737_v49  ;;  %v7236_v48 = vld [vmem:[%s12651_s12 + $0xb8] sm:$0xf]  ;;  %v8430_v49 = vld [vmem:[%s12651_s12 + $0xd0] sm:$0xf0] }
 0x482   : > { %5086 = vmatmul.bf16.vlgmr.msra.gmra.mxu3 %v11490_v40  ;;  %v7237_v59 = vor.u32 %v8430_v49, %v7236_v48  ;;  %v7521_v48 = vor.u32 %v8497_v39, %v7518_v54  ;;  %v7685_v49 = vor.u32 %v8542_v45, %v7684_v44  ;;  %v7770_v39 = vld [vmem:[%s12651_s12 + $0x4fc] sm:$0xf0]  ;;  %v8462_v54 = vld [vmem:[%s12651_s12 + $0x1d4] sm:$0xf] }
 0x483   : > { %5134 = vmatpush.bf16.msrb.mxu3 %v7573_v62  ;;  %5110 = vmatpush.bf16.msrb.mxu1 %v7905_v58  ;;  %v7265_v62 = vor.u32 %v8437_v35, %v7264_v34  ;;  %v8472_v58 = vld [vmem:[%s12651_s12 + $0x220] sm:$0xf0]  ;;  %v7713_v35 = vor.u32 %v8549_v28, %v7712_v8  ;;  %v7601_v8 = vor.u32 %v8521_v21, %v7600_v50 }
 0x484   : > { %v7405_v5 = vor.u32 %v8472_v58, %v7404_v42  ;;  %v7656_v42 = vld [vmem:[%s12651_s12 + $0x400] sm:$0xf]  ;;  %v8535_v58 = vld [vmem:[%s12651_s12 + $0x418] sm:$0xf0]  ;;  %v8452_v50 = vld [vmem:[%s12651_s12 + $0x180] sm:$0xf0] }
 0x485   : > { %5071 = vmatpush.bf16.msrb.mxu2 %v7149_v2  ;;  %5095 = vmatpush.bf16.msra.mxu0 %v7709_v3  ;;  %v8423_v2 = vld [vmem:[%s12651_s12 + $0x98] sm:$0xf0]  ;;  %v7768_v3 = vld [vmem:[%s12651_s12 + $0x4e0] sm:$0xf] }
 0x486   : > { %v7209_v41 = vor.u32 %v8423_v2, %v7208_v1  ;;  %v7657_v2 = vor.u32 %v8535_v58, %v7656_v42 }
 0x487   : > { %5135 = vmatpush.bf16.msrb.mxu3 %v7545_v63  ;;  %5111 = vmatpush.bf16.msrb.mxu1 %v7877_v10  ;;  %v7964_v63 = vld [vmem:[%s12651_s12 + $0x668] sm:$0xf]  ;;  %v7936_v10 = vld [vmem:[%s12651_s12 + $0x630] sm:$0xf] }
 0x488   : > { %5072 = vmatmul.bf16.vlgmr.msrb.gmra.mxu2 %v11512_v57  ;;  %v7965_v7 = vor.u32 %v8612_v0, %v7964_v63  ;;  %v7937_v19 = vor.u32 %v8605_v11, %v7936_v10  ;;  %v7853_v63 = vor.u32 %v8584_v53, %v7852_v37  ;;  %v7824_v0 = vld [vmem:[%s12651_s12 + $0x550] sm:$0xf]  ;;  %v7628_v10 = vld [vmem:[%s12651_s12 + $0x3c8] sm:$0xf]  ;;  %v8528_v11 = vld [vmem:[%s12651_s12 + $0x3e0] sm:$0xf0] }
 0x489   : > { %5120 = vmatpush.bf16.msra.mxu2 %v7349_v6  ;;  %5096 = vmatpush.bf16.msra.mxu0 %v7681_v15  ;;  %v7376_v6 = vld [vmem:[%s12651_s12 + $0x1d0] sm:$0xf]  ;;  %v7180_v15 = vld [vmem:[%s12651_s12 + $0x48] sm:$0xf]  ;;  %v8515_v37 = vld [vmem:[%s12651_s12 + $0x378] sm:$0xf0] }
 0x48a   : > { %v7377_v61 = vor.u32 %v8465_v9, %v7376_v6  ;;  %v8022_v9 = vld [vmem:[%s12651_s12 + $0x6f4] sm:$0xf0]  ;;  %v8413_v53 = vld [vmem:[%s12651_s12 + $0x4c] sm:$0xf] }
 0x48b   : > { %5136 = vmatpush.bf16.msrb.mxu3 %v7517_v12  ;;  %5112 = vmatpush.bf16.msrb.mxu1 %v7849_v20  ;;  %v7769_v12 = vor.u32 %v8563_v4, %v7768_v3  ;;  %v7577_v20 = vor.u32 %v8511_v13, %v7574_v14  ;;  %v8577_v3 = vld [vmem:[%s12651_s12 + $0x568] sm:$0xf0]  ;;  %v8483_v4 = vld [vmem:[%s12651_s12 + $0x27c] sm:$0xf] }
 0x48c   : > { %v7825_v13 = vor.u32 %v8577_v3, %v7824_v0  ;;  %v8508_v3 = vld [vmem:[%s12651_s12 + $0x340] sm:$0xf0] }
 0x48d   : > { %5121 = vmatpush.bf16.msra.mxu2 %v7321_v18  ;;  %5097 = vmatpush.bf16.msra.mxu0 %v7653_v26  ;;  %v8556_v18 = vld [vmem:[%s12651_s12 + $0x4c0] sm:$0xf0]  ;;  %v7152_v26 = vld [vmem:[%s12651_s12 + $0x10] sm:$0xf] }
 0x48e   : > { %v7741_v25 = vor.u32 %v8556_v18, %v7740_v17  ;;  %v7153_v34 = vor.u32 %v8409_v27, %v7152_v26  ;;  %v7434_v17 = vld [vmem:[%s12651_s12 + $0x25c] sm:$0xf0]  ;;  %v7629_v18 = vor.u32 %v8528_v11, %v7628_v10  ;;  %v8459_v10 = vld [vmem:[%s12651_s12 + $0x1b8] sm:$0xf0] }
 0x48f   : > { %5137 = vmatpush.bf16.msrb.mxu3 %v7489_v22  ;;  %5113 = vmatpush.bf16.msrb.mxu1 %v7821_v33  ;;  %v7181_v22 = vor.u32 %v8416_v16, %v7180_v15  ;;  %v7549_v33 = vor.u32 %v8504_v30, %v7546_v23  ;;  %v8476_v16 = vld [vmem:[%s12651_s12 + $0x244] sm:$0xf]  ;;  %v8567_v30 = vld [vmem:[%s12651_s12 + $0x51c] sm:$0xf]  ;;  %v7798_v23 = vld [vmem:[%s12651_s12 + $0x534] sm:$0xf0] }
 0x490   : > { %v7437_v26 = vor.u32 %v8476_v16, %v7434_v17  ;;  %v7524_v16 = vld [vmem:[%s12651_s12 + $0x2f0] sm:$0xf] }
 0x491   : > { %5122 = vmatpush.bf16.msra.mxu2 %v7293_v29  ;;  %5098 = vmatpush.bf16.msra.mxu0 %v7625_v43  ;;  %v8455_v29 = vld [vmem:[%s12651_s12 + $0x19c] sm:$0xf] }
 0x492   : > { %5114 = vmatmul.bf16.vlgmr.msrb.gmra.mxu1 %v11555_v24  ;;  %v7353_v43 = vor.u32 %v8455_v29, %v7350_v31  ;;  %v8469_v29 = vld [vmem:[%s12651_s12 + $0x20c] sm:$0xf]  ;;  %v7406_v31 = vld [vmem:[%s12651_s12 + $0x224] sm:$0xf0] }
 0x493   : > { %5138 = vmatpush.bf16.msrb.mxu3 %v7461_v36  ;;  %5162 = vmatpush.bf16.msra.mxu1 %v8021_v38  ;;  %v7880_v36 = vld [vmem:[%s12651_s12 + $0x5c0] sm:$0xf]  ;;  %v8591_v38 = vld [vmem:[%s12651_s12 + $0x5d8] sm:$0xf0] }
 0x494   : > { %v7881_v47 = vor.u32 %v8591_v38, %v7880_v36  ;;  %v7210_v36 = vld [vmem:[%s12651_s12 + $0x9c] sm:$0xf0]  ;;  %v8560_v38 = vld [vmem:[%s12651_s12 + $0x4e4] sm:$0xf] }
 0x495   : > { %5123 = vmatpush.bf16.msra.mxu2 %v7265_v62  ;;  %5099 = vmatpush.bf16.msra.mxu0 %v7597_v52  ;;  %v8448_v62 = vld [vmem:[%s12651_s12 + $0x164] sm:$0xf]  ;;  %v7490_v52 = vld [vmem:[%s12651_s12 + $0x2cc] sm:$0xf0] }
 0x497   : > { %5139 = vmatpush.bf16.msrb.mxu3 %v7433_v55  ;;  %5163 = vmatpush.bf16.msra.mxu1 %v7993_v56  ;;  %v8490_v55 = vld [vmem:[%s12651_s12 + $0x2b4] sm:$0xf]  ;;  %v7325_v56 = vor.u32 %v8448_v62, %v7322_v46  ;;  %v7378_v62 = vld [vmem:[%s12651_s12 + $0x1ec] sm:$0xf0] }
 0x498   : > { %5100 = vmatmul.bf16.vlgmr.msra.gmra.mxu0 %v11595_v51  ;;  %v7493_v1 = vor.u32 %v8490_v55, %v7490_v52  ;;  %v8602_v46 = vld [vmem:[%s12651_s12 + $0x634] sm:$0xf]  ;;  %v7182_v55 = vld [vmem:[%s12651_s12 + $0x64] sm:$0xf0]  ;;  %v7381_v42 = vor.u32 %v8462_v54, %v7378_v62  ;;  %v8525_v62 = vld [vmem:[%s12651_s12 + $0x3cc] sm:$0xf] }
 0x499   : > { %5124 = vmatpush.bf16.msra.mxu2 %v7237_v59  ;;  %5148 = vmatpush.bf16.msrb.mxu0 %v7797_v60  ;;  %v8441_v59 = vld [vmem:[%s12651_s12 + $0x12c] sm:$0xf]  ;;  %v7294_v60 = vld [vmem:[%s12651_s12 + $0x144] sm:$0xf0]  ;;  %v7185_v0 = vor.u32 %v8413_v53, %v7182_v55 }
 0x49a   : > { %v7297_v6 = vor.u32 %v8441_v59, %v7294_v60  ;;  %v7742_v52 = vld [vmem:[%s12651_s12 + $0x4c4] sm:$0xf0]  ;;  %v8595_v60 = vld [vmem:[%s12651_s12 + $0x5fc] sm:$0xf] }
 0x49b   : > { %5140 = vmatpush.bf16.msrb.mxu3 %v7405_v5  ;;  %5164 = vmatpush.bf16.msra.mxu1 %v7965_v7  ;;  %v7462_v5 = vld [vmem:[%s12651_s12 + $0x294] sm:$0xf0]  ;;  %v8623_v7 = vld [vmem:[%s12651_s12 + $0x6dc] sm:$0xf]  ;;  %v7440_v55 = vld [vmem:[%s12651_s12 + $0x248] sm:$0xf] }
 0x49c   : > { %v7465_v14 = vor.u32 %v8483_v4, %v7462_v5  ;;  %v8025_v15 = vor.u32 %v8623_v7, %v8022_v9  ;;  %v8406_v4 = vld [vmem:[%s12651_s12 + $0x14] sm:$0xf]  ;;  %v7154_v5 = vld [vmem:[%s12651_s12 + $0x2c] sm:$0xf0]  ;;  %v7356_v9 = vld [vmem:[%s12651_s12 + $0x1a0] sm:$0xf] }
 0x49d   : > { %5125 = vmatpush.bf16.msra.mxu2 %v7209_v41  ;;  %5149 = vmatpush.bf16.msrb.mxu0 %v7769_v12  ;;  %v8434_v41 = vld [vmem:[%s12651_s12 + $0xf4] sm:$0xf]  ;;  %v7266_v12 = vld [vmem:[%s12651_s12 + $0x10c] sm:$0xf0]  ;;  %v7357_v17 = vor.u32 %v8459_v10, %v7356_v9 }
 0x49e   : > { %v7714_v7 = vld [vmem:[%s12651_s12 + $0x48c] sm:$0xf0] }
 0x49f   : > { %5141 = vmatpush.bf16.msrb.mxu3 %v7377_v61  ;;  %5165 = vmatpush.bf16.msra.mxu1 %v7937_v19  ;;  %v7269_v61 = vor.u32 %v8434_v41, %v7266_v12  ;;  %v8616_v19 = vld [vmem:[%s12651_s12 + $0x6a4] sm:$0xf]  ;;  %v7157_v12 = vor.u32 %v8406_v4, %v7154_v5  ;;  %v7412_v10 = vld [vmem:[%s12651_s12 + $0x210] sm:$0xf] }
 0x4a1   : > { %5126 = vmatpush.bf16.msra.mxu2 %v7181_v22  ;;  %5150 = vmatpush.bf16.msrb.mxu0 %v7741_v25  ;;  %v8427_v22 = vld [vmem:[%s12651_s12 + $0xbc] sm:$0xf]  ;;  %v7238_v25 = vld [vmem:[%s12651_s12 + $0xd4] sm:$0xf0] }
 0x4a2   : > { %5142 = vmatmul.bf16.vlgmr.msrb.gmra.mxu3 %v11490_v40  ;;  %v7241_v28 = vor.u32 %v8427_v22, %v7238_v25 }
 0x4a3   : > { %5190 = vmatpush.bf16.msra.mxu3 %v7577_v20  ;;  %5166 = vmatpush.bf16.msra.mxu1 %v7909_v32  ;;  %v7994_v20 = vld [vmem:[%s12651_s12 + $0x6bc] sm:$0xf0]  ;;  %v8609_v32 = vld [vmem:[%s12651_s12 + $0x66c] sm:$0xf] }
 0x4a4   : > { %v7997_v27 = vor.u32 %v8616_v19, %v7994_v20  ;;  %v7686_v19 = vld [vmem:[%s12651_s12 + $0x454] sm:$0xf0]  ;;  %v7328_v20 = vld [vmem:[%s12651_s12 + $0x168] sm:$0xf] }
 0x4a5   : > { %5127 = vmatpush.bf16.msra.mxu2 %v7153_v34  ;;  %5151 = vmatpush.bf16.msrb.mxu0 %v7713_v35  ;;  %v7966_v34 = vld [vmem:[%s12651_s12 + $0x684] sm:$0xf0]  ;;  %v8420_v35 = vld [vmem:[%s12651_s12 + $0x84] sm:$0xf] }
 0x4a6   : > { %v7969_v44 = vor.u32 %v8609_v32, %v7966_v34  ;;  %v7213_v45 = vor.u32 %v8420_v35, %v7210_v36  ;;  %v8445_v32 = vld [vmem:[%s12651_s12 + $0x148] sm:$0xf0]  ;;  %v8574_v34 = vld [vmem:[%s12651_s12 + $0x554] sm:$0xf] }
 0x4a7   : > { %5191 = vmatpush.bf16.msra.mxu3 %v7549_v33  ;;  %5167 = vmatpush.bf16.msra.mxu1 %v7881_v47  ;;  %v7801_v33 = vor.u32 %v8567_v30, %v7798_v23  ;;  %v7938_v47 = vld [vmem:[%s12651_s12 + $0x64c] sm:$0xf0]  ;;  %v8581_v30 = vld [vmem:[%s12651_s12 + $0x58c] sm:$0xf]  ;;  %v7854_v23 = vld [vmem:[%s12651_s12 + $0x5a4] sm:$0xf0] }
 0x4a8   : > { %5128 = vmatmul.bf16.vlgmr.msra.gmra.mxu2 %v11512_v57  ;;  %v7941_v58 = vor.u32 %v8602_v46, %v7938_v47  ;;  %v7630_v46 = vld [vmem:[%s12651_s12 + $0x3e4] sm:$0xf0]  ;;  %v7272_v47 = vld [vmem:[%s12651_s12 + $0xf8] sm:$0xf] }
 0x4a9   : > { %5176 = vmatpush.bf16.msrb.mxu2 %v7353_v43  ;;  %5152 = vmatpush.bf16.msrb.mxu0 %v7685_v49  ;;  %v7409_v43 = vor.u32 %v8469_v29, %v7406_v31  ;;  %v7580_v49 = vld [vmem:[%s12651_s12 + $0x360] sm:$0xf]  ;;  %v7300_v31 = vld [vmem:[%s12651_s12 + $0x130] sm:$0xf] }
 0x4aa   : > { %v7581_v59 = vor.u32 %v8515_v37, %v7580_v49  ;;  %v7658_v29 = vld [vmem:[%s12651_s12 + $0x41c] sm:$0xf0]  ;;  %v7301_v54 = vor.u32 %v8445_v32, %v7300_v31  ;;  %v7748_v31 = vld [vmem:[%s12651_s12 + $0x4b0] sm:$0xf]  ;;  %v8557_v32 = vld [vmem:[%s12651_s12 + $0x4c8] sm:$0xf0] }
 0x4ab   : > { %5192 = vmatpush.bf16.msra.mxu3 %v7521_v48  ;;  %5168 = vmatpush.bf16.msra.mxu1 %v7853_v63  ;;  %v7773_v48 = vor.u32 %v8560_v38, %v7770_v39  ;;  %v7910_v63 = vld [vmem:[%s12651_s12 + $0x614] sm:$0xf0]  ;;  %v7826_v38 = vld [vmem:[%s12651_s12 + $0x56c] sm:$0xf0]  ;;  %v7468_v39 = vld [vmem:[%s12651_s12 + $0x280] sm:$0xf] }
 0x4ac   : > { %v7913_v11 = vor.u32 %v8595_v60, %v7910_v63  ;;  %v7829_v49 = vor.u32 %v8574_v34, %v7826_v38  ;;  %v8518_v60 = vld [vmem:[%s12651_s12 + $0x394] sm:$0xf]  ;;  %v7602_v63 = vld [vmem:[%s12651_s12 + $0x3ac] sm:$0xf0] }
 0x4ad   : > { %5177 = vmatpush.bf16.msrb.mxu2 %v7325_v56  ;;  %5153 = vmatpush.bf16.msrb.mxu0 %v7657_v2  ;;  %v8553_v56 = vld [vmem:[%s12651_s12 + $0x4ac] sm:$0xf]  ;;  %v7552_v2 = vld [vmem:[%s12651_s12 + $0x328] sm:$0xf] }
 0x4ae   : > { %v7553_v41 = vor.u32 %v8508_v3, %v7552_v2  ;;  %v7804_v2 = vld [vmem:[%s12651_s12 + $0x520] sm:$0xf]  ;;  %v8571_v3 = vld [vmem:[%s12651_s12 + $0x538] sm:$0xf0] }
 0x4af   : > { %5193 = vmatpush.bf16.msra.mxu3 %v7493_v1  ;;  %5169 = vmatpush.bf16.msra.mxu1 %v7825_v13  ;;  %v7745_v1 = vor.u32 %v8553_v56, %v7742_v52  ;;  %v8480_v56 = vld [vmem:[%s12651_s12 + $0x260] sm:$0xf0]  ;;  %v7633_v52 = vor.u32 %v8525_v62, %v7630_v46  ;;  %v7720_v62 = vld [vmem:[%s12651_s12 + $0x478] sm:$0xf]  ;;  %v8550_v46 = vld [vmem:[%s12651_s12 + $0x490] sm:$0xf0] }
 0x4b0   : > { %v7441_v4 = vor.u32 %v8480_v56, %v7440_v55  ;;  %v7721_v55 = vor.u32 %v8550_v46, %v7720_v62  ;;  %v7888_v56 = vld [vmem:[%s12651_s12 + $0x5c8] sm:$0xf] }
 0x4b1   : > { %5178 = vmatpush.bf16.msrb.mxu2 %v7297_v6  ;;  %5154 = vmatpush.bf16.msrb.mxu0 %v7629_v18  ;;  %v8546_v6 = vld [vmem:[%s12651_s12 + $0x474] sm:$0xf]  ;;  %v8501_v18 = vld [vmem:[%s12651_s12 + $0x308] sm:$0xf0] }
 0x4b2   : > { %5170 = vmatmul.bf16.vlgmr.msra.gmra.mxu1 %v11555_v24  ;;  %v7717_v13 = vor.u32 %v8546_v6, %v7714_v7  ;;  %v7525_v22 = vor.u32 %v8501_v18, %v7524_v16  ;;  %v12371_v6 = vld [vmem:[%s12652_s13] sm:$0x7f]  ;;  %v7605_v7 = vor.u32 %v8518_v60, %v7602_v63  ;;  %v7776_v18 = vld [vmem:[%s12651_s12 + $0x4e8] sm:$0xf]  ;;  %v8543_v60 = vld [vmem:[%s12651_s12 + $0x458] sm:$0xf0] }
 0x4b3   : > { %5194 = vmatpush.bf16.msra.mxu3 %v7465_v14  ;;  %5218 = vmatpush.bf16.msrb.mxu1 %v8025_v15  ;;  %v8588_v14 = vld [vmem:[%s12651_s12 + $0x5c4] sm:$0xf]  ;;  %v7882_v15 = vld [vmem:[%s12651_s12 + $0x5dc] sm:$0xf0] }
 0x4b4   : > { %v7885_v21 = vor.u32 %v8588_v14, %v7882_v15  ;;  %v8613_v14 = vld [vmem:[%s12651_s12 + $0x688] sm:$0xf0]  ;;  %v7216_v15 = vld [vmem:[%s12651_s12 + $0x88] sm:$0xf]  ;;  %v8424_v16 = vld [vmem:[%s12651_s12 + $0xa0] sm:$0xf0] }
 0x4b5   : > { %5179 = vmatpush.bf16.msrb.mxu2 %v7269_v61  ;;  %5155 = vmatpush.bf16.msrb.mxu0 %v7601_v8  ;;  %v8539_v61 = vld [vmem:[%s12651_s12 + $0x43c] sm:$0xf]  ;;  %v8494_v8 = vld [vmem:[%s12651_s12 + $0x2d0] sm:$0xf0] }
 0x4b6   : > { %v7689_v25 = vor.u32 %v8539_v61, %v7686_v19  ;;  %v8564_v61 = vld [vmem:[%s12651_s12 + $0x500] sm:$0xf0] }
 0x4b7   : > { %5195 = vmatpush.bf16.msra.mxu3 %v7437_v26  ;;  %5219 = vmatpush.bf16.msrb.mxu1 %v7997_v27  ;;  %v7496_v26 = vld [vmem:[%s12651_s12 + $0x2b8] sm:$0xf]  ;;  %v7329_v27 = vor.u32 %v8452_v50, %v7328_v20 }
 0x4b8   : > { %5156 = vmatmul.bf16.vlgmr.msrb.gmra.mxu0 %v11595_v51  ;;  %v7497_v35 = vor.u32 %v8494_v8, %v7496_v26  ;;  %v8606_v26 = vld [vmem:[%s12651_s12 + $0x650] sm:$0xf0]  ;;  %v8417_v8 = vld [vmem:[%s12651_s12 + $0x68] sm:$0xf0] }
 0x4b9   : > { %5180 = vmatpush.bf16.msrb.mxu2 %v7241_v28  ;;  %5204 = vmatpush.bf16.msra.mxu0 %v7801_v33  ;;  %v8532_v28 = vld [vmem:[%s12651_s12 + $0x404] sm:$0xf]  ;;  %v7857_v33 = vor.u32 %v8581_v30, %v7854_v23  ;;  %v7944_v30 = vld [vmem:[%s12651_s12 + $0x638] sm:$0xf]  ;;  %v7777_v23 = vor.u32 %v8564_v61, %v7776_v18  ;;  %v8529_v18 = vld [vmem:[%s12651_s12 + $0x3e8] sm:$0xf0] }
 0x4ba   : > { %v7661_v36 = vor.u32 %v8532_v28, %v7658_v29  ;;  %v7945_v34 = vor.u32 %v8606_v26, %v7944_v30  ;;  %v7608_v30 = vld [vmem:[%s12651_s12 + $0x398] sm:$0xf] }
 0x4bb   : > { %5196 = vmatpush.bf16.msra.mxu3 %v7409_v43  ;;  %5220 = vmatpush.bf16.msrb.mxu1 %v7969_v44  ;;  %v8487_v43 = vld [vmem:[%s12651_s12 + $0x298] sm:$0xf0]  ;;  %v8028_v44 = vld [vmem:[%s12651_s12 + $0x6e0] sm:$0xf] }
 0x4bc   : > { %v7469_v37 = vor.u32 %v8487_v43, %v7468_v39  ;;  %v7749_v39 = vor.u32 %v8557_v32, %v7748_v31  ;;  %v8599_v43 = vld [vmem:[%s12651_s12 + $0x618] sm:$0xf0] }
 0x4bd   : > { %5181 = vmatpush.bf16.msrb.mxu2 %v7213_v45  ;;  %5205 = vmatpush.bf16.msra.mxu0 %v7773_v48  ;;  %v8627_v45 = vld [vmem:[%s12651_s12 + $0x6f8] sm:$0xf0]  ;;  %v8438_v48 = vld [vmem:[%s12651_s12 + $0x110] sm:$0xf0] }
 0x4be   : > { %v8029_v53 = vor.u32 %v8627_v45, %v8028_v44  ;;  %v8410_v44 = vld [vmem:[%s12651_s12 + $0x30] sm:$0xf0] }
 0x4bf   : > { %5197 = vmatpush.bf16.msra.mxu3 %v7381_v42  ;;  %5221 = vmatpush.bf16.msrb.mxu1 %v7941_v58  ;;  %v7273_v42 = vor.u32 %v8438_v48, %v7272_v47  ;;  %v8000_v58 = vld [vmem:[%s12651_s12 + $0x6a8] sm:$0xf] }
 0x4c1   : > { %5182 = vmatpush.bf16.msrb.mxu2 %v7185_v0  ;;  %5206 = vmatpush.bf16.msra.mxu0 %v7745_v1  ;;  %v7244_v0 = vld [vmem:[%s12651_s12 + $0xc0] sm:$0xf]  ;;  %v8431_v1 = vld [vmem:[%s12651_s12 + $0xd8] sm:$0xf0] }
 0x4c2   : > { %5198 = vmatmul.bf16.vlgmr.msra.gmra.mxu3 %v11490_v40  ;;  %v7245_v9 = vor.u32 %v8431_v1, %v7244_v0 }
 0x4c3   : > { %5246 = vmatpush.bf16.msrb.mxu3 %v7581_v59  ;;  %5222 = vmatpush.bf16.msrb.mxu1 %v7913_v11  ;;  %v8620_v59 = vld [vmem:[%s12651_s12 + $0x6c0] sm:$0xf0]  ;;  %v8473_v11 = vld [vmem:[%s12651_s12 + $0x228] sm:$0xf0] }
 0x4c4   : > { %v8001_v5 = vor.u32 %v8620_v59, %v8000_v58  ;;  %v7413_v20 = vor.u32 %v8473_v11, %v7412_v10  ;;  %v7692_v59 = vld [vmem:[%s12651_s12 + $0x440] sm:$0xf]  ;;  %v8536_v10 = vld [vmem:[%s12651_s12 + $0x420] sm:$0xf0] }
 0x4c5   : > { %5183 = vmatpush.bf16.msrb.mxu2 %v7157_v12  ;;  %5207 = vmatpush.bf16.msra.mxu0 %v7717_v13  ;;  %v7805_v13 = vor.u32 %v8571_v3, %v7804_v2  ;;  %v4919_v19 = vpop.f32.mrf.mxu3  ;;  %v7693_v3 = vor.u32 %v8543_v60, %v7692_v59 }
 0x4c7   : > { %5247 = vmatpush.bf16.msrb.mxu3 %v7553_v41  ;;  %5223 = vmatpush.bf16.msrb.mxu1 %v7885_v21  ;;  %v7972_v41 = vld [vmem:[%s12651_s12 + $0x670] sm:$0xf]  ;;  %v7217_v21 = vor.u32 %v8424_v16, %v7216_v15  ;;  %v8578_v15 = vld [vmem:[%s12651_s12 + $0x570] sm:$0xf0] }
 0x4c8   : > { %5184 = vmatmul.bf16.vlgmr.msrb.gmra.mxu2 %v11512_v57  ;;  %v7973_v50 = vor.u32 %v8613_v14, %v7972_v41  ;;  %v7832_v14 = vld [vmem:[%s12651_s12 + $0x558] sm:$0xf] }
 0x4c9   : > { %5232 = vmatpush.bf16.msra.mxu2 %v7357_v17  ;;  %5208 = vmatpush.bf16.msra.mxu0 %v7689_v25  ;;  %v3730_v17 = vperm.slane %v12371_v6, 0  ;;  %v8466_v25 = vld [vmem:[%s12651_s12 + $0x1f0] sm:$0xf0] }
 0x4cb   : > { %5248 = vmatpush.bf16.msrb.mxu3 %v7525_v22  ;;  %5224 = vmatpush.bf16.msrb.mxu1 %v7857_v33  ;;  %v4905_v12 = vpop.f32.mrf.mxu2  ;;  %v7384_v22 = vld [vmem:[%s12651_s12 + $0x1d8] sm:$0xf] }
 0x4cc   : > { %v4906_v28 = vadd.f32 %v4905_v12, %v3730_v17  ;;  %v7385_v33 = vor.u32 %v8466_v25, %v7384_v22 }
 0x4cd   : > { %5233 = vmatpush.bf16.msra.mxu2 %v7329_v27  ;;  %5209 = vmatpush.bf16.msra.mxu0 %v7661_v36  ;;  %v7188_v27 = vld [vmem:[%s12651_s12 + $0x50] sm:$0xf]  ;;  %v7916_v36 = vld [vmem:[%s12651_s12 + $0x600] sm:$0xf] }
 0x4ce   : > { %v4920_v45 = vadd.f32 %v4919_v19, %v4906_v28 }
 0x4cf   : > { %5249 = vmatpush.bf16.msrb.mxu3 %v7497_v35  ;;  %5225 = vmatpush.bf16.msrb.mxu1 %v7829_v49  ;;  %v4947_v29 = vpop.f32.mrf.mxu1  ;;  %v7189_v35 = vor.u32 %v8417_v8, %v7188_v27  ;;  %v7917_v49 = vor.u32 %v8599_v43, %v7916_v36 }
 0x4d1   : > { %5234 = vmatpush.bf16.msra.mxu2 %v7301_v54  ;;  %5210 = vmatpush.bf16.msra.mxu0 %v7633_v52  ;;  %v7160_v54 = vld [vmem:[%s12651_s12 + $0x18] sm:$0xf]  ;;  %v8592_v52 = vld [vmem:[%s12651_s12 + $0x5e0] sm:$0xf0] }
 0x4d2   : > { %5226 = vmatmul.bf16.vlgmr.msrb.gmra.mxu1 %v11555_v24  ;;  %v7889_v1 = vor.u32 %v8592_v52, %v7888_v56 }
 0x4d3   : > { %5250 = vmatpush.bf16.msrb.mxu3 %v7469_v37  ;;  %5274 = vmatpush.bf16.msra.mxu1 %v8029_v53  ;;  %v4907_v38 = vpop.f32.mrf.mxu2  ;;  %v7161_v37 = vor.u32 %v8410_v44, %v7160_v54  ;;  %v4921_v53 = vpop.f32.mrf.mxu3 }
 0x4d5   : > { %5235 = vmatpush.bf16.msra.mxu2 %v7273_v42  ;;  %5211 = vmatpush.bf16.msra.mxu0 %v7605_v7  ;;  %v4933_v47 = vpop.f32.mrf.mxu0  ;;  %v4908_v42 = vadd.f32 %v4907_v38, %v3730_v17 }
 0x4d6   : > { %v4934_v48 = vadd.f32 %v4933_v47, %v4920_v45 }
 0x4d7   : > { %5251 = vmatpush.bf16.msrb.mxu3 %v7441_v4  ;;  %5275 = vmatpush.bf16.msra.mxu1 %v8001_v5  ;;  %v4949_v0 = vpop.f32.mrf.mxu1  ;;  %v8585_v4 = vld [vmem:[%s12651_s12 + $0x5a8] sm:$0xf0]  ;;  %v3731_v5 = vperm.slane %v12371_v6, 1  ;;  %v4922_v7 = vadd.f32 %v4921_v53, %v4908_v42 }
 0x4d8   : > { %5212 = vmatmul.bf16.vlgmr.msra.gmra.mxu0 %v11595_v51  ;;  %v4948_v58 = vadd.f32 %v4947_v29, %v4934_v48 }
 0x4d9   : > { %5236 = vmatpush.bf16.msra.mxu2 %v7245_v9  ;;  %5260 = vmatpush.bf16.msrb.mxu0 %v7805_v13  ;;  %v7664_v9 = vld [vmem:[%s12651_s12 + $0x408] sm:$0xf] }
 0x4da   : > { %v8030_v63 = vmul.f32 -1.442695, %v4948_v58  ;;  %v7665_v13 = vor.u32 %v8536_v10, %v7664_v9 }
 0x4db   : > { %5252 = vmatpush.bf16.msrb.mxu3 %v7413_v20  ;;  %5276 = vmatpush.bf16.msra.mxu1 %v7973_v50  ;;  %v4961_v2 = vpop.f32.mrf.mxu2  ;;  %v4975_v61 = vpop.f32.mrf.mxu3  ;;  %v7833_v50 = vor.u32 %v8578_v15, %v7832_v14 }
 0x4dc   : > { %8678 = vpow2.f32 %v8030_v63  ;;  %v4962_v16 = vadd.f32 %v4961_v2, %v3731_v5 }
 0x4dd   : > { %5237 = vmatpush.bf16.msra.mxu2 %v7217_v21  ;;  %5261 = vmatpush.bf16.msrb.mxu0 %v7777_v23  ;;  %v4935_v11 = vpop.f32.mrf.mxu0  ;;  %v8522_v23 = vld [vmem:[%s12651_s12 + $0x3b0] sm:$0xf0] }
 0x4de   : > { %v4936_v41 = vadd.f32 %v4935_v11, %v4922_v7  ;;  %v4976_v25 = vadd.f32 %v4975_v61, %v4962_v16  ;;  %v7609_v29 = vor.u32 %v8522_v23, %v7608_v30 }
 0x4df   : > { %5253 = vmatpush.bf16.msrb.mxu3 %v7385_v33  ;;  %5277 = vmatpush.bf16.msra.mxu1 %v7945_v34  ;;  %v5003_v22 = vpop.f32.mrf.mxu1 }
 0x4e0   : > { %v4950_v17 = vadd.f32 %v4949_v0, %v4936_v41 }
 0x4e1   : > { %5238 = vmatpush.bf16.msra.mxu2 %v7189_v35  ;;  %5262 = vmatpush.bf16.msrb.mxu0 %v7749_v39 }
 0x4e2   : > { %5254 = vmatmul.bf16.vlgmr.msrb.gmra.mxu3 %v11490_v40  ;;  %v7860_v40 = vld [vmem:[%s12651_s12 + $0x590] sm:$0xf]  ;;  %v8679_v19 = vpop.eup %8678  ;;  %v8037_v20 = vmul.f32 -1.442695, %v4950_v17 }
 0x4e3   : > { %5278 = vmatpush.bf16.msra.mxu1 %v7917_v49  ;;  %v7861_v12 = vor.u32 %v8585_v4, %v7860_v40  ;;  %v12487_v26 = vadd.f32 1.0, %v8679_v19  ;;  %v4963_v27 = vpop.f32.mrf.mxu2  ;;  %v4977_v35 = vpop.f32.mrf.mxu3  ;;  %v3732_v49 = vperm.slane %v12371_v6, 2 }
 0x4e4   : > { %8680 = vpow2.f32 %v8037_v20  ;;  %v4964_v31 = vadd.f32 %v4963_v27, %v3731_v5 }
 0x4e5   : > { %5239 = vmatpush.bf16.msra.mxu2 %v7161_v37  ;;  %5263 = vmatpush.bf16.msrb.mxu0 %v7721_v55  ;;  %v4989_v8 = vpop.f32.mrf.mxu0  ;;  %8682 = vrcp.f32 %v12487_v26  ;;  %vm5349_vm3 = vweird.f32 %v12487_v26  ;;  %v5355_v7 = vand.u32 2147483648, %v12487_v26  ;;  %v5353_v11 = vand.u32 2147483647, %v12487_v26 }
 0x4e6   : > { %v4990_v28 = vadd.f32 %v4989_v8, %v4976_v25  ;;  %v4978_v36 = vadd.f32 %v4977_v35, %v4964_v31 }
 0x4e7   : > { %5279 = vmatpush.bf16.msra.mxu1 %v7889_v1  ;;  %v5005_v44 = vpop.f32.mrf.mxu1  ;;  %v5356_v19 = vor.u32 1.1754944e-38, %v5355_v7  ;;  %vm5354_vm8 = vcmp.eq.f32.partialorder %v5353_v11, 8.507059e+37 }
 0x4e8   : > { %5240 = vmatmul.bf16.vlgmr.msra.gmra.mxu2 %v11512_v57  ;;  %v7636_v57 = vld [vmem:[%s12651_s12 + $0x3d0] sm:$0xf]  ;;  %v5004_v32 = vadd.f32 %v5003_v22, %v4990_v28 }
 0x4e9   : > { %5264 = vmatpush.bf16.msrb.mxu0 %v7693_v3  ;;  %v7637_v21 = vor.u32 %v8529_v18, %v7636_v57 }
 0x4ea   : > { %v8681_v33 = vpop.eup %8680  ;;  %v8031_v34 = vmul.f32 -1.442695, %v5004_v32 }
 0x4eb   : > { %5280 = vmatpush.bf16.msra.mxu1 %v7861_v12  ;;  %v12491_v38 = vadd.f32 1.0, %v8681_v33  ;;  %v8683_v54 = vpop.eup %8682  ;;  %v5017_v46 = vpop.f32.mrf.mxu2 }
 0x4ec   : > { %8684 = vpow2.f32 %v8031_v34  ;;  %v5031_v55 = vpop.f32.mrf.mxu3  ;;  %vm5350_vm2 = vweird.f32 %v8683_v54 }
 0x4ed   : > { %5265 = vmatpush.bf16.msrb.mxu0 %v7665_v13  ;;  %v4991_v39 = vpop.f32.mrf.mxu0  ;;  %8686 = vrcp.f32 %v12491_v38  ;;  %vm12508_vm5 = vmor %vm5349_vm3, %vm5350_vm2  ;;  %vm5454_vm11 = vweird.f32 %v12491_v38  ;;  %v5458_v32 = vand.u32 2147483647, %v12491_v38 }
 0x4ee   : > { %v4992_v43 = vadd.f32 %v4991_v39, %v4978_v36 }
 0x4ef   : > { %5281 = vmatpush.bf16.msra.mxu1 %v7833_v50  ;;  %v5059_v5 = vpop.f32.mrf.mxu1  ;;  %vm5459_vm0 = vcmp.eq.f32.partialorder %v5458_v32, 8.507059e+37 }
 0x4f0   : > { %v5006_v45 = vadd.f32 %v5005_v44, %v4992_v43  ;;  %v3733_v43 = vperm.slane %v12371_v6, 3 }
 0x4f1   : > { %5266 = vmatpush.bf16.msrb.mxu0 %v7637_v21 }
 0x4f2   : > { %5282 = vmatmul.bf16.vlgmr.msra.gmra.mxu1 %v11555_v24  ;;  %v8685_v62 = vpop.eup %8684  ;;  %v5345_v24 = vmul.f32 %v8683_v54, %v12487_v26  ;;  %v8038_v47 = vmul.f32 -1.442695, %v5006_v45 }
 0x4f3   : > { %v5331_v48 = vadd.f32 1.0, %v8685_v62  ;;  %v12497_v53 = vpop.eup %8686  ;;  %v5019_v1 = vpop.f32.mrf.mxu2 }
 0x4f4   : > { %8688 = vpow2.f32 %v8038_v47  ;;  %v5346_v37 = vsub.f32 1.0, %v5345_v24  ;;  %v5450_v58 = vmul.f32 %v12497_v53, %v12491_v38  ;;  %v5020_v10 = vadd.f32 %v5019_v1, %v3732_v49  ;;  %v5033_v57 = vpop.f32.mrf.mxu3 }
 0x4f5   : > { %5267 = vmatpush.bf16.msrb.mxu0 %v7609_v29  ;;  %8690 = vrcp.f32 %v5331_v48  ;;  %v5045_v56 = vpop.f32.mrf.mxu0  ;;  %v5370_v9 = vand.u32 2147483648, %v5331_v48  ;;  %v5368_v12 = vand.u32 2147483647, %v5331_v48  ;;  %vm5364_vm6 = vweird.f32 %v5331_v48 }
 0x4f6   : > { %v5347_v42 = vmul.f32 %v8683_v54, %v5346_v37  ;;  %v5451_v40 = vsub.f32 1.0, %v5450_v58  ;;  %v5034_v50 = vadd.f32 %v5033_v57, %v5020_v10  ;;  %vm5455_vm10 = vweird.f32 %v12497_v53 }
 0x4f7   : > { %v5371_v20 = vor.u32 1.1754944e-38, %v5370_v9  ;;  %vm5369_vm9 = vcmp.eq.f32.partialorder %v5368_v12, 8.507059e+37  ;;  %v5460_v29 = vand.u32 2147483648, %v12491_v38  ;;  %v5061_v35 = vpop.f32.mrf.mxu1  ;;  %vm5456_vm13 = vmor %vm5454_vm11, %vm5455_vm10 }
 0x4f8   : > { %5268 = vmatmul.bf16.vlgmr.msrb.gmra.mxu0 %v11595_v51  ;;  %v5018_v51 = vadd.f32 %v5017_v46, %v3732_v49  ;;  %v5348_v3 = vadd.f32 %v8683_v54, %v5347_v42  ;;  %v5452_v16 = vmul.f32 %v12497_v53, %v5451_v40 }
 0x4f9   : > { %v5461_v38 = vor.u32 1.1754944e-38, %v5460_v29 }
 0x4fa   : > { %v8689_v52 = vpop.eup %8688  ;;  %v5032_v63 = vadd.f32 %v5031_v55, %v5018_v51  ;;  %v5352_v15 = vsel %vm12508_vm5, %v8683_v54, %v5348_v3  ;;  %v5453_v27 = vadd.f32 %v12497_v53, %v5452_v16 }
 0x4fb   : > { %v8691_v59 = vpop.eup %8690  ;;  %v12501_v60 = vadd.f32 1.0, %v8689_v52  ;;  %v5357_v25 = vsel %vm5354_vm8, %v5356_v19, %v5352_v15 }
 0x4fc   : > { %v5360_v0 = vmul.f32 %v8691_v59, %v5331_v48  ;;  %v5046_v2 = vadd.f32 %v5045_v56, %v5032_v63  ;;  %vm5365_vm4 = vweird.f32 %v8691_v59  ;;  %v5457_v54 = vsel %vm5456_vm13, %v12497_v53, %v5453_v27 }
 0x4fd   : > { %8692 = vrcp.f32 %v12501_v60  ;;  %v5047_v18 = vpop.f32.mrf.mxu0  ;;  %vm5366_vm7 = vmor %vm5364_vm6, %vm5365_vm4  ;;  %v5475_v31 = vand.u32 2147483648, %v12501_v60  ;;  %v5473_v34 = vand.u32 2147483647, %v12501_v60  ;;  %vm5469_vm14 = vweird.f32 %v12501_v60 }
 0x4fe   : > { %v5361_v4 = vsub.f32 1.0, %v5360_v0  ;;  %v5060_v14 = vadd.f32 %v5059_v5, %v5046_v2  ;;  %v5048_v26 = vadd.f32 %v5047_v18, %v5034_v50  ;;  %v5462_v24 = vsel %vm5459_vm0, %v5461_v38, %v5457_v54 }
 0x4ff   : > { %v5476_v45 = vor.u32 1.1754944e-38, %v5475_v31  ;;  %vm5474_vm1 = vcmp.eq.f32.partialorder %v5473_v34, 8.507059e+37  ;;  %v3734_v27 = vperm.slane %v12371_v6, 4 }
 0x500   : > { %v5362_v41 = vmul.f32 %v8691_v59, %v5361_v4  ;;  %v8032_v23 = vmul.f32 -1.442695, %v5060_v14  ;;  %v5062_v39 = vadd.f32 %v5061_v35, %v5048_v26 }
 0x502   : > { %v5363_v17 = vadd.f32 %v8691_v59, %v5362_v41  ;;  %8694 = vpow2.f32 %v8032_v23  ;;  %v8039_v47 = vmul.f32 -1.442695, %v5062_v39 }
 0x503   : > { %v8693_v61 = vpop.eup %8692 }
 0x504   : > { %v5367_v21 = vsel %vm5366_vm7, %v8691_v59, %v5363_v17  ;;  %v5465_v22 = vmul.f32 %v8693_v61, %v12501_v60  ;;  %vm5470_vm12 = vweird.f32 %v8693_v61  ;;  %8696 = vpow2.f32 %v8039_v47 }
 0x505   : > { %v5372_v30 = vsel %vm5369_vm9, %v5371_v20, %v5367_v21  ;;  %vm5471_vm15 = vmor %vm5469_vm14, %vm5470_vm12  ;;  %v5087_v37 = vpop.f32.mrf.mxu3 }
 0x506   : > { %v5554_v8 = vpack.c.bf16 %v5372_v30, %v5357_v25  ;;  %v5466_v28 = vsub.f32 1.0, %v5465_v22 }
 0x508   : > { %5562 = vst [vmem:[%s12524_s30] sm:$0xff] %v5554_v8  ;;  %v5467_v33 = vmul.f32 %v8693_v61, %v5466_v28  ;;  %v8695_v51 = vpop.eup %8694 }
 0x509   : > { %v5332_v56 = vadd.f32 1.0, %v8695_v51 }
 0x50a   : > { %v5468_v44 = vadd.f32 %v8693_v61, %v5467_v33  ;;  %v8697_v63 = vpop.eup %8696 }
 0x50b   : > { %v5073_v36 = vpop.f32.mrf.mxu2  ;;  %8698 = vrcp.f32 %v5332_v56  ;;  %v12532_v3 = vadd.f32 1.0, %v8697_v63  ;;  %vm5379_vm3 = vweird.f32 %v5332_v56  ;;  %v5385_v21 = vand.u32 2147483648, %v5332_v56 }
 0x50c   : > { %v5472_v62 = vsel %vm5471_vm15, %v8693_v61, %v5468_v44  ;;  %v5074_v48 = vadd.f32 %v5073_v36, %v3733_v43  ;;  %v5383_v25 = vand.u32 2147483647, %v5332_v56 }
 0x50d   : > { %v5477_v46 = vsel %vm5474_vm1, %v5476_v45, %v5472_v62  ;;  %v5089_v1 = vpop.f32.mrf.mxu3  ;;  %v5386_v33 = vor.u32 1.1754944e-38, %v5385_v21  ;;  %vm5484_vm11 = vweird.f32 %v12532_v3  ;;  %v5490_v62 = vand.u32 2147483648, %v12532_v3 }
 0x50e   : > { %v5558_v49 = vpack.c.bf16 %v5477_v46, %v5462_v24  ;;  %v5088_v55 = vadd.f32 %v5087_v37, %v5074_v48  ;;  %vm5384_vm8 = vcmp.eq.f32.partialorder %v5383_v25, 8.507059e+37  ;;  %v5488_v48 = vand.u32 2147483647, %v12532_v3 }
 0x50f   : > { %v5115_v53 = vpop.f32.mrf.mxu1 }
 0x510   : > { %5567 = vst [vmem:[%s12524_s30 + $0x1c] sm:$0xff] %v5558_v49  ;;  %vm5489_vm0 = vcmp.eq.f32.partialorder %v5488_v48, 8.507059e+37 }
 0x511   : > { %v8699_v5 = vpop.eup %8698 }
 0x512   : > { %v5375_v11 = vmul.f32 %v8699_v5, %v5332_v56  ;;  %vm5380_vm2 = vweird.f32 %v8699_v5  ;;  %v5491_v56 = vor.u32 1.1754944e-38, %v5490_v62 }
 0x513   : > { %v5075_v52 = vpop.f32.mrf.mxu2  ;;  %vm12539_vm5 = vmor %vm5379_vm3, %vm5380_vm2 }
 0x514   : > { %v5076_v59 = vadd.f32 %v5075_v52, %v3733_v43  ;;  %v5376_v13 = vsub.f32 1.0, %v5375_v11 }
 0x515   : > { %v5101_v42 = vpop.f32.mrf.mxu0 }
 0x516   : > { %v5102_v58 = vadd.f32 %v5101_v42, %v5088_v55  ;;  %v5090_v2 = vadd.f32 %v5089_v1, %v5076_v59  ;;  %v5377_v16 = vmul.f32 %v8699_v5, %v5376_v13 }
 0x517   : > { %v5117_v7 = vpop.f32.mrf.mxu1 }
 0x518   : > { %v5116_v60 = vadd.f32 %v5115_v53, %v5102_v58  ;;  %v5378_v19 = vadd.f32 %v8699_v5, %v5377_v16 }
 0x51a   : > { %v8033_v0 = vmul.f32 -1.442695, %v5116_v60  ;;  %v5382_v28 = vsel %vm12539_vm5, %v8699_v5, %v5378_v19 }
 0x51b   : > { %v5387_v39 = vsel %vm5384_vm8, %v5386_v33, %v5382_v28 }
 0x51c   : > { %8700 = vpow2.f32 %v8033_v0 }
 0x51d   : > { %v5103_v40 = vpop.f32.mrf.mxu0  ;;  %8702 = vrcp.f32 %v12532_v3 }
 0x51e   : > { %v5104_v4 = vadd.f32 %v5103_v40, %v5090_v2 }
 0x520   : > { %v5118_v9 = vadd.f32 %v5117_v7, %v5104_v4 }
 0x522   : > { %v8701_v10 = vpop.eup %8700  ;;  %v8040_v41 = vmul.f32 -1.442695, %v5118_v9 }
 0x523   : > { %v5333_v12 = vadd.f32 1.0, %v8701_v10  ;;  %v12535_v14 = vpop.eup %8702 }
 0x524   : > { %8704 = vpow2.f32 %v8040_v41  ;;  %v5480_v17 = vmul.f32 %v12535_v14, %v12532_v3  ;;  %vm5485_vm10 = vweird.f32 %v12535_v14 }
 0x525   : > { %8706 = vrcp.f32 %v5333_v12  ;;  %v5400_v22 = vand.u32 2147483648, %v5333_v12  ;;  %v5398_v23 = vand.u32 2147483647, %v5333_v12  ;;  %vm5394_vm6 = vweird.f32 %v5333_v12  ;;  %v5143_v46 = vpop.f32.mrf.mxu3  ;;  %vm5486_vm13 = vmor %vm5484_vm11, %vm5485_vm10 }
 0x526   : > { %v5481_v20 = vsub.f32 1.0, %v5480_v17 }
 0x527   : > { %v5401_v34 = vor.u32 1.1754944e-38, %v5400_v22  ;;  %vm5399_vm9 = vcmp.eq.f32.partialorder %v5398_v23, 8.507059e+37 }
 0x528   : > { %v5482_v29 = vmul.f32 %v12535_v14, %v5481_v20 }
 0x52a   : > { %v8705_v15 = vpop.eup %8704  ;;  %v5483_v54 = vadd.f32 %v12535_v14, %v5482_v29 }
 0x52b   : > { %v8707_v57 = vpop.eup %8706  ;;  %v5340_v18 = vadd.f32 1.0, %v8705_v15  ;;  %v5129_v8 = vpop.f32.mrf.mxu2 }
 0x52c   : > { %v5390_v61 = vmul.f32 %v8707_v57, %v5333_v12  ;;  %vm5395_vm4 = vweird.f32 %v8707_v57  ;;  %v5130_v45 = vadd.f32 %v5129_v8, %v3734_v27  ;;  %v5487_v51 = vsel %vm5486_vm13, %v12535_v14, %v5483_v54 }
 0x52d   : > { %8708 = vrcp.f32 %v5340_v18  ;;  %vm5396_vm7 = vmor %vm5394_vm6, %vm5395_vm4  ;;  %v5505_v24 = vand.u32 2147483648, %v5340_v18  ;;  %v5503_v37 = vand.u32 2147483647, %v5340_v18  ;;  %vm5499_vm14 = vweird.f32 %v5340_v18  ;;  %v5145_v40 = vpop.f32.mrf.mxu3 }
 0x52e   : > { %v5391_v50 = vsub.f32 1.0, %v5390_v61  ;;  %v5144_v55 = vadd.f32 %v5143_v46, %v5130_v45  ;;  %v5492_v60 = vsel %vm5489_vm0, %v5491_v56, %v5487_v51  ;;  %v3735_v12 = vperm.slane %v12371_v6, 5 }
 0x52f   : > { %v5506_v52 = vor.u32 1.1754944e-38, %v5505_v24  ;;  %vm5504_vm1 = vcmp.eq.f32.partialorder %v5503_v37, 8.507059e+37  ;;  %v5171_v0 = vpop.f32.mrf.mxu1  ;;  %v3736_v54 = vperm.slane %v12371_v6, 6 }
 0x530   : > { %v5392_v30 = vmul.f32 %v8707_v57, %v5391_v50 }
 0x532   : > { %v5393_v31 = vadd.f32 %v8707_v57, %v5392_v30 }
 0x533   : > { %v8709_v32 = vpop.eup %8708  ;;  %v5131_v42 = vpop.f32.mrf.mxu2 }
 0x534   : > { %v5397_v35 = vsel %vm5396_vm7, %v8707_v57, %v5393_v31  ;;  %v5495_v36 = vmul.f32 %v8709_v32, %v5340_v18  ;;  %vm5500_vm12 = vweird.f32 %v8709_v32  ;;  %v5132_v2 = vadd.f32 %v5131_v42, %v3734_v27 }
 0x535   : > { %v5402_v43 = vsel %vm5399_vm9, %v5401_v34, %v5397_v35  ;;  %v5157_v47 = vpop.f32.mrf.mxu0  ;;  %vm5501_vm15 = vmor %vm5499_vm14, %vm5500_vm12 }
 0x536   : > { %v5555_v44 = vpack.c.bf16 %v5402_v43, %v5387_v39  ;;  %v5496_v38 = vsub.f32 1.0, %v5495_v36  ;;  %v5158_v59 = vadd.f32 %v5157_v47, %v5144_v55  ;;  %v5146_v5 = vadd.f32 %v5145_v40, %v5132_v2 }
 0x537   : > { %v5173_v10 = vpop.f32.mrf.mxu1 }
 0x538   : > { %5563 = vst [vmem:[%s12524_s30 + $0x8] sm:$0xff] %v5555_v44  ;;  %v5497_v49 = vmul.f32 %v8709_v32, %v5496_v38  ;;  %v5172_v3 = vadd.f32 %v5171_v0, %v5158_v59 }
 0x53a   : > { %v5498_v53 = vadd.f32 %v8709_v32, %v5497_v49  ;;  %v8034_v7 = vmul.f32 -1.442695, %v5172_v3 }
 0x53c   : > { %v5502_v58 = vsel %vm5501_vm15, %v8709_v32, %v5498_v53  ;;  %8710 = vpow2.f32 %v8034_v7 }
 0x53d   : > { %v5507_v63 = vsel %vm5504_vm1, %v5506_v52, %v5502_v58  ;;  %v5159_v4 = vpop.f32.mrf.mxu0 }
 0x53e   : > { %v5559_v1 = vpack.c.bf16 %v5507_v63, %v5492_v60  ;;  %v5160_v9 = vadd.f32 %v5159_v4, %v5146_v5 }
 0x540   : > { %5568 = vst [vmem:[%s12524_s30 + $0x24] sm:$0xff] %v5559_v1  ;;  %v5174_v41 = vadd.f32 %v5173_v10, %v5160_v9 }
 0x542   : > { %v8041_v13 = vmul.f32 -1.442695, %v5174_v41  ;;  %v8711_v16 = vpop.eup %8710 }
 0x543   : > { %v12558_v18 = vadd.f32 1.0, %v8711_v16 }
 0x544   : > { %8712 = vpow2.f32 %v8041_v13 }
 0x545   : > { %v5199_v15 = vpop.f32.mrf.mxu3  ;;  %8714 = vrcp.f32 %v12558_v18  ;;  %vm5409_vm3 = vweird.f32 %v12558_v18  ;;  %v5415_v6 = vand.u32 2147483648, %v12558_v18  ;;  %v5413_v55 = vand.u32 2147483647, %v12558_v18 }
 0x547   : > { %v5416_v40 = vor.u32 1.1754944e-38, %v5415_v6  ;;  %vm5414_vm8 = vcmp.eq.f32.partialorder %v5413_v55, 8.507059e+37 }
 0x54a   : > { %v8713_v22 = vpop.eup %8712 }
 0x54b   : > { %v5185_v11 = vpop.f32.mrf.mxu2  ;;  %v12561_v26 = vadd.f32 1.0, %v8713_v22  ;;  %v8715_v28 = vpop.eup %8714 }
 0x54c   : > { %v5186_v14 = vadd.f32 %v5185_v11, %v3735_v12  ;;  %v5405_v33 = vmul.f32 %v8715_v28, %v12558_v18  ;;  %vm5410_vm2 = vweird.f32 %v8715_v28 }
 0x54d   : > { %v5201_v30 = vpop.f32.mrf.mxu3  ;;  %vm12576_vm5 = vmor %vm5409_vm3, %vm5410_vm2  ;;  %vm5514_vm11 = vweird.f32 %v12561_v26  ;;  %v5520_v16 = vand.u32 2147483648, %v12561_v26  ;;  %v5518_v18 = vand.u32 2147483647, %v12561_v26 }
 0x54e   : > { %v5200_v57 = vadd.f32 %v5199_v15, %v5186_v14  ;;  %v5406_v36 = vsub.f32 1.0, %v5405_v33 }
 0x54f   : > { %v5227_v17 = vpop.f32.mrf.mxu1  ;;  %vm5519_vm0 = vcmp.eq.f32.partialorder %v5518_v18, 8.507059e+37 }
 0x550   : > { %v5407_v38 = vmul.f32 %v8715_v28, %v5406_v36 }
 0x552   : > { %v5408_v48 = vadd.f32 %v8715_v28, %v5407_v38 }
 0x553   : > { %v5187_v61 = vpop.f32.mrf.mxu2 }
 0x554   : > { %v5188_v50 = vadd.f32 %v5187_v61, %v3735_v12  ;;  %v5412_v60 = vsel %vm12576_vm5, %v8715_v28, %v5408_v48 }
 0x555   : > { %v5213_v19 = vpop.f32.mrf.mxu0  ;;  %v5417_v10 = vsel %vm5414_vm8, %v5416_v40, %v5412_v60 }
 0x556   : > { %v5214_v20 = vadd.f32 %v5213_v19, %v5200_v57  ;;  %v5202_v23 = vadd.f32 %v5201_v30, %v5188_v50 }
 0x557   : > { %v5229_v29 = vpop.f32.mrf.mxu1 }
 0x558   : > { %v5228_v21 = vadd.f32 %v5227_v17, %v5214_v20 }
 0x55a   : > { %v8035_v25 = vmul.f32 -1.442695, %v5228_v21 }
 0x55c   : > { %8716 = vpow2.f32 %v8035_v25 }
 0x55d   : > { %v5215_v27 = vpop.f32.mrf.mxu0  ;;  %8718 = vrcp.f32 %v12561_v26 }
 0x55e   : > { %v5216_v8 = vadd.f32 %v5215_v27, %v5202_v23  ;;  %v5521_v23 = vor.u32 1.1754944e-38, %v5520_v16 }
 0x560   : > { %v5230_v31 = vadd.f32 %v5229_v29, %v5216_v8 }
 0x562   : > { %v8717_v32 = vpop.eup %8716  ;;  %v8042_v34 = vmul.f32 -1.442695, %v5230_v31 }
 0x563   : > { %v5335_v35 = vadd.f32 1.0, %v8717_v32  ;;  %v12565_v39 = vpop.eup %8718 }
 0x564   : > { %8720 = vpow2.f32 %v8042_v34  ;;  %v5510_v45 = vmul.f32 %v12565_v39, %v12561_v26  ;;  %vm5515_vm10 = vweird.f32 %v12565_v39 }
 0x565   : > { %8722 = vrcp.f32 %v5335_v35  ;;  %v5255_v51 = vpop.f32.mrf.mxu3  ;;  %v5430_v53 = vand.u32 2147483648, %v5335_v35  ;;  %v5428_v52 = vand.u32 2147483647, %v5335_v35  ;;  %vm5424_vm6 = vweird.f32 %v5335_v35  ;;  %vm12592_vm13 = vmor %vm5514_vm11, %vm5515_vm10 }
 0x566   : > { %v5511_v49 = vsub.f32 1.0, %v5510_v45 }
 0x567   : > { %v5431_v4 = vor.u32 1.1754944e-38, %v5430_v53  ;;  %vm5429_vm9 = vcmp.eq.f32.partialorder %v5428_v52, 8.507059e+37 }
 0x568   : > { %v5512_v63 = vmul.f32 %v12565_v39, %v5511_v49 }
 0x56a   : > { %v8721_v44 = vpop.eup %8720  ;;  %v5513_v13 = vadd.f32 %v12565_v39, %v5512_v63 }
 0x56b   : > { %v5241_v43 = vpop.f32.mrf.mxu2  ;;  %v8723_v62 = vpop.eup %8722  ;;  %v12570_v24 = vadd.f32 1.0, %v8721_v44 }
 0x56c   : > { %v5420_v46 = vmul.f32 %v8723_v62, %v5335_v35  ;;  %v5242_v47 = vadd.f32 %v5241_v43, %v3736_v54  ;;  %vm5425_vm4 = vweird.f32 %v8723_v62  ;;  %v5517_v22 = vsel %vm12592_vm13, %v12565_v39, %v5513_v13 }
 0x56d   : > { %8724 = vrcp.f32 %v12570_v24  ;;  %vm5426_vm7 = vmor %vm5424_vm6, %vm5425_vm4  ;;  %v5535_v17 = vand.u32 2147483648, %v12570_v24  ;;  %v5533_v19 = vand.u32 2147483647, %v12570_v24  ;;  %v5257_v20 = vpop.f32.mrf.mxu3  ;;  %vm5529_vm14 = vweird.f32 %v12570_v24 }
 0x56e   : > { %v5421_v37 = vsub.f32 1.0, %v5420_v46  ;;  %v5256_v59 = vadd.f32 %v5255_v51, %v5242_v47  ;;  %v5522_v29 = vsel %vm5519_vm0, %v5521_v23, %v5517_v22  ;;  %vm5565_vm6 = vcmask 125952  }
 0x56f   : > { %v5283_v58 = vpop.f32.mrf.mxu1  ;;  %v5536_v26 = vor.u32 1.1754944e-38, %v5535_v17  ;;  %vm5534_vm1 = vcmp.eq.f32.partialorder %v5533_v19, 8.507059e+37 }
 0x570   : > { %v5422_v56 = vmul.f32 %v8723_v62, %v5421_v37 }
 0x572   : > { %v5423_v0 = vadd.f32 %v8723_v62, %v5422_v56 }
 0x573   : > { %v5243_v1 = vpop.f32.mrf.mxu2  ;;  %v8725_v3 = vpop.eup %8724 }
 0x574   : > { %v5427_v7 = vsel %vm5426_vm7, %v8723_v62, %v5423_v0  ;;  %v5525_v9 = vmul.f32 %v8725_v3, %v12570_v24  ;;  %v5244_v41 = vadd.f32 %v5243_v1, %v3736_v54  ;;  %vm5530_vm12 = vweird.f32 %v8725_v3 }
 0x575   : > { %v5269_v2 = vpop.f32.mrf.mxu0  ;;  %v5432_v11 = vsel %vm5429_vm9, %v5431_v4, %v5427_v7  ;;  %vm5531_vm15 = vmor %vm5529_vm14, %vm5530_vm12 }
 0x576   : > { %v5270_v5 = vadd.f32 %v5269_v2, %v5256_v59  ;;  %v5556_v14 = vpack.c.bf16 %v5432_v11, %v5417_v10  ;;  %v5526_v15 = vsub.f32 1.0, %v5525_v9  ;;  %v5258_v21 = vadd.f32 %v5257_v20, %v5244_v41 }
 0x577   : > { %v5285_v28 = vpop.f32.mrf.mxu1 }
 0x578   : > { %v5284_v12 = vadd.f32 %v5283_v58, %v5270_v5  ;;  %5564 = vst [vmem:[%s12524_s30 + $0x10] sm:$0xff] %v5556_v14  ;;  %v5527_v61 = vmul.f32 %v8725_v3, %v5526_v15 }
 0x57a   : > { %v8036_v57 = vmul.f32 -1.442695, %v5284_v12  ;;  %v5528_v25 = vadd.f32 %v8725_v3, %v5527_v61 }
 0x57c   : > { %8726 = vpow2.f32 %v8036_v57  ;;  %v5532_v8 = vsel %vm5531_vm15, %v8725_v3, %v5528_v25 }
 0x57d   : > { %v5271_v30 = vpop.f32.mrf.mxu0  ;;  %v5537_v31 = vsel %vm5534_vm1, %v5536_v26, %v5532_v8 }
 0x57e   : > { %v5272_v27 = vadd.f32 %v5271_v30, %v5258_v21  ;;  %v5560_v33 = vpack.c.bf16 %v5537_v31, %v5522_v29 }
 0x580   : > { %v5286_v32 = vadd.f32 %v5285_v28, %v5272_v27  ;;  %5569 = vst [vmem:[%s12524_s30 + $0x2c] sm:$0xff] %v5560_v33 }
 0x582   : > { %v8727_v34 = vpop.eup %8726  ;;  %v8043_v35 = vmul.f32 -1.442695, %v5286_v32 }
 0x583   : > { %v5336_v36 = vadd.f32 1.0, %v8727_v34 }
 0x584   : > { %8728 = vpow2.f32 %v8043_v35 }
 0x585   : > { %8730 = vrcp.f32 %v5336_v36  ;;  %v5445_v45 = vand.u32 2147483648, %v5336_v36  ;;  %v5443_v24 = vand.u32 2147483647, %v5336_v36  ;;  %vm5439_vm3 = vweird.f32 %v5336_v36 }
 0x587   : > { %v5446_v48 = vor.u32 1.1754944e-38, %v5445_v45  ;;  %vm5444_vm5 = vcmp.eq.f32.partialorder %v5443_v24, 8.507059e+37 }
 0x58a   : > { %v8729_v39 = vpop.eup %8728 }
 0x58b   : > { %v8731_v43 = vpop.eup %8730  ;;  %v5343_v54 = vadd.f32 1.0, %v8729_v39 }
 0x58c   : > { %v5435_v44 = vmul.f32 %v8731_v43, %v5336_v36  ;;  %vm5440_vm2 = vweird.f32 %v8731_v43 }
 0x58d   : > { %8732 = vrcp.f32 %v5343_v54  ;;  %vm5441_vm4 = vmor %vm5439_vm3, %vm5440_vm2  ;;  %v5550_v55 = vand.u32 2147483648, %v5343_v54  ;;  %v5548_v52 = vand.u32 2147483647, %v5343_v54  ;;  %vm5544_vm8 = vweird.f32 %v5343_v54 }
 0x58e   : > { %v5436_v38 = vsub.f32 1.0, %v5435_v44 }
 0x58f   : > { %v5551_v58 = vor.u32 1.1754944e-38, %v5550_v55  ;;  %vm5549_vm10 = vcmp.eq.f32.partialorder %v5548_v52, 8.507059e+37 }
 0x590   : > { %v5437_v62 = vmul.f32 %v8731_v43, %v5436_v38 }
 0x592   : > { %v5438_v46 = vadd.f32 %v8731_v43, %v5437_v62 }
 0x593   : > { %v8733_v47 = vpop.eup %8732 }
 0x594   : > { %v5442_v49 = vsel %vm5441_vm4, %v8731_v43, %v5438_v46  ;;  %v5540_v37 = vmul.f32 %v8733_v47, %v5343_v54  ;;  %vm5545_vm7 = vweird.f32 %v8733_v47 }
 0x595   : > { %v5447_v51 = vsel %vm5444_vm5, %v5446_v48, %v5442_v49  ;;  %vm5546_vm9 = vmor %vm5544_vm8, %vm5545_vm7 }
 0x596   : > { %v5557_v6 = vpack.c.bf16 %v5447_v51, %v5447_v51  ;;  %v5541_v53 = vsub.f32 1.0, %v5540_v37 }
 0x598   : > { %5566 = vst.msk [vmem:[%s12524_s30 + $0x18] sm:$0xf] %vm5565_vm6, %v5557_v6  ;;  %v5542_v56 = vmul.f32 %v8733_v47, %v5541_v53 }
 0x59a   : > { %v5543_v42 = vadd.f32 %v8733_v47, %v5542_v56 }
 0x59c   : > { %v5547_v59 = vsel %vm5546_vm9, %v8733_v47, %v5543_v42 }
 0x59d   : > { %v5552_v60 = vsel %vm5549_vm10, %v5551_v58, %v5547_v59 }
 0x59e   : > { %v5561_v63 = vpack.c.bf16 %v5552_v60, %v5552_v60 }
 0x5a0   : > { %5570 = vst.msk [vmem:[%s12524_s30 + $0x34] sm:$0xf] %vm5565_vm6, %v5561_v63 }
 0x5a1   : > { %8761 = shalt.err (!%p8758_p3)
}
 0x5a2   : > { %s8799_s23 = smov 448   ;;  %s8800_s30 = smov 28  }
 0x5a3   : > { %8631 = dma.vmem_to_hbm [thread:$0]  (%p8919_p5), %s5593_s22, 896, %s5595_s26, %s5574_s16, %s8799_s23, %s8799_s23, %s8800_s30  }
 0x5a4 PF: > { %s12685_s29 = sld [smem:[#allocation7_spill]] }
 0x5a5   : > { %s12686_s28 = sld [smem:[#allocation5_spill]] }
 0x5aa   : > { %p8637_p4 = scmp.ge.s32.totalorder %s12685_s29, 2 }
 0x5ab   : > { %s5613_s21 = sand.u32 1, %s12686_s28  }
 0x5ac   : > { %p8634_p7 = pnand %p8637_p4, %p8923_p6  ;;  %s5614_s0 = scalar_lea.sflag [#allocation3], %s5613_s21 }
 0x5ae   : > { %p8635_p8 = pneg %p8634_p7 }
 0x5b0   : > { %8779 = dma.done.wait (%p8635_p8), %s5614_s0, 896  }
 0x5b1   : > { %8781 = vsyncadd (%p8635_p8), %s5614_s0, 4294966400  ;;  %s12688_s21 = sld [smem:[#allocation8_spill]]  ;;  %s12691_s18 = smov %s8788_s19 }
 0x5b2   : > { %s12689_s17 = sld [smem:[#allocation6_spill]] }
 0x5b3   : > { %s12690_s20 = sld [smem:[#allocation9_spill]] }
 0x5b7   : > { %p26_p9 = scmp.ge.s32.totalorder %s12688_s21, 4  }
 0x5b8   : > { %s12692_s19 = smov %s12689_s17 }
 0x5b9   :  { %28 = sbr.rel (!%p26_p9) target bundleno = 6 (0x6), region = 126 }
 0x5be   :  { %5628 = vsyncpa [#allocation3], 1 }
 0x5bf   :  { %5630 = vsyncpa [#allocation3 + $0x1], 1 }

</bundles_post_ra>
